<compile_context>
chip_gen: v7x
topology: tpu7x:2x2x1
jax: 0.10.0
libtpu: 0.0.40
codegen_flags: <defaults>
</compile_context>

<pallas_src>
import jax
import jax.numpy as jnp
import numpy as np
from jax import lax
from jax.experimental import pallas as pl
from jax.experimental.pallas import tpu as pltpu

# ----- module hyper-parameters -----
N_IN, N_OUT = 4, 8
KT, KH, KW = 3, 3, 3
DIL_T, DIL_H, DIL_W = 2, 1, 1
PAD_T = (KT - 1) * DIL_T          # 4  (chomped causal temporal padding)
PAD_H = ((KH - 1) // 2) * DIL_H   # 1  ("same" spatial padding)
PAD_W = ((KW - 1) // 2) * DIL_W   # 1
NTAP = KT * KH * KW               # 27
# stride = 1 on all dims (standard TCN).
# TODO(synk): nn.Dropout3d(p=0.2) is identity in eval mode; train-mode channel
# dropout is not implemented here.


def _make_kernel(T, H, W, C_in, C_out):
    HW = H * W
    LT = T * HW                     # output lanes, flattened (t, y, x)
    LP = (T + PAD_T) * HW           # temporally left-padded lanes (4 zero frames)

    def kernel(xcol_ref, a_ref, w2_ref, b_ref, m_ref, out_ref,
               hcol_ref, res_ref):
        # xcol_ref: (1, NTAP*C_in, LT)    wrapper-side im2col of x (lane-dense)
        # a_ref   : (2*C_out, NTAP*C_in)  [conv1 ; fused 1x1x1 downsample]
        # w2_ref  : (KT, C_out, KH*KW*C_out)
        # b_ref   : (3*C_out, 1)          [b1 ; b2 ; bd]
        # m_ref   : (KH*KW, LP)           0/1 spatial border mask per tap
        # out_ref : (1, C_out, LT)        lane-dense output
        # hcol_ref: (KH*KW*C_out, LP)     spatial im2col of relu1 (temp. padded)
        # res_ref : (C_out, LT)           downsample residual (+ bd)

        # ---- conv1 + fused downsample: ONE (2C,108)@(108,T*HW) MXU matmul ----
        pre = jnp.dot(a_ref[...], xcol_ref[0],
                      preferred_element_type=jnp.float32)            # (2C, LT)
        res_ref[...] = pre[C_out:] + b_ref[2 * C_out:, :]            # ds(x)+bd
        h = jnp.maximum(pre[:C_out] + b_ref[:C_out, :], 0.0)         # relu1

        # centre spatial tap block of the temporally zero-padded im2col buffer
        jc = (PAD_H // DIL_H) * KW + (PAD_W // DIL_W)
        r0 = jc * C_out
        hcol_ref[r0:r0 + C_out, :PAD_T * HW] = jnp.zeros(
            (C_out, PAD_T * HW), jnp.float32)
        hcol_ref[r0:r0 + C_out, PAD_T * HW:] = h

        # ---- remaining 8 spatial taps: roll on the flat lane axis + mask ----
        for kh in range(KH):
            for kw in range(KW):
                dy = kh * DIL_H - PAD_H
                dx = kw * DIL_W - PAD_W
                s = dy * W + dx
                if s == 0:
                    continue                      # centre already written
                j = kh * KW + kw
                hp = hcol_ref[r0:r0 + C_out, :]   # (C, LP), reload -> low vregs
                # blk[:, q] = hp[:, q+s] when (y+dy, x+dx) in-bounds, else 0
                blk = pltpu.roll(hp, (-s) % LP, axis=1) * m_ref[j:j + 1, :]
                hcol_ref[j * C_out:(j + 1) * C_out, :] = blk

        # ---- conv2: 3 lane-batched K=72 matmuls (one per causal temporal tap;
        #      zero pad frames implement Chomp3d), + b2, relu2, residual, relu --
        acc = jnp.dot(w2_ref[0], hcol_ref[:, :LT],
                      preferred_element_type=jnp.float32)
        for kt in range(1, KT):
            off = kt * DIL_T * HW
            acc = acc + jnp.dot(w2_ref[kt], hcol_ref[:, off:off + LT],
                                preferred_element_type=jnp.float32)
        o2 = jnp.maximum(acc + b_ref[C_out:2 * C_out, :], 0.0)       # relu2
        out_ref[0] = jnp.maximum(o2 + res_ref[...], 0.0).astype(out_ref.dtype)

    return kernel


def _spatial_masks(T, H, W):
    """0/1 border masks for the 9 spatial taps over the padded lane axis."""
    HW = H * W
    LP = (T + PAD_T) * HW
    q = np.arange(LP)
    yy = (q // W) % H
    xx = q % W
    rows = []
    for kh in range(KH):
        for kw in range(KW):
            dy = kh * DIL_H - PAD_H
            dx = kw * DIL_W - PAD_W
            m = np.ones(LP, np.float32)
            if dy < 0:
                m = m * (yy >= -dy)
            if dy > 0:
                m = m * (yy < H - dy)
            if dx < 0:
                m = m * (xx >= -dx)
            if dx > 0:
                m = m * (xx < W - dx)
            rows.append(m.astype(np.float32))
    return jnp.asarray(np.stack(rows, axis=0))        # (9, LP)


def temporal_block(x_ncdhw, params):
    """x_ncdhw: (N, C_in, T, H, W) float32 -> (N, C_out, T, H, W) float32."""
    N, C_in, T, H, W = x_ncdhw.shape
    HW = H * W
    LT = T * HW
    LP = (T + PAD_T) * HW
    C_out = params["w2"].shape[1]

    # --- wrapper-side layout plumbing (no FLOPs): causal/spatial pad + im2col,
    #     rows ordered (tap, c_in), lanes flattened (t, y, x) -> lane-dense.
    x_pad = jnp.pad(
        x_ncdhw, ((0, 0), (0, 0), (PAD_T, 0), (PAD_H, PAD_H), (PAD_W, PAD_W)))
    cols = [x_pad[:, :,
                  kt * DIL_T:kt * DIL_T + T,
                  kh * DIL_H:kh * DIL_H + H,
                  kw * DIL_W:kw * DIL_W + W]
            for kt in range(KT) for kh in range(KH) for kw in range(KW)]
    xcol = jnp.stack(cols, axis=1).reshape(N, NTAP * C_in, LT)
    masks = _spatial_masks(T, H, W)

    flops = 2 * N * LT * (2 * C_out * NTAP * C_in + C_out * KT * KH * KW * C_out)
    bytes_acc = 4 * (xcol.size + N * C_out * LT + masks.size +
                     params["a"].size + params["w2"].size + params["b"].size)

    out = pl.pallas_call(
        _make_kernel(T, H, W, C_in, C_out),
        out_shape=jax.ShapeDtypeStruct((N, C_out, LT), x_ncdhw.dtype),
        grid_spec=pltpu.PrefetchScalarGridSpec(
            num_scalar_prefetch=0,
            grid=(N,),
            in_specs=[
                pl.BlockSpec((1, NTAP * C_in, LT), lambda n: (n, 0, 0)),
                pl.BlockSpec((2 * C_out, NTAP * C_in), lambda n: (0, 0)),
                pl.BlockSpec((KT, C_out, KH * KW * C_out), lambda n: (0, 0, 0)),
                pl.BlockSpec((3 * C_out, 1), lambda n: (0, 0)),
                pl.BlockSpec((KH * KW, LP), lambda n: (0, 0)),
            ],
            out_specs=pl.BlockSpec((1, C_out, LT), lambda n: (n, 0, 0)),
            scratch_shapes=[
                pltpu.VMEM((KH * KW * C_out, LP), jnp.float32),  # hcol (im2col)
                pltpu.VMEM((C_out, LT), jnp.float32),            # residual
            ],
        ),
        compiler_params=pltpu.CompilerParams(
            dimension_semantics=("parallel",)),
        cost_estimate=pl.CostEstimate(
            flops=int(flops), transcendentals=0, bytes_accessed=int(bytes_acc)),
    )(xcol, params["a"], params["w2"], params["b"], masks)

    # (N, C_out, T*H*W) is already channel-major -> NCDHW via a free reshape.
    return out.reshape(N, C_out, T, H, W)


def pack_params(w1, b1, w2, b2, wd, bd):
    """Fold torch-layout (O,I,KT,KH,KW) weights into the kernel's matrices."""
    C_out, C_in = w1.shape[0], w1.shape[1]
    # conv1: columns ordered (kt, kh, kw, c_in) to match the im2col rows.
    a1 = jnp.transpose(w1, (0, 2, 3, 4, 1)).reshape(C_out, NTAP * C_in)
    # fused 1x1x1 downsample: non-zero only at the tap that reads unpadded
    # x(t, y, x).  (Assumes the divisibility below — true for this config.)
    assert PAD_T % DIL_T == 0 and PAD_H % DIL_H == 0 and PAD_W % DIL_W == 0
    centre = (PAD_T // DIL_T) * KH * KW + (PAD_H // DIL_H) * KW + (PAD_W // DIL_W)
    a_ds = jnp.zeros((C_out, NTAP, C_in), w1.dtype)
    a_ds = a_ds.at[:, centre, :].set(wd.reshape(C_out, C_in))
    a = jnp.concatenate([a1, a_ds.reshape(C_out, NTAP * C_in)], axis=0)
    # conv2: per temporal tap, columns ordered (kh, kw, c) to match hcol rows.
    w2r = jnp.transpose(w2, (2, 0, 3, 4, 1)).reshape(KT, C_out, KH * KW * C_out)
    # biases kept SEPARATE: relu2 must see b2 before the residual add.
    b = jnp.concatenate([b1, b2, bd]).reshape(3 * C_out, 1)
    return {"a": a, "w2": w2r, "b": b}


# ----------------- pure-JAX reference (for self-check) -----------------
def reference(x, w1, b1, w2, b2, wd, bd):
    dn = ("NCDHW", "OIDHW", "NCDHW")

    def conv(inp, w, b, dil):
        y = lax.conv_general_dilated(
            inp, w, window_strides=(1, 1, 1),
            padding=[(PAD_T, PAD_T), (PAD_H, PAD_H), (PAD_W, PAD_W)],
            rhs_dilation=dil, dimension_numbers=dn)
        return y + b[None, :, None, None, None]

    o = conv(x, w1, b1, (DIL_T, DIL_H, DIL_W))[:, :, :-PAD_T]   # chomp1
    o = jnp.maximum(o, 0.0)                                     # relu1
    o = conv(o, w2, b2, (DIL_T, DIL_H, DIL_W))[:, :, :-PAD_T]   # chomp2
    o = jnp.maximum(o, 0.0)                                     # relu2
    res = lax.conv_general_dilated(
        x, wd, window_strides=(1, 1, 1), padding=[(0, 0)] * 3,
        dimension_numbers=dn) + bd[None, :, None, None, None]
    return jnp.maximum(o + res, 0.0)


if __name__ == "__main__":
    key = jax.random.PRNGKey(0)
    ks = jax.random.split(key, 8)

    N, T, H, W = 2, 8, 16, 16
    x = jax.random.normal(ks[0], (N, N_IN, T, H, W), jnp.float32)

    def weight_norm_effective(k, shape):
        # weight_norm(Conv3d): w = g * v / ||v||_2 over dims (1,2,3,4), dim=0;
        # g is initialized to ||v|| at wrap time, so the effective weight == v.
        v = 0.01 * jax.random.normal(k, shape, jnp.float32)
        norm = jnp.sqrt(jnp.sum(v * v, axis=(1, 2, 3, 4), keepdims=True))
        return norm * v / norm

    w1 = weight_norm_effective(ks[1], (N_OUT, N_IN, KT, KH, KW))   # OIDHW
    w2 = weight_norm_effective(ks[2], (N_OUT, N_OUT, KT, KH, KW))
    wd = 0.01 * jax.random.normal(ks[3], (N_OUT, N_IN, 1, 1, 1), jnp.float32)
    b1 = 0.05 * jax.random.normal(ks[4], (N_OUT,), jnp.float32)
    b2 = 0.05 * jax.random.normal(ks[5], (N_OUT,), jnp.float32)
    bd = 0.05 * jax.random.normal(ks[6], (N_OUT,), jnp.float32)

    params = pack_params(w1, b1, w2, b2, wd, bd)

    out = jax.block_until_ready(temporal_block(x, params))
    assert out.shape == (N, N_OUT, T, H, W), out.shape

    ref = reference(x, w1, b1, w2, b2, wd, bd)
    max_err = float(jnp.max(jnp.abs(out - ref)))
    assert jnp.allclose(out, ref, atol=1e-4, rtol=1e-4), max_err

    print("KERNEL_OK")
</pallas_src>

<mosaic_0001>
module attributes {stable_mosaic.version = 11 : i64} {
  func.func @kernel(%arg0: i32, %arg1: memref<1x108x2048xf32, #tpu.memory_space<vmem>>, %arg2: memref<16x108xf32, #tpu.memory_space<vmem>>, %arg3: memref<3x8x72xf32, #tpu.memory_space<vmem>>, %arg4: memref<24x1xf32, #tpu.memory_space<vmem>>, %arg5: memref<9x3072xf32, #tpu.memory_space<vmem>>, %arg6: memref<1x8x2048xf32, #tpu.memory_space<vmem>>, %arg7: memref<72x3072xf32, #tpu.memory_space<vmem>>, %arg8: memref<8x2048xf32, #tpu.memory_space<vmem>>) attributes {dimension_semantics = [#tpu.dimension_semantics<parallel>], iteration_bounds = array<i64: 2>, scalar_prefetch = 0 : i64, scratch_operands = 2 : i64, tpu.core_type = #tpu.core_type<tc>, window_params = [{transform_indices = @transform_0, window_bounds = array<i64: 1, 108, 2048>}, {pipeline_mode = #tpu.pipeline_mode<synchronous>, transform_indices = @transform_1, window_bounds = array<i64: 16, 108>}, {pipeline_mode = #tpu.pipeline_mode<synchronous>, transform_indices = @transform_2, window_bounds = array<i64: 3, 8, 72>}, {pipeline_mode = #tpu.pipeline_mode<synchronous>, transform_indices = @transform_3, window_bounds = array<i64: 24, 1>}, {pipeline_mode = #tpu.pipeline_mode<synchronous>, transform_indices = @transform_4, window_bounds = array<i64: 9, 3072>}, {transform_indices = @transform_5, window_bounds = array<i64: 1, 8, 2048>}]} {
    %c0 = arith.constant 0 : index
    %c0_0 = arith.constant 0 : index
    %0 = vector.load %arg2[%c0, %c0_0] : memref<16x108xf32, #tpu.memory_space<vmem>>, vector<16x108xf32>
    %c0_1 = arith.constant 0 : index
    %c0_2 = arith.constant 0 : index
    %c0_3 = arith.constant 0 : index
    %1 = vector.load %arg1[%c0_1, %c0_2, %c0_3] : memref<1x108x2048xf32, #tpu.memory_space<vmem>>, vector<1x108x2048xf32>
    %2 = vector.shape_cast %1 : vector<1x108x2048xf32> to vector<108x2048xf32>
    %cst = arith.constant dense<0.000000e+00> : vector<16x2048xf32>
    %3 = tpu.matmul %0, %2, %cst {dimension_numbers = #tpu.dot_dimension_numbers<[1], [0], [0], [1], [0, 0, 1, 1], [], []>} : vector<16x108xf32>, vector<108x2048xf32>, vector<16x2048xf32> -> vector<16x2048xf32>
    %4 = vector.extract_strided_slice %3 {offsets = [8, 0], sizes = [8, 2048], strides = [1, 1]} : vector<16x2048xf32> to vector<8x2048xf32>
    %c16 = arith.constant 16 : index
    %c0_4 = arith.constant 0 : index
    %5 = vector.load %arg4[%c16, %c0_4] : memref<24x1xf32, #tpu.memory_space<vmem>>, vector<8x1xf32>
    %6 = vector.broadcast %5 : vector<8x1xf32> to vector<8x2048xf32>
    %7 = arith.addf %4, %6 : vector<8x2048xf32>
    %c0_5 = arith.constant 0 : index
    %c0_6 = arith.constant 0 : index
    %8 = vector.load %arg8[%c0_5, %c0_6] : memref<8x2048xf32, #tpu.memory_space<vmem>>, vector<8x2048xf32>
    tpu.vector_store %arg8[%c0_5, %c0_6], %7 {strides = array<i32>} : memref<8x2048xf32, #tpu.memory_space<vmem>>, vector<8x2048xf32>,
    %9 = vector.extract_strided_slice %3 {offsets = [0, 0], sizes = [8, 2048], strides = [1, 1]} : vector<16x2048xf32> to vector<8x2048xf32>
    %c0_7 = arith.constant 0 : index
    %c0_8 = arith.constant 0 : index
    %10 = vector.load %arg4[%c0_7, %c0_8] : memref<24x1xf32, #tpu.memory_space<vmem>>, vector<8x1xf32>
    %11 = vector.broadcast %10 : vector<8x1xf32> to vector<8x2048xf32>
    %12 = arith.addf %9, %11 : vector<8x2048xf32>
    %cst_9 = arith.constant 0.000000e+00 : f32
    %13 = vector.broadcast %cst_9 : f32 to vector<8x2048xf32>
    %14 = arith.maximumf %12, %13 : vector<8x2048xf32>
    %cst_10 = arith.constant 0.000000e+00 : f32
    %15 = vector.broadcast %cst_10 : f32 to vector<8x1024xf32>
    %c32 = arith.constant 32 : index
    %c0_11 = arith.constant 0 : index
    %16 = vector.load %arg7[%c32, %c0_11] : memref<72x3072xf32, #tpu.memory_space<vmem>>, vector<8x1024xf32>
    tpu.vector_store %arg7[%c32, %c0_11], %15 {strides = array<i32>} : memref<72x3072xf32, #tpu.memory_space<vmem>>, vector<8x1024xf32>,
    %c32_12 = arith.constant 32 : index
    %c1024 = arith.constant 1024 : index
    %17 = vector.load %arg7[%c32_12, %c1024] : memref<72x3072xf32, #tpu.memory_space<vmem>>, vector<8x2048xf32>
    tpu.vector_store %arg7[%c32_12, %c1024], %14 {strides = array<i32>} : memref<72x3072xf32, #tpu.memory_space<vmem>>, vector<8x2048xf32>,
    %c32_13 = arith.constant 32 : index
    %c0_14 = arith.constant 0 : index
    %18 = vector.load %arg7[%c32_13, %c0_14] : memref<72x3072xf32, #tpu.memory_space<vmem>>, vector<8x3072xf32>
    %c17_i32 = arith.constant 17 : i32
    %19 = tpu.dynamic_rotate %18 by %c17_i32 dim 1 : vector<8x3072xf32>, i32 -> vector<8x3072xf32>
    %c0_15 = arith.constant 0 : index
    %c0_16 = arith.constant 0 : index
    %20 = vector.load %arg5[%c0_15, %c0_16] : memref<9x3072xf32, #tpu.memory_space<vmem>>, vector<1x3072xf32>
    %21 = vector.broadcast %20 : vector<1x3072xf32> to vector<8x3072xf32>
    %22 = arith.mulf %19, %21 : vector<8x3072xf32>
    %c0_17 = arith.constant 0 : index
    %c0_18 = arith.constant 0 : index
    %23 = vector.load %arg7[%c0_17, %c0_18] : memref<72x3072xf32, #tpu.memory_space<vmem>>, vector<8x3072xf32>
    tpu.vector_store %arg7[%c0_17, %c0_18], %22 {strides = array<i32>} : memref<72x3072xf32, #tpu.memory_space<vmem>>, vector<8x3072xf32>,
    %c32_19 = arith.constant 32 : index
    %c0_20 = arith.constant 0 : index
    %24 = vector.load %arg7[%c32_19, %c0_20] : memref<72x3072xf32, #tpu.memory_space<vmem>>, vector<8x3072xf32>
    %c16_i32 = arith.constant 16 : i32
    %25 = tpu.dynamic_rotate %24 by %c16_i32 dim 1 : vector<8x3072xf32>, i32 -> vector<8x3072xf32>
    %c1 = arith.constant 1 : index
    %c0_21 = arith.constant 0 : index
    %26 = vector.load %arg5[%c1, %c0_21] : memref<9x3072xf32, #tpu.memory_space<vmem>>, vector<1x3072xf32>
    %27 = vector.broadcast %26 : vector<1x3072xf32> to vector<8x3072xf32>
    %28 = arith.mulf %25, %27 : vector<8x3072xf32>
    %c8 = arith.constant 8 : index
    %c0_22 = arith.constant 0 : index
    %29 = vector.load %arg7[%c8, %c0_22] : memref<72x3072xf32, #tpu.memory_space<vmem>>, vector<8x3072xf32>
    tpu.vector_store %arg7[%c8, %c0_22], %28 {strides = array<i32>} : memref<72x3072xf32, #tpu.memory_space<vmem>>, vector<8x3072xf32>,
    %c32_23 = arith.constant 32 : index
    %c0_24 = arith.constant 0 : index
    %30 = vector.load %arg7[%c32_23, %c0_24] : memref<72x3072xf32, #tpu.memory_space<vmem>>, vector<8x3072xf32>
    %c15_i32 = arith.constant 15 : i32
    %31 = tpu.dynamic_rotate %30 by %c15_i32 dim 1 : vector<8x3072xf32>, i32 -> vector<8x3072xf32>
    %c2 = arith.constant 2 : index
    %c0_25 = arith.constant 0 : index
    %32 = vector.load %arg5[%c2, %c0_25] : memref<9x3072xf32, #tpu.memory_space<vmem>>, vector<1x3072xf32>
    %33 = vector.broadcast %32 : vector<1x3072xf32> to vector<8x3072xf32>
    %34 = arith.mulf %31, %33 : vector<8x3072xf32>
    %c16_26 = arith.constant 16 : index
    %c0_27 = arith.constant 0 : index
    %35 = vector.load %arg7[%c16_26, %c0_27] : memref<72x3072xf32, #tpu.memory_space<vmem>>, vector<8x3072xf32>
    tpu.vector_store %arg7[%c16_26, %c0_27], %34 {strides = array<i32>} : memref<72x3072xf32, #tpu.memory_space<vmem>>, vector<8x3072xf32>,
    %c32_28 = arith.constant 32 : index
    %c0_29 = arith.constant 0 : index
    %36 = vector.load %arg7[%c32_28, %c0_29] : memref<72x3072xf32, #tpu.memory_space<vmem>>, vector<8x3072xf32>
    %c1_i32 = arith.constant 1 : i32
    %37 = tpu.dynamic_rotate %36 by %c1_i32 dim 1 : vector<8x3072xf32>, i32 -> vector<8x3072xf32>
    %c3 = arith.constant 3 : index
    %c0_30 = arith.constant 0 : index
    %38 = vector.load %arg5[%c3, %c0_30] : memref<9x3072xf32, #tpu.memory_space<vmem>>, vector<1x3072xf32>
    %39 = vector.broadcast %38 : vector<1x3072xf32> to vector<8x3072xf32>
    %40 = arith.mulf %37, %39 : vector<8x3072xf32>
    %c24 = arith.constant 24 : index
    %c0_31 = arith.constant 0 : index
    %41 = vector.load %arg7[%c24, %c0_31] : memref<72x3072xf32, #tpu.memory_space<vmem>>, vector<8x3072xf32>
    tpu.vector_store %arg7[%c24, %c0_31], %40 {strides = array<i32>} : memref<72x3072xf32, #tpu.memory_space<vmem>>, vector<8x3072xf32>,
    %c32_32 = arith.constant 32 : index
    %c0_33 = arith.constant 0 : index
    %42 = vector.load %arg7[%c32_32, %c0_33] : memref<72x3072xf32, #tpu.memory_space<vmem>>, vector<8x3072xf32>
    %c3071_i32 = arith.constant 3071 : i32
    %43 = tpu.dynamic_rotate %42 by %c3071_i32 dim 1 : vector<8x3072xf32>, i32 -> vector<8x3072xf32>
    %c5 = arith.constant 5 : index
    %c0_34 = arith.constant 0 : index
    %44 = vector.load %arg5[%c5, %c0_34] : memref<9x3072xf32, #tpu.memory_space<vmem>>, vector<1x3072xf32>
    %45 = vector.broadcast %44 : vector<1x3072xf32> to vector<8x3072xf32>
    %46 = arith.mulf %43, %45 : vector<8x3072xf32>
    %c40 = arith.constant 40 : index
    %c0_35 = arith.constant 0 : index
    %47 = vector.load %arg7[%c40, %c0_35] : memref<72x3072xf32, #tpu.memory_space<vmem>>, vector<8x3072xf32>
    tpu.vector_store %arg7[%c40, %c0_35], %46 {strides = array<i32>} : memref<72x3072xf32, #tpu.memory_space<vmem>>, vector<8x3072xf32>,
    %c32_36 = arith.constant 32 : index
    %c0_37 = arith.constant 0 : index
    %48 = vector.load %arg7[%c32_36, %c0_37] : memref<72x3072xf32, #tpu.memory_space<vmem>>, vector<8x3072xf32>
    %c3057_i32 = arith.constant 3057 : i32
    %49 = tpu.dynamic_rotate %48 by %c3057_i32 dim 1 : vector<8x3072xf32>, i32 -> vector<8x3072xf32>
    %c6 = arith.constant 6 : index
    %c0_38 = arith.constant 0 : index
    %50 = vector.load %arg5[%c6, %c0_38] : memref<9x3072xf32, #tpu.memory_space<vmem>>, vector<1x3072xf32>
    %51 = vector.broadcast %50 : vector<1x3072xf32> to vector<8x3072xf32>
    %52 = arith.mulf %49, %51 : vector<8x3072xf32>
    %c48 = arith.constant 48 : index
    %c0_39 = arith.constant 0 : index
    %53 = vector.load %arg7[%c48, %c0_39] : memref<72x3072xf32, #tpu.memory_space<vmem>>, vector<8x3072xf32>
    tpu.vector_store %arg7[%c48, %c0_39], %52 {strides = array<i32>} : memref<72x3072xf32, #tpu.memory_space<vmem>>, vector<8x3072xf32>,
    %c32_40 = arith.constant 32 : index
    %c0_41 = arith.constant 0 : index
    %54 = vector.load %arg7[%c32_40, %c0_41] : memref<72x3072xf32, #tpu.memory_space<vmem>>, vector<8x3072xf32>
    %c3056_i32 = arith.constant 3056 : i32
    %55 = tpu.dynamic_rotate %54 by %c3056_i32 dim 1 : vector<8x3072xf32>, i32 -> vector<8x3072xf32>
    %c7 = arith.constant 7 : index
    %c0_42 = arith.constant 0 : index
    %56 = vector.load %arg5[%c7, %c0_42] : memref<9x3072xf32, #tpu.memory_space<vmem>>, vector<1x3072xf32>
    %57 = vector.broadcast %56 : vector<1x3072xf32> to vector<8x3072xf32>
    %58 = arith.mulf %55, %57 : vector<8x3072xf32>
    %c56 = arith.constant 56 : index
    %c0_43 = arith.constant 0 : index
    %59 = vector.load %arg7[%c56, %c0_43] : memref<72x3072xf32, #tpu.memory_space<vmem>>, vector<8x3072xf32>
    tpu.vector_store %arg7[%c56, %c0_43], %58 {strides = array<i32>} : memref<72x3072xf32, #tpu.memory_space<vmem>>, vector<8x3072xf32>,
    %c32_44 = arith.constant 32 : index
    %c0_45 = arith.constant 0 : index
    %60 = vector.load %arg7[%c32_44, %c0_45] : memref<72x3072xf32, #tpu.memory_space<vmem>>, vector<8x3072xf32>
    %c3055_i32 = arith.constant 3055 : i32
    %61 = tpu.dynamic_rotate %60 by %c3055_i32 dim 1 : vector<8x3072xf32>, i32 -> vector<8x3072xf32>
    %c8_46 = arith.constant 8 : index
    %c0_47 = arith.constant 0 : index
    %62 = vector.load %arg5[%c8_46, %c0_47] : memref<9x3072xf32, #tpu.memory_space<vmem>>, vector<1x3072xf32>
    %63 = vector.broadcast %62 : vector<1x3072xf32> to vector<8x3072xf32>
    %64 = arith.mulf %61, %63 : vector<8x3072xf32>
    %c64 = arith.constant 64 : index
    %c0_48 = arith.constant 0 : index
    %65 = vector.load %arg7[%c64, %c0_48] : memref<72x3072xf32, #tpu.memory_space<vmem>>, vector<8x3072xf32>
    tpu.vector_store %arg7[%c64, %c0_48], %64 {strides = array<i32>} : memref<72x3072xf32, #tpu.memory_space<vmem>>, vector<8x3072xf32>,
    %c0_49 = arith.constant 0 : index
    %c0_50 = arith.constant 0 : index
    %c0_51 = arith.constant 0 : index
    %66 = vector.load %arg3[%c0_49, %c0_50, %c0_51] : memref<3x8x72xf32, #tpu.memory_space<vmem>>, vector<1x8x72xf32>
    %67 = vector.shape_cast %66 : vector<1x8x72xf32> to vector<8x72xf32>
    %c0_52 = arith.constant 0 : index
    %c0_53 = arith.constant 0 : index
    %68 = vector.load %arg7[%c0_52, %c0_53] : memref<72x3072xf32, #tpu.memory_space<vmem>>, vector<72x2048xf32>
    %cst_54 = arith.constant dense<0.000000e+00> : vector<8x2048xf32>
    %69 = tpu.matmul %67, %68, %cst_54 {dimension_numbers = #tpu.dot_dimension_numbers<[1], [0], [0], [1], [0, 0, 1, 1], [], []>} : vector<8x72xf32>, vector<72x2048xf32>, vector<8x2048xf32> -> vector<8x2048xf32>
    %c1_55 = arith.constant 1 : index
    %c0_56 = arith.constant 0 : index
    %c0_57 = arith.constant 0 : index
    %70 = vector.load %arg3[%c1_55, %c0_56, %c0_57] : memref<3x8x72xf32, #tpu.memory_space<vmem>>, vector<1x8x72xf32>
    %71 = vector.shape_cast %70 : vector<1x8x72xf32> to vector<8x72xf32>
    %c0_58 = arith.constant 0 : index
    %c512 = arith.constant 512 : index
    %72 = vector.load %arg7[%c0_58, %c512] : memref<72x3072xf32, #tpu.memory_space<vmem>>, vector<72x2048xf32>
    %cst_59 = arith.constant dense<0.000000e+00> : vector<8x2048xf32>
    %73 = tpu.matmul %71, %72, %cst_59 {dimension_numbers = #tpu.dot_dimension_numbers<[1], [0], [0], [1], [0, 0, 1, 1], [], []>} : vector<8x72xf32>, vector<72x2048xf32>, vector<8x2048xf32> -> vector<8x2048xf32>
    %74 = arith.addf %69, %73 : vector<8x2048xf32>
    %c2_60 = arith.constant 2 : index
    %c0_61 = arith.constant 0 : index
    %c0_62 = arith.constant 0 : index
    %75 = vector.load %arg3[%c2_60, %c0_61, %c0_62] : memref<3x8x72xf32, #tpu.memory_space<vmem>>, vector<1x8x72xf32>
    %76 = vector.shape_cast %75 : vector<1x8x72xf32> to vector<8x72xf32>
    %c0_63 = arith.constant 0 : index
    %c1024_64 = arith.constant 1024 : index
    %77 = vector.load %arg7[%c0_63, %c1024_64] : memref<72x3072xf32, #tpu.memory_space<vmem>>, vector<72x2048xf32>
    %cst_65 = arith.constant dense<0.000000e+00> : vector<8x2048xf32>
    %78 = tpu.matmul %76, %77, %cst_65 {dimension_numbers = #tpu.dot_dimension_numbers<[1], [0], [0], [1], [0, 0, 1, 1], [], []>} : vector<8x72xf32>, vector<72x2048xf32>, vector<8x2048xf32> -> vector<8x2048xf32>
    %79 = arith.addf %74, %78 : vector<8x2048xf32>
    %c8_66 = arith.constant 8 : index
    %c0_67 = arith.constant 0 : index
    %80 = vector.load %arg4[%c8_66, %c0_67] : memref<24x1xf32, #tpu.memory_space<vmem>>, vector<8x1xf32>
    %81 = vector.broadcast %80 : vector<8x1xf32> to vector<8x2048xf32>
    %82 = arith.addf %79, %81 : vector<8x2048xf32>
    %cst_68 = arith.constant 0.000000e+00 : f32
    %83 = vector.broadcast %cst_68 : f32 to vector<8x2048xf32>
    %84 = arith.maximumf %82, %83 : vector<8x2048xf32>
    %c0_69 = arith.constant 0 : index
    %c0_70 = arith.constant 0 : index
    %85 = vector.load %arg8[%c0_69, %c0_70] : memref<8x2048xf32, #tpu.memory_space<vmem>>, vector<8x2048xf32>
    %86 = arith.addf %84, %85 : vector<8x2048xf32>
    %cst_71 = arith.constant 0.000000e+00 : f32
    %87 = vector.broadcast %cst_71 : f32 to vector<8x2048xf32>
    %88 = arith.maximumf %86, %87 : vector<8x2048xf32>
    %c0_72 = arith.constant 0 : index
    %c0_73 = arith.constant 0 : index
    %c0_74 = arith.constant 0 : index
    %89 = vector.load %arg6[%c0_72, %c0_73, %c0_74] : memref<1x8x2048xf32, #tpu.memory_space<vmem>>, vector<1x8x2048xf32>
    %90 = vector.shape_cast %89 : vector<1x8x2048xf32> to vector<8x2048xf32>
    %91 = vector.shape_cast %88 : vector<8x2048xf32> to vector<1x8x2048xf32>
    tpu.vector_store %arg6[%c0_72, %c0_73, %c0_74], %91 {strides = array<i32>} : memref<1x8x2048xf32, #tpu.memory_space<vmem>>, vector<1x8x2048xf32>,
    return
  }
  func.func @transform_0(%arg0: i32) -> (i32, i32, i32) {
    %c0_i32 = arith.constant 0 : i32
    %c0_i32_0 = arith.constant 0 : i32
    %c0_i32_1 = arith.constant 0 : i32
    return %arg0, %c0_i32, %c0_i32_0 : i32, i32, i32
  }
  func.func @transform_1(%arg0: i32) -> (i32, i32) {
    %c0_i32 = arith.constant 0 : i32
    %c0_i32_0 = arith.constant 0 : i32
    %c0_i32_1 = arith.constant 0 : i32
    return %c0_i32, %c0_i32_0 : i32, i32
  }
  func.func @transform_2(%arg0: i32) -> (i32, i32, i32) {
    %c0_i32 = arith.constant 0 : i32
    %c0_i32_0 = arith.constant 0 : i32
    %c0_i32_1 = arith.constant 0 : i32
    %c0_i32_2 = arith.constant 0 : i32
    return %c0_i32, %c0_i32_0, %c0_i32_1 : i32, i32, i32
  }
  func.func @transform_3(%arg0: i32) -> (i32, i32) {
    %c0_i32 = arith.constant 0 : i32
    %c0_i32_0 = arith.constant 0 : i32
    %c0_i32_1 = arith.constant 0 : i32
    return %c0_i32, %c0_i32_0 : i32, i32
  }
  func.func @transform_4(%arg0: i32) -> (i32, i32) {
    %c0_i32 = arith.constant 0 : i32
    %c0_i32_0 = arith.constant 0 : i32
    %c0_i32_1 = arith.constant 0 : i32
    return %c0_i32, %c0_i32_0 : i32, i32
  }
  func.func @transform_5(%arg0: i32) -> (i32, i32, i32) {
    %c0_i32 = arith.constant 0 : i32
    %c0_i32_0 = arith.constant 0 : i32
    %c0_i32_1 = arith.constant 0 : i32
    return %arg0, %c0_i32, %c0_i32_0 : i32, i32, i32
  }
}

</mosaic_0001>

<bundles_post_ra>
// kernel: tpu_custom_call.1
= control target key start
LH: loop header
LB: loop body
LE: loop exit
PB: predicated region body
PF: predicated region fallthrough
CT: control target
= control target key end

     0   :  { %10 = vsyncpa [#allocation5], 0  ;;  %s9817_s0 = inlined_call_operand.vmem [shape: f32[2,108,2048], index: 0, kind: input, shape index: {}]   ;;  %s9818_s1 = inlined_call_operand.vmem [shape: f32[16,108], index: 1, kind: input, shape index: {}]   ;;  %s9819_s2 = inlined_call_operand.vmem [shape: f32[3,8,72], index: 2, kind: input, shape index: {}]   ;;  %s9820_s3 = inlined_call_operand.vmem [shape: f32[24,1], index: 3, kind: input, shape index: {}]   ;;  %s9821_s4 = inlined_call_operand.vmem [shape: f32[9,3072], index: 4, kind: input, shape index: {}]   ;;  %s9822_s5 = inlined_call_operand.hbm [shape: f32[2,8,2048], index: 5, kind: output, shape index: {}]  }
   0x1   :  { %12 = vsyncpa [#allocation5 + $0x1], 0  ;;  %s6769_s18 = smov 0   ;;  %s6771_s19 = smov 0  }
   0x2   :  { %s6773_s20 = smov 0   ;;  %s6775_s21 = smov 0  }
   0x3 LB: > { %s6790_s22 = sadd.s32 4294967295, %s6725_s21   ;;  %s5697_s23 = sadd.s32 4294967294, %s6725_s21   ;;  %s6725_s21 = sphi %s6775_s21, %s10474_s21   ;;  %s6721_s20 = sphi %s6773_s20, %s10473_s20   ;;  %s6717_s19 = sphi %s6771_s19, %s10472_s19   ;;  %s6713_s18 = sphi %s6769_s18, %s10471_s18  }
   0x4   : > { %s6794_s24 = sadd.s32 1, %s6725_s21   ;;  %s135_s25 = sadd.s32 1, %s6721_s20 }
   0x5   : > { %s132_s26 = ssub.s32 %s6725_s21, %s6794_s24  ;;  %p145_p0 = scmp.ne.s32.totalorder %s6721_s20, %s6717_s19 }
   0x6   : > { %p133_p1 = scmp.eq.s32.totalorder %s132_s26, 0  ;;  %p146_p2 = scmp.eq.s32.totalorder %s6790_s22, 1 }
   0x7   : > { %p151_p3 = scmp.ne.s32.totalorder %s6717_s19, %s6713_s18  ;;  %p152_p4 = scmp.eq.s32.totalorder %s5697_s23, 1 }
   0x8   : > { %s6805_s27 = scalar_select %p133_p1, %s6721_s20, %s135_s25  }
   0x9   : > { %p6807_p5 = por %p146_p2, %p145_p0  ;;  %p6811_p6 = por %p152_p4, %p151_p3 }
   0xa   : > { %p5700_p7 = scmp.ge.s32.totalorder %s6725_s21, 1  ;;  %p190_p8 = scmp.lt.s32.totalorder %s6725_s21, 3 }
   0xc   : > { %p191_p9 = pnand %p5700_p7, %p190_p8 }
   0xe   : > { %194 = sbr.rel (%p191_p9) target bundleno = 981 (0x3d5), region = 40 }
  0x15   : > { %p218_p10 = scmp.lt.s32.totalorder %s6790_s22, 1  ;;  %v9832_v0 = vmov 0.0   ;;  %v1159_v1 = vld [vmem:[%s9820_s3] sm:$0xff]  ;;  %v6728_v2 = vmov 0   ;;  %s6729_s9 = smov 17   ;;  %vm456_vm0 = vcmask 1043456  }
  0x16   : > { %569 = vmatprep.mubr.f32.mxu0 %v9832_v0  ;;  %646 = vmatprep.mubr.f32.mxu1 %v9832_v0  ;;  %s6730_s13 = smov 16   ;;  %s6731_s14 = smov 15   ;;  %vm6733_vm1 = vmmov 1   ;;  %vm449_vm3 = vcmask 883712   ;;  %vm3645_vm12 = vcmask 588800  }
  0x17   : > { %s219_s7 = scalar_select %p218_p10, %s6790_s22, 1  ;;  %6520 = vset.pattern.permute.xlu0 %v6728_v2  ;;  %6527 = vrot.lane.b32.xlu1 %v9832_v0, %s6729_s9  ;;  %vm6903_vm2 = vmpackc.low %vm456_vm0, %vm6733_vm1 }
  0x18   : > { %1162 = vperm.xlu0 %6520, %v1159_v1   ;;  %6661 = vset.pattern.permute.xlu1 %v6728_v2  ;;  %s6732_s15 = smov 1   ;;  %s6734_s16 = smov 127  }
  0x19   : > { %s6469_s8 = smul.u32 1792, %s219_s7  ;;  %s6735_s17 = smov 113  }
  0x1a   : > { %s6736_s26 = smov 112   ;;  %s6737_s7 = smov 111  }
  0x1b   : > { %s6829_s12 = scalar_lea.vmem %s9817_s0, %s6469_s8  ;;  %6532 = vrot.lane.b32.xlu1 %v9832_v0, %s6730_s13  ;;  %s215_s25 = sand.u32 1, %s6717_s19  }
  0x1c   : > { %v226_v3 = vld [vmem:[%s6829_s12 + $0x8] sm:$0xff]  ;;  %v228_v5 = vld [vmem:[%s6829_s12 + $0x18] sm:$0xff]  ;;  %6522 = vrot.lane.b32.xlu0 %v9832_v0, %s6729_s9  ;;  %v225_v8 = vld [vmem:[%s6829_s12] sm:$0xff]  ;;  %s5701_s30 = sshll.u32 %s215_s25, 7  ;;  %s5812_s6 = sshll.u32 %s6790_s22, 11 }
  0x1d   : > { %v242_v4 = vld [vmem:[%s6829_s12 + $0x88] sm:$0xff]  ;;  %v244_v7 = vld [vmem:[%s6829_s12 + $0x98] sm:$0xff]  ;;  %v241_v9 = vld [vmem:[%s6829_s12 + $0x80] sm:$0xff]  ;;  %s5624_s22 = scalar_lea.sflag [#allocation5], %s215_s25 }
  0x1e   : > { %v5813_v6 = vpack.c.bf16 %v242_v4, %v226_v3  ;;  %v5843_v10 = vpack.c.bf16 %v244_v7, %v228_v5  ;;  %v5815_v11 = vpack.c.bf16 %v241_v9, %v225_v8  ;;  %v227_v12 = vld [vmem:[%s6829_s12 + $0x10] sm:$0xff]  ;;  %v258_v14 = vld [vmem:[%s6829_s12 + $0x108] sm:$0xff]  ;;  %v260_v17 = vld [vmem:[%s6829_s12 + $0x118] sm:$0xff] }
  0x1f   : > { %v243_v13 = vld [vmem:[%s6829_s12 + $0x90] sm:$0xff]  ;;  %v274_v16 = vld [vmem:[%s6829_s12 + $0x188] sm:$0xff]  ;;  %v276_v18 = vld [vmem:[%s6829_s12 + $0x198] sm:$0xff]  ;;  %1251 = vrot.lane.b32.xlu1 %v9832_v0, %s6729_s9 }
  0x20   : > { %5814 = vmatprep.subr.bf16.mxu0 %v5813_v6  ;;  %v5845_v15 = vpack.c.bf16 %v243_v13, %v227_v12  ;;  %5844 = vmatprep.subr.bf16.mxu1 %v5843_v10  ;;  %v5817_v19 = vpack.c.bf16 %v274_v16, %v258_v14  ;;  %v5847_v20 = vpack.c.bf16 %v276_v18, %v260_v17  ;;  %v257_v21 = vld [vmem:[%s6829_s12 + $0x100] sm:$0xff]  ;;  %v259_v23 = vld [vmem:[%s6829_s12 + $0x110] sm:$0xff]  ;;  %v290_v26 = vld [vmem:[%s6829_s12 + $0x208] sm:$0xff] }
  0x21   : > { %5816 = vmatpush1.bf16.msra.mxu0 %v5815_v11  ;;  %v273_v22 = vld [vmem:[%s6829_s12 + $0x180] sm:$0xff]  ;;  %v275_v25 = vld [vmem:[%s6829_s12 + $0x190] sm:$0xff]  ;;  %v306_v27 = vld [vmem:[%s6829_s12 + $0x288] sm:$0xff]  ;;  %6537 = vrot.lane.b32.xlu0 %v9832_v0, %s6730_s13 }
  0x22   : > { %5846 = vmatpush1.bf16.msra.mxu1 %v5845_v15  ;;  %v5819_v24 = vpack.c.bf16 %v273_v22, %v257_v21  ;;  %5818 = vmatprep.subr.bf16.mxu0 %v5817_v19  ;;  %v5849_v28 = vpack.c.bf16 %v275_v25, %v259_v23  ;;  %v5821_v29 = vpack.c.bf16 %v306_v27, %v290_v26  ;;  %v292_v30 = vld [vmem:[%s6829_s12 + $0x218] sm:$0xff]  ;;  %v289_v32 = vld [vmem:[%s6829_s12 + $0x200] sm:$0xff]  ;;  %v291_v35 = vld [vmem:[%s6829_s12 + $0x210] sm:$0xff] }
  0x23   : > { %5848 = vmatprep.subr.bf16.mxu1 %v5847_v20  ;;  %v308_v31 = vld [vmem:[%s6829_s12 + $0x298] sm:$0xff]  ;;  %v305_v34 = vld [vmem:[%s6829_s12 + $0x280] sm:$0xff]  ;;  %v307_v36 = vld [vmem:[%s6829_s12 + $0x290] sm:$0xff]  ;;  %6542 = vrot.lane.b32.xlu1 %v9832_v0, %s6731_s14 }
  0x24   : > { %v5851_v33 = vpack.c.bf16 %v308_v31, %v292_v30  ;;  %v5823_v37 = vpack.c.bf16 %v305_v34, %v289_v32  ;;  %v322_v38 = vld [vmem:[%s6829_s12 + $0x308] sm:$0xff]  ;;  %v324_v40 = vld [vmem:[%s6829_s12 + $0x318] sm:$0xff]  ;;  %v5853_v41 = vpack.c.bf16 %v307_v36, %v291_v35  ;;  %v321_v44 = vld [vmem:[%s6829_s12 + $0x300] sm:$0xff] }
  0x25   : > { %5820 = vmatpush1.bf16.msra.mxu0 %v5819_v24  ;;  %v338_v39 = vld [vmem:[%s6829_s12 + $0x388] sm:$0xff]  ;;  %v340_v43 = vld [vmem:[%s6829_s12 + $0x398] sm:$0xff]  ;;  %v337_v45 = vld [vmem:[%s6829_s12 + $0x380] sm:$0xff]  ;;  %1532 = vrot.lane.b32.xlu0 %v9832_v0, %s6730_s13 }
  0x26   : > { %5850 = vmatpush1.bf16.msra.mxu1 %v5849_v28  ;;  %5822 = vmatprep.subr.bf16.mxu0 %v5821_v29  ;;  %v5825_v42 = vpack.c.bf16 %v338_v39, %v322_v38  ;;  %v5855_v46 = vpack.c.bf16 %v340_v43, %v324_v40  ;;  %v323_v47 = vld [vmem:[%s6829_s12 + $0x310] sm:$0xff]  ;;  %v354_v49 = vld [vmem:[%s6829_s12 + $0x408] sm:$0xff]  ;;  %v356_v51 = vld [vmem:[%s6829_s12 + $0x418] sm:$0xff]  ;;  %v5827_v53 = vpack.c.bf16 %v337_v45, %v321_v44 }
  0x27   : > { %5852 = vmatprep.subr.bf16.mxu1 %v5851_v33  ;;  %v339_v48 = vld [vmem:[%s6829_s12 + $0x390] sm:$0xff]  ;;  %v370_v50 = vld [vmem:[%s6829_s12 + $0x488] sm:$0xff]  ;;  %v372_v52 = vld [vmem:[%s6829_s12 + $0x498] sm:$0xff]  ;;  %6552 = vrot.lane.b32.xlu1 %v9832_v0, %s6732_s15 }
  0x28   : > { %v5857_v54 = vpack.c.bf16 %v339_v48, %v323_v47  ;;  %v5829_v55 = vpack.c.bf16 %v370_v50, %v354_v49  ;;  %v353_v56 = vld [vmem:[%s6829_s12 + $0x400] sm:$0xff]  ;;  %v355_v58 = vld [vmem:[%s6829_s12 + $0x410] sm:$0xff]  ;;  %v5859_v59 = vpack.c.bf16 %v372_v52, %v356_v51  ;;  %v386_v61 = vld [vmem:[%s6829_s12 + $0x508] sm:$0xff] }
  0x29   : > { %5824 = vmatpush1.bf16.msra.mxu0 %v5823_v37  ;;  %v369_v57 = vld [vmem:[%s6829_s12 + $0x480] sm:$0xff]  ;;  %v371_v60 = vld [vmem:[%s6829_s12 + $0x490] sm:$0xff]  ;;  %v402_v62 = vld [vmem:[%s6829_s12 + $0x588] sm:$0xff]  ;;  %6547 = vrot.lane.b32.xlu0 %v9832_v0, %s6731_s14 }
  0x2a   : > { %5854 = vmatpush1.bf16.msra.mxu1 %v5853_v41  ;;  %5826 = vmatprep.subr.bf16.mxu0 %v5825_v42  ;;  %v388_v63 = vld [vmem:[%s6829_s12 + $0x518] sm:$0xff]  ;;  %v5831_v2 = vpack.c.bf16 %v369_v57, %v353_v56  ;;  %v5861_v3 = vpack.c.bf16 %v371_v60, %v355_v58  ;;  %v5833_v4 = vpack.c.bf16 %v402_v62, %v386_v61  ;;  %v385_v5 = vld [vmem:[%s6829_s12 + $0x500] sm:$0xff]  ;;  %v387_v7 = vld [vmem:[%s6829_s12 + $0x510] sm:$0xff] }
  0x2b   : > { %5856 = vmatprep.subr.bf16.mxu1 %v5855_v46  ;;  %v404_v1 = vld [vmem:[%s6829_s12 + $0x598] sm:$0xff]  ;;  %v401_v6 = vld [vmem:[%s6829_s12 + $0x580] sm:$0xff]  ;;  %v403_v9 = vld [vmem:[%s6829_s12 + $0x590] sm:$0xff]  ;;  %1812 = vrot.lane.b32.xlu1 %v9832_v0, %s6731_s14 }
  0x2c   : > { %v5863_v8 = vpack.c.bf16 %v404_v1, %v388_v63  ;;  %v418_v10 = vld [vmem:[%s6829_s12 + $0x608] sm:$0xff]  ;;  %v420_v12 = vld [vmem:[%s6829_s12 + $0x618] sm:$0xff]  ;;  %v5835_v14 = vpack.c.bf16 %v401_v6, %v385_v5  ;;  %v5865_v16 = vpack.c.bf16 %v403_v9, %v387_v7  ;;  %v417_v18 = vld [vmem:[%s6829_s12 + $0x600] sm:$0xff] }
  0x2d   : > { %5828 = vmatpush1.bf16.msra.mxu0 %v5827_v53  ;;  %v434_v11 = vld [vmem:[%s6829_s12 + $0x688] sm:$0xf]  ;;  %6557 = vrot.lane.b32.xlu0 %v9832_v0, %s6732_s15  ;;  %v436_v13 = vld [vmem:[%s6829_s12 + $0x698] sm:$0xf]  ;;  %v433_v19 = vld [vmem:[%s6829_s12 + $0x680] sm:$0xf] }
  0x2e   : > { %5858 = vmatpush1.bf16.msra.mxu1 %v5857_v54  ;;  %5830 = vmatprep.subr.bf16.mxu0 %v5829_v55  ;;  %v5837_v17 = vpack.c.bf16 %v434_v11, %v418_v10  ;;  %v419_v20 = vld [vmem:[%s6829_s12 + $0x610] sm:$0xff]  ;;  %v5867_v21 = vpack.c.bf16 %v436_v13, %v420_v12  ;;  %v230_v23 = vld [vmem:[%s6829_s12 + $0x28] sm:$0xff]  ;;  %v232_v25 = vld [vmem:[%s6829_s12 + $0x38] sm:$0xff]  ;;  %v5840_v27 = vpack.c.bf16 %v433_v19, %v417_v18 }
  0x2f   : > { %5860 = vmatprep.subr.bf16.mxu1 %v5859_v59  ;;  %v435_v22 = vld [vmem:[%s6829_s12 + $0x690] sm:$0xf]  ;;  %v246_v24 = vld [vmem:[%s6829_s12 + $0xa8] sm:$0xff]  ;;  %v248_v26 = vld [vmem:[%s6829_s12 + $0xb8] sm:$0xff]  ;;  %6562 = vrot.lane.b32.xlu1 %v9832_v0, %s6734_s16 }
  0x30   : > { %v5870_v28 = vpack.c.bf16 %v435_v22, %v419_v20  ;;  %v5873_v29 = vpack.c.bf16 %v246_v24, %v230_v23  ;;  %v229_v30 = vld [vmem:[%s6829_s12 + $0x20] sm:$0xff]  ;;  %v231_v32 = vld [vmem:[%s6829_s12 + $0x30] sm:$0xff]  ;;  %v5903_v33 = vpack.c.bf16 %v248_v26, %v232_v25  ;;  %v262_v35 = vld [vmem:[%s6829_s12 + $0x128] sm:$0xff] }
  0x31   : > { %5832 = vmatpush1.bf16.msra.mxu0 %v5831_v2  ;;  %2092 = vrot.lane.b32.xlu0 %v9832_v0, %s6732_s15  ;;  %v245_v31 = vld [vmem:[%s6829_s12 + $0xa0] sm:$0xff]  ;;  %v247_v34 = vld [vmem:[%s6829_s12 + $0xb0] sm:$0xff]  ;;  %v278_v36 = vld [vmem:[%s6829_s12 + $0x1a8] sm:$0xff] }
  0x32   : > { %5862 = vmatpush1.bf16.msra.mxu1 %v5861_v3  ;;  %5834 = vmatprep.subr.bf16.mxu0 %v5833_v4  ;;  %v264_v37 = vld [vmem:[%s6829_s12 + $0x138] sm:$0xff]  ;;  %v6940_v39 = vld [vmem:[%s9818_s1] sm:$0xff]  ;;  %v5875_v40 = vpack.c.bf16 %v245_v31, %v229_v30  ;;  %v5905_v41 = vpack.c.bf16 %v247_v34, %v231_v32  ;;  %v5877_v42 = vpack.c.bf16 %v278_v36, %v262_v35  ;;  %v263_v45 = vld [vmem:[%s6829_s12 + $0x130] sm:$0xff] }
  0x33   : > { %5864 = vmatprep.subr.bf16.mxu1 %v5863_v8  ;;  %v280_v38 = vld [vmem:[%s6829_s12 + $0x1b8] sm:$0xff]  ;;  %6577 = vrot.lane.b32.xlu1 %v9832_v0, %s6735_s17  ;;  %v261_v43 = vld [vmem:[%s6829_s12 + $0x120] sm:$0xff]  ;;  %v279_v47 = vld [vmem:[%s6829_s12 + $0x1b0] sm:$0xff] }
  0x34   : > { %v277_v44 = vld [vmem:[%s6829_s12 + $0x1a0] sm:$0xff]  ;;  %v5907_v46 = vpack.c.bf16 %v280_v38, %v264_v37  ;;  %v294_v48 = vld [vmem:[%s6829_s12 + $0x228] sm:$0xff]  ;;  %v296_v50 = vld [vmem:[%s6829_s12 + $0x238] sm:$0xff]  ;;  %v5909_v54 = vpack.c.bf16 %v279_v47, %v263_v45 }
  0x35   : > { %5836 = vmatpush1.bf16.msra.mxu0 %v5835_v14  ;;  %6567 = vrot.lane.b32.xlu0 %v9832_v0, %s6734_s16  ;;  %v310_v49 = vld [vmem:[%s6829_s12 + $0x2a8] sm:$0xff]  ;;  %v312_v51 = vld [vmem:[%s6829_s12 + $0x2b8] sm:$0xff]  ;;  %v5879_v52 = vpack.c.bf16 %v277_v44, %v261_v43  ;;  %v293_v56 = vld [vmem:[%s6829_s12 + $0x220] sm:$0xff] }
  0x36   : > { %5866 = vmatpush1.bf16.msra.mxu1 %v5865_v16  ;;  %5839 = vmatprep.subr.msk.bf16.mxu0 %vm6903_vm2, %v5837_v17  ;;  %v6963_v53 = vld [vmem:[%s9818_s1 + $0x8] sm:$0xff]  ;;  %v5881_v55 = vpack.c.bf16 %v310_v49, %v294_v48  ;;  %v309_v57 = vld [vmem:[%s6829_s12 + $0x2a0] sm:$0xff]  ;;  %v295_v58 = vld [vmem:[%s6829_s12 + $0x230] sm:$0xff]  ;;  %v5911_v59 = vpack.c.bf16 %v312_v51, %v296_v50 }
  0x37   : > { %5869 = vmatprep.subr.msk.bf16.mxu1 %vm6903_vm2, %v5867_v21  ;;  %6582 = vrot.lane.b32.xlu1 %v9832_v0, %s6736_s26  ;;  %v311_v60 = vld [vmem:[%s6829_s12 + $0x2b0] sm:$0xff]  ;;  %v326_v61 = vld [vmem:[%s6829_s12 + $0x328] sm:$0xff]  ;;  %v328_v63 = vld [vmem:[%s6829_s12 + $0x338] sm:$0xff]  ;;  %v5883_v2 = vpack.c.bf16 %v309_v57, %v293_v56 }
  0x38   : > { %v342_v62 = vld [vmem:[%s6829_s12 + $0x3a8] sm:$0xff]  ;;  %v344_v1 = vld [vmem:[%s6829_s12 + $0x3b8] sm:$0xff]  ;;  %v5913_v3 = vpack.c.bf16 %v311_v60, %v295_v58  ;;  %v325_v5 = vld [vmem:[%s6829_s12 + $0x320] sm:$0xff] }
  0x39   : > { %5842 = vmatpush1.bf16.msk.msra.mxu0 %vm6903_vm2, %v5840_v27  ;;  %6572 = vrot.lane.b32.xlu0 %v9832_v0, %s6735_s17  ;;  %v5885_v4 = vpack.c.bf16 %v342_v62, %v326_v61  ;;  %v341_v6 = vld [vmem:[%s6829_s12 + $0x3a0] sm:$0xff]  ;;  %v327_v7 = vld [vmem:[%s6829_s12 + $0x330] sm:$0xff]  ;;  %v5915_v8 = vpack.c.bf16 %v344_v1, %v328_v63  ;;  %v358_v10 = vld [vmem:[%s6829_s12 + $0x428] sm:$0xff] }
  0x3a   : > { %5872 = vmatpush1.bf16.msk.msra.mxu1 %vm6903_vm2, %v5870_v28  ;;  %5874 = vmatprep.subr.bf16.mxu0 %v5873_v29  ;;  %v343_v9 = vld [vmem:[%s6829_s12 + $0x3b0] sm:$0xff]  ;;  %v374_v11 = vld [vmem:[%s6829_s12 + $0x4a8] sm:$0xff]  ;;  %v360_v12 = vld [vmem:[%s6829_s12 + $0x438] sm:$0xff]  ;;  %v5887_v14 = vpack.c.bf16 %v341_v6, %v325_v5 }
  0x3b   : > { %5904 = vmatprep.subr.bf16.mxu1 %v5903_v33  ;;  %v376_v13 = vld [vmem:[%s6829_s12 + $0x4b8] sm:$0xff]  ;;  %6597 = vrot.lane.b32.xlu1 %v9832_v0, %s6737_s7  ;;  %v5917_v16 = vpack.c.bf16 %v343_v9, %v327_v7  ;;  %v5889_v17 = vpack.c.bf16 %v374_v11, %v358_v10  ;;  %v357_v18 = vld [vmem:[%s6829_s12 + $0x420] sm:$0xff]  ;;  %v359_v20 = vld [vmem:[%s6829_s12 + $0x430] sm:$0xff] }
  0x3c   : > { %5705 = vmatmul.mubr.msk.f32.vlgmr.msra.gmra.mrb[0].mxu0 %vm449_vm3, %v6940_v39  ;;  %v373_v19 = vld [vmem:[%s6829_s12 + $0x4a0] sm:$0xff]  ;;  %v5919_v21 = vpack.c.bf16 %v376_v13, %v360_v12  ;;  %v375_v22 = vld [vmem:[%s6829_s12 + $0x4b0] sm:$0xff]  ;;  %v390_v23 = vld [vmem:[%s6829_s12 + $0x528] sm:$0xff] }
  0x3d   : > { %5709 = vmatmul.mubr.msk.f32.vlgmr.msra.gmra.mrb[0].mxu1 %vm449_vm3, %v6940_v39  ;;  %5876 = vmatpush1.bf16.msra.mxu0 %v5875_v40  ;;  %v406_v24 = vld [vmem:[%s6829_s12 + $0x5a8] sm:$0xff]  ;;  %v392_v25 = vld [vmem:[%s6829_s12 + $0x538] sm:$0xff]  ;;  %v5891_v27 = vpack.c.bf16 %v373_v19, %v357_v18  ;;  %v5921_v28 = vpack.c.bf16 %v375_v22, %v359_v20  ;;  %v389_v30 = vld [vmem:[%s6829_s12 + $0x520] sm:$0xff] }
  0x3e   : > { %5906 = vmatpush1.bf16.msra.mxu1 %v5905_v41  ;;  %5878 = vmatprep.subr.bf16.mxu0 %v5877_v42  ;;  %v408_v26 = vld [vmem:[%s6829_s12 + $0x5b8] sm:$0xff]  ;;  %v5893_v29 = vpack.c.bf16 %v406_v24, %v390_v23  ;;  %v405_v31 = vld [vmem:[%s6829_s12 + $0x5a0] sm:$0xff]  ;;  %v391_v32 = vld [vmem:[%s6829_s12 + $0x530] sm:$0xff] }
  0x3f   : > { %5908 = vmatprep.subr.bf16.mxu1 %v5907_v46  ;;  %575 = vmatprep.mubr.f32.mxu0 %v9832_v0  ;;  %v5923_v33 = vpack.c.bf16 %v408_v26, %v392_v25  ;;  %v407_v34 = vld [vmem:[%s6829_s12 + $0x5b0] sm:$0xff]  ;;  %v422_v35 = vld [vmem:[%s6829_s12 + $0x628] sm:$0xff]  ;;  %v424_v37 = vld [vmem:[%s6829_s12 + $0x638] sm:$0xff]  ;;  %v5895_v40 = vpack.c.bf16 %v405_v31, %v389_v30 }
  0x40   : > { %652 = vmatprep.mubr.f32.mxu1 %v9832_v0  ;;  %5706 = vmatmul.mubr.msk.f32.gmra.mrb[2].mxu0 %vm449_vm3, %v6963_v53  ;;  %v438_v36 = vld [vmem:[%s6829_s12 + $0x6a8] sm:$0xf]  ;;  %v440_v38 = vld [vmem:[%s6829_s12 + $0x6b8] sm:$0xf]  ;;  %v5925_v41 = vpack.c.bf16 %v407_v34, %v391_v32  ;;  %v421_v43 = vld [vmem:[%s6829_s12 + $0x620] sm:$0xff] }
  0x41   : > { %5880 = vmatpush1.bf16.msra.mxu0 %v5879_v52  ;;  %5710 = vmatmul.mubr.msk.f32.gmra.mrb[2].mxu1 %vm449_vm3, %v6963_v53  ;;  %v5897_v42 = vpack.c.bf16 %v438_v36, %v422_v35  ;;  %v437_v44 = vld [vmem:[%s6829_s12 + $0x6a0] sm:$0xf]  ;;  %v423_v45 = vld [vmem:[%s6829_s12 + $0x630] sm:$0xff]  ;;  %v5927_v46 = vpack.c.bf16 %v440_v38, %v424_v37  ;;  %v234_v48 = vld [vmem:[%s6829_s12 + $0x48] sm:$0xff] }
  0x42   : > { %5910 = vmatpush1.bf16.msra.mxu1 %v5909_v54  ;;  %5882 = vmatprep.subr.bf16.mxu0 %v5881_v55  ;;  %v439_v47 = vld [vmem:[%s6829_s12 + $0x6b0] sm:$0xf]  ;;  %v250_v49 = vld [vmem:[%s6829_s12 + $0xc8] sm:$0xff]  ;;  %v236_v50 = vld [vmem:[%s6829_s12 + $0x58] sm:$0xff]  ;;  %v5900_v52 = vpack.c.bf16 %v437_v44, %v421_v43 }
  0x43   : > { %5912 = vmatprep.subr.bf16.mxu1 %v5911_v59  ;;  %723 = vmatprep.mubr.f32.mxu0 %v9832_v0  ;;  %v252_v51 = vld [vmem:[%s6829_s12 + $0xd8] sm:$0xff]  ;;  %v5930_v54 = vpack.c.bf16 %v439_v47, %v423_v45  ;;  %v5933_v55 = vpack.c.bf16 %v250_v49, %v234_v48  ;;  %v233_v56 = vld [vmem:[%s6829_s12 + $0x40] sm:$0xff]  ;;  %v235_v58 = vld [vmem:[%s6829_s12 + $0x50] sm:$0xff] }
  0x44   : > { %800 = vmatprep.mubr.f32.mxu1 %v9832_v0  ;;  %6587 = vrot.lane.b32.xlu0 %v9832_v0, %s6736_s26  ;;  %v249_v57 = vld [vmem:[%s6829_s12 + $0xc0] sm:$0xff]  ;;  %v5963_v59 = vpack.c.bf16 %v252_v51, %v236_v50  ;;  %v251_v60 = vld [vmem:[%s6829_s12 + $0xd0] sm:$0xff]  ;;  %v266_v61 = vld [vmem:[%s6829_s12 + $0x148] sm:$0xff] }
  0x45   : > { %5884 = vmatpush1.bf16.msra.mxu0 %v5883_v2  ;;  %6602 = vrot.lane.b32.xlu1 %v9832_v0, %s6729_s9  ;;  %v282_v62 = vld [vmem:[%s6829_s12 + $0x1c8] sm:$0xff]  ;;  %v268_v63 = vld [vmem:[%s6829_s12 + $0x158] sm:$0xff]  ;;  %v5935_v2 = vpack.c.bf16 %v249_v57, %v233_v56  ;;  %v265_v5 = vld [vmem:[%s6829_s12 + $0x140] sm:$0xff] }
  0x46   : > { %5914 = vmatpush1.bf16.msra.mxu1 %v5913_v3  ;;  %5886 = vmatprep.subr.bf16.mxu0 %v5885_v4  ;;  %v284_v1 = vld [vmem:[%s6829_s12 + $0x1d8] sm:$0xff]  ;;  %v5965_v3 = vpack.c.bf16 %v251_v60, %v235_v58  ;;  %v5937_v4 = vpack.c.bf16 %v282_v62, %v266_v61  ;;  %v281_v6 = vld [vmem:[%s6829_s12 + $0x1c0] sm:$0xff]  ;;  %v267_v7 = vld [vmem:[%s6829_s12 + $0x150] sm:$0xff] }
  0x47   : > { %5916 = vmatprep.subr.bf16.mxu1 %v5915_v8  ;;  %v5967_v8 = vpack.c.bf16 %v284_v1, %v268_v63  ;;  %v283_v9 = vld [vmem:[%s6829_s12 + $0x1d0] sm:$0xff]  ;;  %v298_v10 = vld [vmem:[%s6829_s12 + $0x248] sm:$0xff]  ;;  %v300_v12 = vld [vmem:[%s6829_s12 + $0x258] sm:$0xff] }
  0x48   : > { %6592 = vrot.lane.b32.xlu0 %v9832_v0, %s6737_s7  ;;  %v314_v11 = vld [vmem:[%s6829_s12 + $0x2c8] sm:$0xff]  ;;  %v316_v13 = vld [vmem:[%s6829_s12 + $0x2d8] sm:$0xff]  ;;  %v297_v18 = vld [vmem:[%s6829_s12 + $0x240] sm:$0xff] }
  0x49   : > { %5888 = vmatpush1.bf16.msra.mxu0 %v5887_v14  ;;  %6607 = vrot.lane.b32.xlu1 %v9832_v0, %s6730_s13  ;;  %v5939_v14 = vpack.c.bf16 %v281_v6, %v265_v5  ;;  %v313_v19 = vld [vmem:[%s6829_s12 + $0x2c0] sm:$0xff]  ;;  %v299_v20 = vld [vmem:[%s6829_s12 + $0x250] sm:$0xff]  ;;  %v330_v23 = vld [vmem:[%s6829_s12 + $0x348] sm:$0xff] }
  0x4a   : > { %5918 = vmatpush1.bf16.msra.mxu1 %v5917_v16  ;;  %5890 = vmatprep.subr.bf16.mxu0 %v5889_v17  ;;  %v5969_v16 = vpack.c.bf16 %v283_v9, %v267_v7  ;;  %v5941_v17 = vpack.c.bf16 %v314_v11, %v298_v10  ;;  %v315_v22 = vld [vmem:[%s6829_s12 + $0x2d0] sm:$0xff]  ;;  %v346_v24 = vld [vmem:[%s6829_s12 + $0x3c8] sm:$0xff]  ;;  %v332_v25 = vld [vmem:[%s6829_s12 + $0x358] sm:$0xff] }
  0x4b   : > { %5920 = vmatprep.subr.bf16.mxu1 %v5919_v21  ;;  %v5971_v21 = vpack.c.bf16 %v316_v13, %v300_v12  ;;  %v348_v26 = vld [vmem:[%s6829_s12 + $0x3d8] sm:$0xff]  ;;  %v329_v30 = vld [vmem:[%s6829_s12 + $0x340] sm:$0xff]  ;;  %v331_v32 = vld [vmem:[%s6829_s12 + $0x350] sm:$0xff] }
  0x4c   : > { %1249 = vrot.lane.b32.xlu0 %v9832_v0, %s6729_s9  ;;  %v345_v31 = vld [vmem:[%s6829_s12 + $0x3c0] sm:$0xff]  ;;  %v347_v34 = vld [vmem:[%s6829_s12 + $0x3d0] sm:$0xff]  ;;  %v362_v35 = vld [vmem:[%s6829_s12 + $0x448] sm:$0xff] }
  0x4d   : > { %5892 = vmatpush1.bf16.msra.mxu0 %v5891_v27  ;;  %6612 = vrot.lane.b32.xlu1 %v9832_v0, %s6731_s14  ;;  %v5943_v27 = vpack.c.bf16 %v313_v19, %v297_v18  ;;  %v378_v36 = vld [vmem:[%s6829_s12 + $0x4c8] sm:$0xff]  ;;  %v364_v37 = vld [vmem:[%s6829_s12 + $0x458] sm:$0xff]  ;;  %v361_v43 = vld [vmem:[%s6829_s12 + $0x440] sm:$0xff] }
  0x4e   : > { %5922 = vmatpush1.bf16.msra.mxu1 %v5921_v28  ;;  %5894 = vmatprep.subr.bf16.mxu0 %v5893_v29  ;;  %v5973_v28 = vpack.c.bf16 %v315_v22, %v299_v20  ;;  %v5945_v29 = vpack.c.bf16 %v346_v24, %v330_v23  ;;  %v380_v38 = vld [vmem:[%s6829_s12 + $0x4d8] sm:$0xff]  ;;  %v377_v44 = vld [vmem:[%s6829_s12 + $0x4c0] sm:$0xff]  ;;  %v363_v45 = vld [vmem:[%s6829_s12 + $0x450] sm:$0xff] }
  0x4f   : > { %5924 = vmatprep.subr.bf16.mxu1 %v5923_v33  ;;  %v5975_v33 = vpack.c.bf16 %v348_v26, %v332_v25  ;;  %v379_v47 = vld [vmem:[%s6829_s12 + $0x4d0] sm:$0xff]  ;;  %v394_v48 = vld [vmem:[%s6829_s12 + $0x548] sm:$0xff]  ;;  %v396_v50 = vld [vmem:[%s6829_s12 + $0x558] sm:$0xff] }
  0x50   : > { %1530 = vrot.lane.b32.xlu0 %v9832_v0, %s6730_s13  ;;  %v410_v49 = vld [vmem:[%s6829_s12 + $0x5c8] sm:$0xff]  ;;  %v412_v51 = vld [vmem:[%s6829_s12 + $0x5d8] sm:$0xff]  ;;  %v393_v56 = vld [vmem:[%s6829_s12 + $0x540] sm:$0xff] }
  0x51   : > { %5896 = vmatpush1.bf16.msra.mxu0 %v5895_v40  ;;  %6617 = vrot.lane.b32.xlu1 %v9832_v0, %s6732_s15  ;;  %v5947_v40 = vpack.c.bf16 %v345_v31, %v329_v30  ;;  %v409_v57 = vld [vmem:[%s6829_s12 + $0x5c0] sm:$0xff]  ;;  %v395_v58 = vld [vmem:[%s6829_s12 + $0x550] sm:$0xff]  ;;  %v426_v61 = vld [vmem:[%s6829_s12 + $0x648] sm:$0xff] }
  0x52   : > { %5926 = vmatpush1.bf16.msra.mxu1 %v5925_v41  ;;  %5899 = vmatprep.subr.msk.bf16.mxu0 %vm6903_vm2, %v5897_v42  ;;  %v5977_v41 = vpack.c.bf16 %v347_v34, %v331_v32  ;;  %v5949_v42 = vpack.c.bf16 %v378_v36, %v362_v35  ;;  %v411_v60 = vld [vmem:[%s6829_s12 + $0x5d0] sm:$0xff]  ;;  %v442_v62 = vld [vmem:[%s6829_s12 + $0x6c8] sm:$0xf]  ;;  %v428_v63 = vld [vmem:[%s6829_s12 + $0x658] sm:$0xff] }
  0x53   : > { %5929 = vmatprep.subr.msk.bf16.mxu1 %vm6903_vm2, %v5927_v46  ;;  %v5979_v46 = vpack.c.bf16 %v380_v38, %v364_v37  ;;  %v444_v1 = vld [vmem:[%s6829_s12 + $0x6d8] sm:$0xf]  ;;  %v425_v5 = vld [vmem:[%s6829_s12 + $0x640] sm:$0xff]  ;;  %v427_v7 = vld [vmem:[%s6829_s12 + $0x650] sm:$0xff] }
  0x54   : > { %1810 = vrot.lane.b32.xlu0 %v9832_v0, %s6731_s14  ;;  %v441_v6 = vld [vmem:[%s6829_s12 + $0x6c0] sm:$0xf]  ;;  %v443_v9 = vld [vmem:[%s6829_s12 + $0x6d0] sm:$0xf]  ;;  %v238_v10 = vld [vmem:[%s6829_s12 + $0x68] sm:$0xff] }
  0x55   : > { %5902 = vmatpush1.bf16.msk.msra.mxu0 %vm6903_vm2, %v5900_v52  ;;  %v5951_v52 = vpack.c.bf16 %v377_v44, %v361_v43  ;;  %v254_v11 = vld [vmem:[%s6829_s12 + $0xe8] sm:$0xff]  ;;  %v240_v12 = vld [vmem:[%s6829_s12 + $0x78] sm:$0xff]  ;;  %v237_v18 = vld [vmem:[%s6829_s12 + $0x60] sm:$0xff]  ;;  %6622 = vrot.lane.b32.xlu1 %v9832_v0, %s6734_s16 }
  0x56   : > { %5932 = vmatpush1.bf16.msk.msra.mxu1 %vm6903_vm2, %v5930_v54  ;;  %5934 = vmatprep.subr.bf16.mxu0 %v5933_v55  ;;  %v5981_v54 = vpack.c.bf16 %v379_v47, %v363_v45  ;;  %v5953_v55 = vpack.c.bf16 %v410_v49, %v394_v48  ;;  %v256_v13 = vld [vmem:[%s6829_s12 + $0xf8] sm:$0xff]  ;;  %v253_v19 = vld [vmem:[%s6829_s12 + $0xe0] sm:$0xff]  ;;  %v239_v20 = vld [vmem:[%s6829_s12 + $0x70] sm:$0xff] }
  0x57   : > { %5964 = vmatprep.subr.bf16.mxu1 %v5963_v59  ;;  %v5983_v59 = vpack.c.bf16 %v412_v51, %v396_v50  ;;  %v255_v22 = vld [vmem:[%s6829_s12 + $0xf0] sm:$0xff]  ;;  %v270_v23 = vld [vmem:[%s6829_s12 + $0x168] sm:$0xff]  ;;  %v272_v25 = vld [vmem:[%s6829_s12 + $0x178] sm:$0xff] }
  0x58   : > { %5713 = vmatmul.mubr.msk.f32.vlgmr.msra.gmra.mrb[4].mxu0 %vm449_vm3, %v6940_v39  ;;  %2090 = vrot.lane.b32.xlu0 %v9832_v0, %s6732_s15  ;;  %v286_v24 = vld [vmem:[%s6829_s12 + $0x1e8] sm:$0xff]  ;;  %v288_v26 = vld [vmem:[%s6829_s12 + $0x1f8] sm:$0xff]  ;;  %v269_v30 = vld [vmem:[%s6829_s12 + $0x160] sm:$0xff] }
  0x59   : > { %5717 = vmatmul.mubr.msk.f32.vlgmr.msra.gmra.mrb[4].mxu1 %vm449_vm3, %v6940_v39  ;;  %5936 = vmatpush1.bf16.msra.mxu0 %v5935_v2  ;;  %v5955_v2 = vpack.c.bf16 %v409_v57, %v393_v56  ;;  %v285_v31 = vld [vmem:[%s6829_s12 + $0x1e0] sm:$0xff]  ;;  %v271_v32 = vld [vmem:[%s6829_s12 + $0x170] sm:$0xff]  ;;  %v302_v35 = vld [vmem:[%s6829_s12 + $0x268] sm:$0xff] }
  0x5a   : > { %5966 = vmatpush1.bf16.msra.mxu1 %v5965_v3  ;;  %5938 = vmatprep.subr.bf16.mxu0 %v5937_v4  ;;  %v5985_v3 = vpack.c.bf16 %v411_v60, %v395_v58  ;;  %v5957_v4 = vpack.c.bf16 %v442_v62, %v426_v61  ;;  %v287_v34 = vld [vmem:[%s6829_s12 + $0x1f0] sm:$0xff]  ;;  %v318_v36 = vld [vmem:[%s6829_s12 + $0x2e8] sm:$0xff]  ;;  %v304_v37 = vld [vmem:[%s6829_s12 + $0x278] sm:$0xff] }
  0x5b   : > { %5968 = vmatprep.subr.bf16.mxu1 %v5967_v8  ;;  %729 = vmatprep.mubr.f32.mxu0 %v9832_v0  ;;  %v5987_v8 = vpack.c.bf16 %v444_v1, %v428_v63  ;;  %v320_v38 = vld [vmem:[%s6829_s12 + $0x2f8] sm:$0xff]  ;;  %v301_v43 = vld [vmem:[%s6829_s12 + $0x260] sm:$0xff]  ;;  %v303_v45 = vld [vmem:[%s6829_s12 + $0x270] sm:$0xff] }
  0x5c   : > { %806 = vmatprep.mubr.f32.mxu1 %v9832_v0  ;;  %5714 = vmatmul.mubr.msk.f32.gmra.mrb[6].mxu0 %vm449_vm3, %v6963_v53  ;;  %v317_v44 = vld [vmem:[%s6829_s12 + $0x2e0] sm:$0xff]  ;;  %v319_v47 = vld [vmem:[%s6829_s12 + $0x2f0] sm:$0xff]  ;;  %v334_v48 = vld [vmem:[%s6829_s12 + $0x368] sm:$0xff] }
  0x5d   : > { %5940 = vmatpush1.bf16.msra.mxu0 %v5939_v14  ;;  %5718 = vmatmul.mubr.msk.f32.gmra.mrb[6].mxu1 %vm449_vm3, %v6963_v53  ;;  %v5960_v14 = vpack.c.bf16 %v441_v6, %v425_v5  ;;  %v350_v49 = vld [vmem:[%s6829_s12 + $0x3e8] sm:$0xff]  ;;  %v336_v50 = vld [vmem:[%s6829_s12 + $0x378] sm:$0xff]  ;;  %v333_v56 = vld [vmem:[%s6829_s12 + $0x360] sm:$0xff] }
  0x5e   : > { %5970 = vmatpush1.bf16.msra.mxu1 %v5969_v16  ;;  %5942 = vmatprep.subr.bf16.mxu0 %v5941_v17  ;;  %v5990_v16 = vpack.c.bf16 %v443_v9, %v427_v7  ;;  %v5993_v17 = vpack.c.bf16 %v254_v11, %v238_v10  ;;  %v352_v51 = vld [vmem:[%s6829_s12 + $0x3f8] sm:$0xff]  ;;  %v349_v57 = vld [vmem:[%s6829_s12 + $0x3e0] sm:$0xff]  ;;  %v335_v58 = vld [vmem:[%s6829_s12 + $0x370] sm:$0xff] }
  0x5f   : > { %5972 = vmatprep.subr.bf16.mxu1 %v5971_v21  ;;  %877 = vmatprep.mubr.f32.mxu0 %v9832_v0  ;;  %v6023_v21 = vpack.c.bf16 %v256_v13, %v240_v12  ;;  %v351_v60 = vld [vmem:[%s6829_s12 + $0x3f0] sm:$0xff]  ;;  %v366_v61 = vld [vmem:[%s6829_s12 + $0x468] sm:$0xff]  ;;  %v368_v63 = vld [vmem:[%s6829_s12 + $0x478] sm:$0xff] }
  0x60   : > { %954 = vmatprep.mubr.f32.mxu1 %v9832_v0  ;;  %6627 = vrot.lane.b32.xlu0 %v9832_v0, %s6734_s16  ;;  %v382_v62 = vld [vmem:[%s6829_s12 + $0x4e8] sm:$0xff]  ;;  %v384_v1 = vld [vmem:[%s6829_s12 + $0x4f8] sm:$0xff]  ;;  %v365_v5 = vld [vmem:[%s6829_s12 + $0x460] sm:$0xff] }
  0x61   : > { %5944 = vmatpush1.bf16.msra.mxu0 %v5943_v27  ;;  %v5995_v27 = vpack.c.bf16 %v253_v19, %v237_v18  ;;  %v381_v6 = vld [vmem:[%s6829_s12 + $0x4e0] sm:$0xff]  ;;  %v367_v7 = vld [vmem:[%s6829_s12 + $0x470] sm:$0xff]  ;;  %v398_v10 = vld [vmem:[%s6829_s12 + $0x568] sm:$0xff] }
  0x62   : > { %5974 = vmatpush1.bf16.msra.mxu1 %v5973_v28  ;;  %5946 = vmatprep.subr.bf16.mxu0 %v5945_v29  ;;  %v6025_v28 = vpack.c.bf16 %v255_v22, %v239_v20  ;;  %v5997_v29 = vpack.c.bf16 %v286_v24, %v270_v23  ;;  %v383_v9 = vld [vmem:[%s6829_s12 + $0x4f0] sm:$0xff]  ;;  %v414_v11 = vld [vmem:[%s6829_s12 + $0x5e8] sm:$0xff]  ;;  %v400_v12 = vld [vmem:[%s6829_s12 + $0x578] sm:$0xff] }
  0x63   : > { %5976 = vmatprep.subr.bf16.mxu1 %v5975_v33  ;;  %v6027_v33 = vpack.c.bf16 %v288_v26, %v272_v25  ;;  %v416_v13 = vld [vmem:[%s6829_s12 + $0x5f8] sm:$0xff]  ;;  %v397_v18 = vld [vmem:[%s6829_s12 + $0x560] sm:$0xff]  ;;  %v399_v20 = vld [vmem:[%s6829_s12 + $0x570] sm:$0xff] }
  0x64   : > { %v413_v19 = vld [vmem:[%s6829_s12 + $0x5e0] sm:$0xff]  ;;  %v415_v22 = vld [vmem:[%s6829_s12 + $0x5f0] sm:$0xff]  ;;  %v430_v23 = vld [vmem:[%s6829_s12 + $0x668] sm:$0xff] }
  0x65   : > { %5948 = vmatpush1.bf16.msra.mxu0 %v5947_v40  ;;  %v5999_v40 = vpack.c.bf16 %v285_v31, %v269_v30  ;;  %v446_v24 = vld [vmem:[%s6829_s12 + $0x6e8] sm:$0xf]  ;;  %v432_v25 = vld [vmem:[%s6829_s12 + $0x678] sm:$0xff]  ;;  %v429_v30 = vld [vmem:[%s6829_s12 + $0x660] sm:$0xff] }
  0x66   : > { %5978 = vmatpush1.bf16.msra.mxu1 %v5977_v41  ;;  %5950 = vmatprep.subr.bf16.mxu0 %v5949_v42  ;;  %v6029_v41 = vpack.c.bf16 %v287_v34, %v271_v32  ;;  %v6001_v42 = vpack.c.bf16 %v318_v36, %v302_v35  ;;  %v448_v26 = vld [vmem:[%s6829_s12 + $0x6f8] sm:$0xf]  ;;  %v445_v31 = vld [vmem:[%s6829_s12 + $0x6e0] sm:$0xf]  ;;  %v447_v34 = vld [vmem:[%s6829_s12 + $0x6f0] sm:$0xf] }
  0x67   : > { %5980 = vmatprep.subr.bf16.mxu1 %v5979_v46  ;;  %v6031_v46 = vpack.c.bf16 %v320_v38, %v304_v37  ;;  %v6047_v32 = vpack.c.bf16 %v448_v26, %v432_v25  ;;  %v6020_v35 = vpack.c.bf16 %v445_v31, %v429_v30 }
  0x69   : > { %5952 = vmatpush1.bf16.msra.mxu0 %v5951_v52  ;;  %v6003_v52 = vpack.c.bf16 %v317_v44, %v301_v43  ;;  %v1293_v44 = vlaneseq }
  0x6a   : > { %5982 = vmatpush1.bf16.msra.mxu1 %v5981_v54  ;;  %5954 = vmatprep.subr.bf16.mxu0 %v5953_v55  ;;  %v6033_v54 = vpack.c.bf16 %v319_v47, %v303_v45  ;;  %v6005_v55 = vpack.c.bf16 %v350_v49, %v334_v48  ;;  %v1321_v48 = vld [vmem:[%s9821_s4] ss:$8 sm:$0xf0] }
  0x6b   : > { %5984 = vmatprep.subr.bf16.mxu1 %v5983_v59  ;;  %v6035_v59 = vpack.c.bf16 %v352_v51, %v336_v50  ;;  %v7228_v47 = vand.u32 127, %v1293_v44  ;;  %v7233_v49 = vshrl.u32 %v1293_v44, 7 }
  0x6d   : > { %5956 = vmatpush1.bf16.msra.mxu0 %v5955_v2  ;;  %v6007_v2 = vpack.c.bf16 %v349_v57, %v333_v56  ;;  %v5739_v56 = vld [vmem:[%s9821_s4 + $0x1] ss:$8 sm:$0xf]  ;;  %vm1295_vm4 = vcmp.lt.s32.totalorder %v7228_v47, 17  ;;  %vm1574_vm5 = vcmp.lt.s32.totalorder %v7228_v47, 16  ;;  %vm1854_vm6 = vcmp.lt.s32.totalorder %v7228_v47, 15 }
  0x6e   : > { %5986 = vmatpush1.bf16.msra.mxu1 %v5985_v3  ;;  %5959 = vmatprep.subr.msk.bf16.mxu0 %vm6903_vm2, %v5957_v4  ;;  %v6037_v3 = vpack.c.bf16 %v351_v60, %v335_v58  ;;  %v6009_v4 = vpack.c.bf16 %v382_v62, %v366_v61  ;;  %v5740_v57 = vld [vmem:[%s9821_s4 + $0x1] ss:$8 sm:$0xf0]  ;;  %vm2134_vm7 = vcmp.lt.s32.totalorder %v7228_v47, 1  ;;  %vm2414_vm8 = vcmp.lt.s32.totalorder %v7228_v47, 127 }
  0x6f   : > { %5989 = vmatprep.subr.msk.bf16.mxu1 %vm6903_vm2, %v5987_v8  ;;  %v6039_v8 = vpack.c.bf16 %v384_v1, %v368_v63  ;;  %v7251_v61 = vor.u32 %v5740_v57, %v5739_v56  ;;  %vm2694_vm9 = vcmp.lt.s32.totalorder %v7228_v47, 113  ;;  %vm2974_vm10 = vcmp.lt.s32.totalorder %v7228_v47, 112 }
  0x70   : > { %vm3254_vm11 = vcmp.lt.s32.totalorder %v7228_v47, 111 }
  0x71   : > { %5962 = vmatpush1.bf16.msk.msra.mxu0 %vm6903_vm2, %v5960_v14  ;;  %v6011_v14 = vpack.c.bf16 %v381_v6, %v365_v5  ;;  %10075 = vst [vmem:[#allocation12_spill] sm:$0xff] %v7251_v61 }
  0x72   : > { %5992 = vmatpush1.bf16.msk.msra.mxu1 %vm6903_vm2, %v5990_v16  ;;  %5994 = vmatprep.subr.bf16.mxu0 %v5993_v17  ;;  %v6041_v16 = vpack.c.bf16 %v383_v9, %v367_v7  ;;  %v6013_v17 = vpack.c.bf16 %v414_v11, %v398_v10  ;;  %v7267_v7 = vsub.s32 5, %v7233_v49 }
  0x73   : > { %6024 = vmatprep.subr.bf16.mxu1 %v6023_v21  ;;  %v6043_v21 = vpack.c.bf16 %v416_v13, %v400_v12  ;;  %v5745_v12 = vld [vmem:[%s9821_s4 + $0x2] ss:$8 sm:$0xf] }
  0x74   : > { %5721 = vmatmul.mubr.msk.f32.vlgmr.msra.gmra.mrb[8].mxu0 %vm449_vm3, %v6940_v39  ;;  %10078 = vst [vmem:[#allocation15_spill] sm:$0xff] %v7267_v7  ;;  %v5746_v13 = vld [vmem:[%s9821_s4 + $0x2] ss:$8 sm:$0xf0] }
  0x75   : > { %5725 = vmatmul.mubr.msk.f32.vlgmr.msra.gmra.mrb[8].mxu1 %vm449_vm3, %v6940_v39  ;;  %5996 = vmatpush1.bf16.msra.mxu0 %v5995_v27  ;;  %v6015_v27 = vpack.c.bf16 %v413_v19, %v397_v18  ;;  %v7293_v19 = vsub.s32 7, %v7233_v49  ;;  %v7300_v26 = vor.u32 %v5746_v13, %v5745_v12 }
  0x76   : > { %6026 = vmatpush1.bf16.msra.mxu1 %v6025_v28  ;;  %5998 = vmatprep.subr.bf16.mxu0 %v5997_v29  ;;  %v6045_v28 = vpack.c.bf16 %v415_v22, %v399_v20  ;;  %v6017_v29 = vpack.c.bf16 %v446_v24, %v430_v23 }
  0x77   : > { %6028 = vmatprep.subr.bf16.mxu1 %v6027_v33  ;;  %883 = vmatprep.mubr.f32.mxu0 %v9832_v0  ;;  %v431_v33 = vld [vmem:[%s6829_s12 + $0x670] sm:$0xff]  ;;  %10080 = vst [vmem:[#allocation17_spill] sm:$0xff] %v7293_v19  ;;  %10081 = vst [vmem:[#allocation18_spill] sm:$0xff] %v7300_v26 }
  0x78   : > { %960 = vmatprep.mubr.f32.mxu1 %v9832_v0  ;;  %5722 = vmatmul.mubr.msk.f32.gmra.mrb[10].mxu0 %vm449_vm3, %v6963_v53  ;;  %v6050_v36 = vpack.c.bf16 %v447_v34, %v431_v33 }
  0x79   : > { %6000 = vmatpush1.bf16.msra.mxu0 %v5999_v40  ;;  %5726 = vmatmul.mubr.msk.f32.gmra.mrb[10].mxu1 %vm449_vm3, %v6963_v53 }
  0x7a   : > { %6030 = vmatpush1.bf16.msra.mxu1 %v6029_v41  ;;  %6002 = vmatprep.subr.bf16.mxu0 %v6001_v42 }
  0x7b   : > { %6032 = vmatprep.subr.bf16.mxu1 %v6031_v46  ;;  %1031 = vmatprep.mubr.f32.mxu0 %v9832_v0  ;;  %v1320_v46 = vld [vmem:[%s9821_s4] ss:$8 sm:$0xf] }
  0x7c   : > { %1108 = vmatprep.mubr.f32.mxu1 %v9832_v0 }
  0x7d   : > { %6004 = vmatpush1.bf16.msra.mxu0 %v6003_v52 }
  0x7e   : > { %6034 = vmatpush1.bf16.msra.mxu1 %v6033_v54  ;;  %6006 = vmatprep.subr.bf16.mxu0 %v6005_v55  ;;  %v7238_v55 = vor.u32 %v1321_v48, %v1320_v46  ;;  %v1645_v48 = vrot.slane %v7251_v61, %v7293_v19 }
  0x7f   : > { %6036 = vmatprep.subr.bf16.mxu1 %v6035_v59  ;;  %v7248_v59 = vsub.s32 6, %v7233_v49 }
  0x80   : > { %10073 = vst [vmem:[#allocation10_spill] sm:$0xff] %v7238_v55 }
  0x81   : > { %6008 = vmatpush1.bf16.msra.mxu0 %v6007_v2  ;;  %10074 = vst [vmem:[#allocation11_spill] sm:$0xff] %v7248_v59  ;;  %v7257_v2 = vsub.s32 4, %v7233_v49  ;;  %v1641_v9 = vrot.slane %v7251_v61, %v7248_v59 }
  0x82   : > { %6038 = vmatpush1.bf16.msra.mxu1 %v6037_v3  ;;  %6010 = vmatprep.subr.bf16.mxu0 %v6009_v4 }
  0x83   : > { %6040 = vmatprep.subr.bf16.mxu1 %v6039_v8  ;;  %10076 = vst [vmem:[#allocation13_spill] sm:$0xff] %v7257_v2  ;;  %v1353_v4 = vrot.slane %v7238_v55, %v7257_v2  ;;  %v1633_v5 = vrot.slane %v7251_v61, %v7257_v2  ;;  %v1361_v8 = vrot.slane %v7238_v55, %v7248_v59 }
  0x84   : > { %v1913_v13 = vrot.slane %v7300_v26, %v7257_v2 }
  0x85   : > { %6012 = vmatpush1.bf16.msra.mxu0 %v6011_v14 }
  0x86   : > { %6042 = vmatpush1.bf16.msra.mxu1 %v6041_v16  ;;  %6014 = vmatprep.subr.bf16.mxu0 %v6013_v17 }
  0x87   : > { %6044 = vmatprep.subr.bf16.mxu1 %v6043_v21 }
  0x89   : > { %6016 = vmatpush1.bf16.msra.mxu0 %v6015_v27 }
  0x8a   : > { %6046 = vmatpush1.bf16.msra.mxu1 %v6045_v28  ;;  %6019 = vmatprep.subr.msk.bf16.mxu0 %vm6903_vm2, %v6017_v29  ;;  %v1357_v28 = vrot.slane %v7238_v55, %v7267_v7 }
  0x8b   : > { %6049 = vmatprep.subr.msk.bf16.mxu1 %vm6903_vm2, %v6047_v32  ;;  %v1637_v32 = vrot.slane %v7251_v61, %v7267_v7 }
  0x8d   : > { %6022 = vmatpush1.bf16.msk.msra.mxu0 %vm6903_vm2, %v6020_v35  ;;  %v1365_v35 = vrot.slane %v7238_v55, %v7293_v19 }
  0x8e   : > { %6052 = vmatpush1.bf16.msk.msra.mxu1 %vm6903_vm2, %v6050_v36 }
  0x90   : > { %5729 = vmatmul.mubr.msk.f32.vlgmr.msra.gmra.mrb[12].mxu0 %vm449_vm3, %v6940_v39 }
  0x91   : > { %5733 = vmatmul.mubr.msk.f32.vlgmr.msra.gmra.mrb[12].mxu1 %vm449_vm3, %v6940_v39  ;;  %1037 = vmatprep.mubr.f32.mxu0 %v9832_v0 }
  0x92   : > { %1114 = vmatprep.mubr.f32.mxu1 %v9832_v0 }
  0x94   : > { %5730 = vmatmul.mubr.msk.f32.gmra.mrb[14].mxu0 %vm449_vm3, %v6963_v53 }
  0x95   : > { %3713 = vmatprep.mubr.f32.mxu0 %v9832_v0  ;;  %5734 = vmatmul.mubr.msk.f32.gmra.mrb[14].mxu1 %vm449_vm3, %v6963_v53  ;;  %v7223_v53 = vpop.permute.xlu1 %6527 }
  0x96   : > { %3784 = vmatprep.mubr.f32.mxu1 %v9832_v0  ;;  %v6529_v60 = vunpack.i.l.bf16 %v7223_v53  ;;  %v9825_v14 = vunpack.i.h.bf16 %v7223_v53 }
  0x97   : > { %v7207_v15 = vpop.permute.xlu0 %1162 }
  0x98   : > { %v1312_v34 = vsel %vm1295_vm4, %v6529_v60, %v9825_v14 }
  0x99   : > { %v6533_v58 = vpop.permute.xlu1 %6532  ;;  %v1461_v57 = vmul.f32 %v1365_v35, %v1312_v34 }
  0x9a   : > { %v6535_v62 = vunpack.i.h.bf16 %v6533_v58  ;;  %v6534_v63 = vunpack.i.l.bf16 %v6533_v58 }
  0x9b   : > { %v6523_v39 = vpop.permute.xlu0 %6522 }
  0x9c   : > { %v6525_v51 = vunpack.i.h.bf16 %v6523_v39  ;;  %v6524_v52 = vunpack.i.l.bf16 %v6523_v39  ;;  %v1593_v31 = vsel %vm1574_vm5, %v6534_v63, %v6535_v62 }
  0x9d   : > { %v7264_v6 = vpop.permute.xlu1 %1251  ;;  %v1739_v46 = vmul.f32 %v1637_v32, %v1593_v31 }
  0x9e   : > { %10077 = vst [vmem:[#allocation14_spill] sm:$0xff] %v7264_v6  ;;  %v1315_v11 = vsel %vm1295_vm4, %v7264_v6, %v6524_v52  ;;  %v1313_v16 = vsel %vm1295_vm4, %v6525_v51, %v6529_v60  ;;  %v1314_v23 = vsel %vm1295_vm4, %v6524_v52, %v6525_v51  ;;  %v5751_v51 = vld [vmem:[%s9821_s4 + $0x3] ss:$8 sm:$0xf] }
  0x9f   : > { %v7209_v37 = vpop.permute.xlu0 %6537  ;;  %v1458_v24 = vmul.f32 %v1353_v4, %v1315_v11  ;;  %v1460_v29 = vmul.f32 %v1361_v8, %v1313_v16  ;;  %v1459_v33 = vmul.f32 %v1357_v28, %v1314_v23  ;;  %v5752_v52 = vld [vmem:[%s9821_s4 + $0x3] ss:$8 sm:$0xf0]  ;;  %v5757_v16 = vld [vmem:[%s9821_s4 + $0x5] ss:$8 sm:$0xf] }
  0xa0   : > { %v6539_v54 = vunpack.i.l.bf16 %v7209_v37  ;;  %v9826_v3 = vunpack.i.h.bf16 %v7209_v37  ;;  %v7339_v8 = vor.u32 %v5752_v52, %v5751_v51 }
  0xa1   : > { %v6543_v27 = vpop.permute.xlu1 %6542 }
  0xa2   : > { %v1592_v17 = vsel %vm1574_vm5, %v6535_v62, %v6539_v54  ;;  %v1591_v36 = vsel %vm1574_vm5, %v6539_v54, %v9826_v3  ;;  %v6545_v44 = vunpack.i.h.bf16 %v6543_v27  ;;  %v1921_v54 = vrot.slane %v7300_v26, %v7248_v59  ;;  %10086 = vst [vmem:[#allocation23_spill] sm:$0xff] %v7339_v8 }
  0xa3   : > { %v7211_v38 = vpop.permute.xlu0 %1532  ;;  %v1740_v30 = vmul.f32 %v1641_v9, %v1592_v17  ;;  %v6544_v62 = vunpack.i.l.bf16 %v6543_v27  ;;  %v1741_v4 = vmul.f32 %v1645_v48, %v1591_v36  ;;  %v1917_v17 = vrot.slane %v7300_v26, %v7267_v7 }
  0xa4   : > { %10070 = vst [vmem:[#allocation7_spill] sm:$0xff] %v7211_v38  ;;  %v1594_v10 = vsel %vm1574_vm5, %v7211_v38, %v6534_v63  ;;  %v7334_v63 = vpack.c.bf16 %v1739_v46, %v1459_v33  ;;  %v2201_v23 = vrot.slane %v7339_v8, %v7248_v59  ;;  %v2193_v27 = vrot.slane %v7339_v8, %v7257_v2 }
  0xa5   : > { %v1738_v25 = vmul.f32 %v1633_v5, %v1594_v10  ;;  %v6553_v60 = vpop.permute.xlu1 %6552  ;;  %v7337_v5 = vpack.c.bf16 %v1740_v30, %v1460_v29  ;;  %v7346_v12 = vpack.c.bf16 %v1741_v4, %v1461_v57  ;;  %v5758_v30 = vld [vmem:[%s9821_s4 + $0x5] ss:$8 sm:$0xf0]  ;;  %v1873_v34 = vsel %vm1854_vm6, %v6544_v62, %v6545_v44 }
  0xa6   : > { %10084 = vst [vmem:[#allocation21_spill] sm:$0xff] %v7334_v63  ;;  %v6555_v9 = vunpack.i.h.bf16 %v6553_v60  ;;  %v6554_v10 = vunpack.i.l.bf16 %v6553_v60  ;;  %6054 = vmatprep.subr.bf16.mxu0 %v7334_v63  ;;  %v7377_v33 = vor.u32 %v5758_v30, %v5757_v16  ;;  %v2019_v4 = vmul.f32 %v1917_v17, %v1873_v34 }
  0xa7   : > { %v7213_v40 = vpop.permute.xlu0 %6547  ;;  %v7327_v56 = vpack.c.bf16 %v1738_v25, %v1458_v24  ;;  %10085 = vst [vmem:[#allocation22_spill] sm:$0xff] %v7337_v5  ;;  %10087 = vst [vmem:[#allocation24_spill] sm:$0xff] %v7346_v12  ;;  %6070 = vmatprep.subr.bf16.mxu1 %v7346_v12 }
  0xa8   : > { %v9823_v20 = vunpack.i.h.bf16 %v7213_v40  ;;  %v6549_v21 = vunpack.i.l.bf16 %v7213_v40  ;;  %10090 = vst [vmem:[#allocation27_spill] sm:$0xff] %v7377_v33  ;;  %6072 = vmatpush1.bf16.msra.mxu1 %v7337_v5  ;;  %v2481_v52 = vrot.slane %v7377_v33, %v7248_v59  ;;  %v2153_v57 = vsel %vm2134_vm7, %v6554_v10, %v6555_v9 }
  0xa9   : > { %10082 = vst [vmem:[#allocation19_spill] sm:$0xff] %v7327_v56  ;;  %6056 = vmatpush1.bf16.msra.mxu0 %v7327_v56  ;;  %v7365_v28 = vpop.permute.xlu1 %1812  ;;  %v2485_v5 = vrot.slane %v7377_v33, %v7293_v19 }
  0xaa   : > { %v1872_v11 = vsel %vm1854_vm6, %v6545_v44, %v6549_v21  ;;  %10088 = vst [vmem:[#allocation25_spill] sm:$0xff] %v7365_v28  ;;  %v1874_v32 = vsel %vm1854_vm6, %v7365_v28, %v6544_v62  ;;  %v2197_v44 = vrot.slane %v7339_v8, %v7267_v7  ;;  %v1925_v62 = vrot.slane %v7300_v26, %v7293_v19 }
  0xab   : > { %v7215_v41 = vpop.permute.xlu0 %6557  ;;  %v2020_v36 = vmul.f32 %v1921_v54, %v1872_v11  ;;  %v2018_v48 = vmul.f32 %v1913_v13, %v1874_v32  ;;  %v1871_v54 = vsel %vm1854_vm6, %v6549_v21, %v9823_v20  ;;  %v5763_v21 = vld [vmem:[%s9821_s4 + $0x6] ss:$8 sm:$0xf] }
  0xac   : > { %v9824_v22 = vunpack.i.h.bf16 %v7215_v41  ;;  %v6559_v39 = vunpack.i.l.bf16 %v7215_v41  ;;  %v2299_v17 = vmul.f32 %v2197_v44, %v2153_v57 }
  0xad   : > { %v6563_v60 = vpop.permute.xlu1 %6562 }
  0xae   : > { %v2152_v24 = vsel %vm2134_vm7, %v6555_v9, %v6559_v39  ;;  %v6565_v11 = vunpack.i.h.bf16 %v6563_v60  ;;  %v6564_v13 = vunpack.i.l.bf16 %v6563_v60  ;;  %v2151_v9 = vsel %vm2134_vm7, %v6559_v39, %v9824_v22 }
  0xaf   : > { %v7217_v42 = vpop.permute.xlu0 %2092  ;;  %v2300_v46 = vmul.f32 %v2201_v23, %v2152_v24  ;;  %v2021_v23 = vmul.f32 %v1925_v62, %v1871_v54  ;;  %v2473_v39 = vrot.slane %v7377_v33, %v7257_v2  ;;  %v7427_v60 = vpack.c.bf16 %v2299_v17, %v2019_v4 }
  0xb0   : > { %10071 = vst [vmem:[#allocation8_spill] sm:$0xff] %v7217_v42  ;;  %v2154_v25 = vsel %vm2134_vm7, %v7217_v42, %v6554_v10  ;;  %v2205_v10 = vrot.slane %v7339_v8, %v7293_v19 }
  0xb1   : > { %v2298_v51 = vmul.f32 %v2193_v27, %v2154_v25  ;;  %v5764_v25 = vld [vmem:[%s9821_s4 + $0x6] ss:$8 sm:$0xf0]  ;;  %10093 = vst [vmem:[#allocation30_spill] sm:$0xff] %v7427_v60  ;;  %6058 = vmatprep.subr.bf16.mxu0 %v7427_v60 }
  0xb2   : > { %v2301_v32 = vmul.f32 %v2205_v10, %v2151_v9  ;;  %v7436_v62 = vor.u32 %v5764_v25, %v5763_v21  ;;  %v5770_v21 = vld [vmem:[%s9821_s4 + $0x7] ss:$8 sm:$0xf0] }
  0xb3   : > { %v7219_v43 = vpop.permute.xlu0 %6567  ;;  %v7413_v27 = vpack.c.bf16 %v2298_v51, %v2018_v48  ;;  %v7429_v48 = vpack.c.bf16 %v2300_v46, %v2020_v36  ;;  %v7431_v51 = vpop.permute.xlu1 %6577  ;;  %v7444_v36 = vsub.s32 3, %v7233_v49 }
  0xb4   : > { %v9829_v31 = vunpack.i.h.bf16 %v7219_v43  ;;  %v9827_v35 = vunpack.i.l.bf16 %v7219_v43  ;;  %10095 = vst [vmem:[#allocation32_spill] sm:$0xff] %v7431_v51  ;;  %v7434_v54 = vpack.c.bf16 %v2301_v32, %v2021_v23  ;;  %10097 = vst [vmem:[#allocation34_spill] sm:$0xff] %v7436_v62  ;;  %v9830_v9 = vunpack.i.h.bf16 %v7431_v51  ;;  %v5769_v23 = vld [vmem:[%s9821_s4 + $0x7] ss:$8 sm:$0xf] }
  0xb5   : > { %10092 = vst [vmem:[#allocation29_spill] sm:$0xff] %v7413_v27  ;;  %10094 = vst [vmem:[#allocation31_spill] sm:$0xff] %v7429_v48  ;;  %6060 = vmatpush1.bf16.msra.mxu0 %v7413_v27  ;;  %v2761_v10 = vrot.slane %v7436_v62, %v7248_v59  ;;  %v2753_v32 = vrot.slane %v7436_v62, %v7257_v2  ;;  %v7474_v22 = vor.u32 %v5770_v21, %v5769_v23 }
  0xb6   : > { %v2431_v30 = vsel %vm2414_vm8, %v6565_v11, %v9827_v35  ;;  %v2433_v34 = vsel %vm2414_vm8, %v9829_v31, %v6564_v13  ;;  %10096 = vst [vmem:[#allocation33_spill] sm:$0xff] %v7434_v54  ;;  %6074 = vmatprep.subr.bf16.mxu1 %v7434_v54 }
  0xb7   : > { %v7221_v45 = vpop.permute.xlu0 %6572  ;;  %v7425_v57 = vmul.f32 %v2481_v52, %v2431_v30  ;;  %v9828_v52 = vunpack.i.l.bf16 %v7431_v51  ;;  %v2578_v46 = vmul.f32 %v2473_v39, %v2433_v34  ;;  %6076 = vmatpush1.bf16.msra.mxu1 %v7429_v48  ;;  %v6583_v25 = vpop.permute.xlu1 %6582  ;;  %v2432_v39 = vsel %vm2414_vm8, %v6564_v13, %v6565_v11  ;;  %10099 = vst [vmem:[#allocation36_spill] sm:$0xff] %v7474_v22 }
  0xb8   : > { %v6575_v16 = vunpack.i.h.bf16 %v7221_v45  ;;  %v6574_v44 = vunpack.i.l.bf16 %v7221_v45  ;;  %v2477_v30 = vrot.slane %v7377_v33, %v7267_v7  ;;  %v6585_v11 = vunpack.i.h.bf16 %v6583_v25 }
  0xb9   : > { %v6584_v13 = vunpack.i.l.bf16 %v6583_v25  ;;  %v3033_v35 = vrot.slane %v7474_v22, %v7257_v2  ;;  %v7483_v31 = vpack.c.bf16 %v2578_v46, %v9832_v0  ;;  %v2469_v46 = vrot.slane %v7377_v33, %v7444_v36 }
  0xba   : > { %v2711_v34 = vsel %vm2694_vm9, %v6575_v16, %v9828_v52  ;;  %v2713_v20 = vsel %vm2694_vm9, %v9830_v9, %v6574_v44  ;;  %v2579_v14 = vmul.f32 %v2477_v30, %v2432_v39  ;;  %v3041_v52 = vrot.slane %v7474_v22, %v7248_v59 }
  0xbb   : > { %v7235_v50 = vpop.permute.xlu0 %6587  ;;  %10100 = vst [vmem:[#allocation37_spill] sm:$0xff] %v7483_v31  ;;  %v2860_v4 = vmul.f32 %v2761_v10, %v2711_v34  ;;  %v2858_v30 = vmul.f32 %v2753_v32, %v2713_v20  ;;  %v7498_v10 = vpop.permute.xlu1 %6597  ;;  %v2712_v34 = vsel %vm2694_vm9, %v6574_v44, %v6575_v16  ;;  %v3037_v20 = vrot.slane %v7474_v22, %v7267_v7 }
  0xbc   : > { %10072 = vst [vmem:[#allocation9_spill] sm:$0xff] %v7235_v50  ;;  %v9831_v45 = vunpack.i.l.bf16 %v7235_v50  ;;  %v10101_v21 = vunpack.i.h.bf16 %v7235_v50  ;;  %v7494_v39 = vpack.c.bf16 %v2579_v14, %v9832_v0  ;;  %10103 = vst [vmem:[#allocation39_spill] sm:$0xff] %v7498_v10  ;;  %v2992_v14 = vsel %vm2974_vm10, %v6584_v13, %v6585_v11 }
  0xbd   : > { %v9834_v32 = vunpack.i.h.bf16 %v7498_v10  ;;  %v3139_v44 = vmul.f32 %v3037_v20, %v2992_v14  ;;  %v10107_v0 = vunpack.i.h.bf16 %v7219_v43  ;;  %v3045_v33 = vrot.slane %v7474_v22, %v7293_v19 }
  0xbe   : > { %v2991_v23 = vsel %vm2974_vm10, %v6585_v11, %v9831_v45  ;;  %v2993_v25 = vsel %vm2974_vm10, %v10101_v21, %v6584_v13  ;;  %10102 = vst [vmem:[#allocation38_spill] sm:$0xff] %v7494_v39  ;;  %6062 = vmatprep.subr.bf16.mxu0 %v7494_v39  ;;  %v2757_v45 = vrot.slane %v7436_v62, %v7267_v7  ;;  %v5776_v11 = vld [vmem:[%s9821_s4 + $0xc0] ss:$8 sm:$0xf0] }
  0xbf   : > { %v7254_v1 = vpop.permute.xlu0 %6592  ;;  %v3138_v9 = vmul.f32 %v3033_v35, %v2993_v25  ;;  %v3140_v3 = vmul.f32 %v3041_v52, %v2991_v23  ;;  %6064 = vmatpush1.bf16.msra.mxu0 %v7483_v31  ;;  %v5775_v23 = vld [vmem:[%s9821_s4 + $0xc0] ss:$8 sm:$0xf]  ;;  %v7712_v54 = vpop.permute.xlu1 %6602 }
  0xc0   : > { %v6594_v52 = vunpack.i.l.bf16 %v7254_v1  ;;  %v2859_v16 = vmul.f32 %v2757_v45, %v2712_v34  ;;  %v7524_v25 = vor.u32 %v5776_v11, %v5775_v23  ;;  %10132 = vst [vmem:[#allocation64_spill] sm:$0xff] %v7712_v54  ;;  %v5741_v54 = vld [vmem:[%s9821_s4 + $0x41] ss:$8 sm:$0xf] }
  0xc1   : > { %v7520_v13 = vpack.c.bf16 %v3140_v3, %v2860_v4  ;;  %v7522_v21 = vpack.c.bf16 %v3138_v9, %v2858_v30  ;;  %v10111_v9 = vunpack.i.h.bf16 %v7254_v1 }
  0xc2   : > { %10106 = vst [vmem:[#allocation42_spill] sm:$0xff] %v7524_v25  ;;  %v7532_v34 = vpack.c.bf16 %v3139_v44, %v2859_v16  ;;  %v3273_v3 = vsel %vm3254_vm11, %v9834_v32, %v6594_v52  ;;  %v3317_v30 = vrot.slane %v7524_v25, %v7267_v7 }
  0xc3   : > { %v7290_v18 = vpop.permute.xlu0 %1249  ;;  %10104 = vst [vmem:[#allocation40_spill] sm:$0xff] %v7520_v13  ;;  %10105 = vst [vmem:[#allocation41_spill] sm:$0xff] %v7522_v21  ;;  %v3272_v4 = vsel %vm3254_vm11, %v6594_v52, %v10111_v9 }
  0xc4   : > { %10079 = vst [vmem:[#allocation16_spill] sm:$0xff] %v7290_v18  ;;  %10109 = vst [vmem:[#allocation43_spill] sm:$0xff] %v7532_v34  ;;  %6066 = vmatprep.subr.bf16.mxu0 %v7532_v34 }
  0xc5   : > { %6068 = vmatpush1.bf16.msra.mxu0 %v7522_v21 }
  0xc7   : > { %v7332_v58 = vpop.permute.xlu0 %1530 }
  0xc8   : > { %10083 = vst [vmem:[#allocation20_spill] sm:$0xff] %v7332_v58 }
  0xcb   : > { %v7367_v29 = vpop.permute.xlu0 %1810 }
  0xcc   : > { %10089 = vst [vmem:[#allocation26_spill] sm:$0xff] %v7367_v29 }
  0xcf   : > { %v7405_v24 = vpop.permute.xlu0 %2090 }
  0xd0   : > { %10091 = vst [vmem:[#allocation28_spill] sm:$0xff] %v7405_v24 }
  0xd3   : > { %v7452_v17 = vpop.permute.xlu0 %6627 }
  0xd4   : > { %10098 = vst [vmem:[#allocation35_spill] sm:$0xff] %v7452_v17  ;;  %v10108_v35 = vunpack.i.l.bf16 %v7452_v17  ;;  %v2765_v17 = vrot.slane %v7436_v62, %v7293_v19  ;;  %v10142_v62 = vunpack.i.l.bf16 %v7235_v50 }
  0xd6   : > { %v2434_v45 = vsel %vm2414_vm8, %v10108_v35, %v10107_v0  ;;  %v3313_v0 = vrot.slane %v7524_v25, %v7257_v2 }
  0xd7   : > { %v7534_v14 = vmul.f32 %v2469_v46, %v2434_v45  ;;  %v7550_v46 = vmul.f32 %v3317_v30, %v3272_v4 }
  0xd8   : > { %v7552_v20 = vmul.f32 %v3313_v0, %v3273_v3 }
  0xd9   : > { %10110 = vst [vmem:[#allocation44_spill] sm:$0xff] %v7534_v14  ;;  %10112 = vst [vmem:[#allocation45_spill] sm:$0xff] %v7550_v46  ;;  %3665 = vmatprep.subr.mxu0 %v7550_v46  ;;  %v10138_v14 = vunpack.i.l.bf16 %v7219_v43 }
  0xda   : > { %10113 = vst [vmem:[#allocation46_spill] sm:$0xff] %v7552_v20  ;;  %3666 = vmatpush1.msra.mxu0 %v7552_v20 }
 0x10f   : > { %v571_v35 = vpop.f32.mrb[0].mxu0 }
 0x110   : > { %v1165_v52 = vadd.f32 %v7207_v15, %v571_v35  ;;  %v648_v16 = vpop.f32.mrb[0].mxu1  ;;  %v573_v44 = vpop.f32.mrb[1].mxu0 }
 0x111   : > { %v650_v23 = vpop.f32.mrb[1].mxu1  ;;  %v1167_v30 = vadd.f32 %v7207_v15, %v648_v16  ;;  %v1166_v35 = vadd.f32 %v7207_v15, %v573_v44 }
 0x112   : > { %v7557_v11 = vmax.f32 %v1165_v52, 0.0  ;;  %v1168_v16 = vadd.f32 %v7207_v15, %v650_v23 }
 0x113   : > { %v7559_v45 = vpop.f32.mrb[2].mxu0  ;;  %v7576_v0 = vmax.f32 %v1167_v30, 0.0  ;;  %v7595_v52 = vmax.f32 %v1166_v35, 0.0 }
 0x114   : > { %10114 = vst [vmem:[#allocation47_spill] sm:$0xff] %v7559_v45  ;;  %2662 = vrot.lane.b32.xlu0 %v7557_v11, %s6735_s17  ;;  %2382 = vrot.lane.b32.xlu1 %v7557_v11, %s6734_s16  ;;  %v7565_v3 = vpop.f32.mrb[2].mxu1  ;;  %v7567_v9 = vpop.f32.mrb[3].mxu0  ;;  %v7607_v35 = vmax.f32 %v1168_v16, 0.0 }
 0x115   : > { %10115 = vst [vmem:[#allocation48_spill] sm:$0xff] %v7565_v3  ;;  %10116 = vst [vmem:[#allocation49_spill] sm:$0xff] %v7567_v9  ;;  %v7569_v4 = vpop.f32.mrb[3].mxu1  ;;  %v7605_v9 = vld [vmem:[%s9819_s2 + $0x8] sm:$0xff]  ;;  %v10119_v3 = vmov 0.0  }
 0x116   : > { %10117 = vst [vmem:[#allocation50_spill] sm:$0xff] %v7569_v4  ;;  %5782 = vmatmul.mubr.msk.f32.vlgmr.msra.gmra.mrb[16].mxu0 %vm3645_vm12, %v7605_v9 }
 0x117   : > { %3855 = vmatprep.mubr.f32.mxu0 %v10119_v3 }
 0x118   : > { %1261 = vrot.lane.b32.xlu0 %v7557_v11, %s6729_s9  ;;  %2942 = vrot.lane.b32.xlu1 %v7557_v11, %s6736_s26 }
 0x11c   : > { %1265 = vrot.lane.b32.xlu0 %v7576_v0, %s6729_s9  ;;  %1822 = vrot.lane.b32.xlu1 %v7557_v11, %s6731_s14 }
 0x120   : > { %1542 = vrot.lane.b32.xlu0 %v7557_v11, %s6730_s13  ;;  %1826 = vrot.lane.b32.xlu1 %v7576_v0, %s6731_s14 }
 0x124   : > { %1546 = vrot.lane.b32.xlu0 %v7576_v0, %s6730_s13  ;;  %2102 = vrot.lane.b32.xlu1 %v7557_v11, %s6732_s15 }
 0x128   : > { %3222 = vrot.lane.b32.xlu0 %v7557_v11, %s6737_s7  ;;  %2106 = vrot.lane.b32.xlu1 %v7576_v0, %s6732_s15 }
 0x12b   : > { %v725_v30 = vpop.f32.mrb[4].mxu0 }
 0x12c   : > { %v802_v32 = vpop.f32.mrb[4].mxu1  ;;  %2386 = vrot.lane.b32.xlu0 %v7576_v0, %s6734_s16  ;;  %1263 = vrot.lane.b32.xlu1 %v7595_v52, %s6729_s9  ;;  %v727_v4 = vpop.f32.mrb[5].mxu0  ;;  %v1169_v16 = vadd.f32 %v7207_v15, %v725_v30 }
 0x12d   : > { %v804_v44 = vpop.f32.mrb[5].mxu1 }
 0x12e   : > { %v7655_v21 = vmax.f32 %v1169_v16, 0.0  ;;  %v1171_v16 = vadd.f32 %v7207_v15, %v802_v32  ;;  %v1172_v48 = vadd.f32 %v7207_v15, %v804_v44 }
 0x12f   : > { %v7611_v23 = vpop.f32.mrb[6].mxu0 }
 0x130   : > { %10118 = vst [vmem:[#allocation51_spill] sm:$0xff] %v7611_v23  ;;  %2666 = vrot.lane.b32.xlu0 %v7576_v0, %s6735_s17  ;;  %1267 = vrot.lane.b32.xlu1 %v7607_v35, %s6729_s9  ;;  %v7618_v45 = vpop.f32.mrb[6].mxu1  ;;  %v7620_v20 = vpop.f32.mrb[7].mxu0  ;;  %10123 = vst [vmem:[#allocation55_spill] sm:$0xff] %v7655_v21  ;;  %v7718_v60 = vmax.f32 %v1172_v48, 0.0 }
 0x131   : > { %10120 = vst [vmem:[#allocation52_spill] sm:$0xff] %v7618_v45  ;;  %10121 = vst [vmem:[#allocation53_spill] sm:$0xff] %v7620_v20  ;;  %v7622_v46 = vpop.f32.mrb[7].mxu1 }
 0x132   : > { %10122 = vst [vmem:[#allocation54_spill] sm:$0xff] %v7622_v46  ;;  %10133 = vst [vmem:[#allocation65_spill] sm:$0xff] %v7718_v60 }
 0x134   : > { %2946 = vrot.lane.b32.xlu0 %v7576_v0, %s6736_s26  ;;  %1544 = vrot.lane.b32.xlu1 %v7595_v52, %s6730_s13 }
 0x138   : > { %3226 = vrot.lane.b32.xlu0 %v7576_v0, %s6737_s7  ;;  %1548 = vrot.lane.b32.xlu1 %v7607_v35, %s6730_s13 }
 0x13c   : > { %1824 = vrot.lane.b32.xlu0 %v7595_v52, %s6731_s14  ;;  %2384 = vrot.lane.b32.xlu1 %v7595_v52, %s6734_s16 }
 0x140   : > { %1828 = vrot.lane.b32.xlu0 %v7607_v35, %s6731_s14  ;;  %2388 = vrot.lane.b32.xlu1 %v7607_v35, %s6734_s16 }
 0x144   : > { %2104 = vrot.lane.b32.xlu0 %v7595_v52, %s6732_s15  ;;  %2664 = vrot.lane.b32.xlu1 %v7595_v52, %s6735_s17 }
 0x147   : > { %v879_v46 = vpop.f32.mrb[8].mxu0 }
 0x148   : > { %v7645_v20 = vpop.f32.mrb[8].mxu1  ;;  %2108 = vrot.lane.b32.xlu0 %v7607_v35, %s6732_s15  ;;  %2668 = vrot.lane.b32.xlu1 %v7607_v35, %s6735_s17  ;;  %v7651_v45 = vpop.f32.mrb[9].mxu0  ;;  %v1173_v63 = vadd.f32 %v7207_v15, %v879_v46  ;;  %v10139_v46 = vunpack.i.l.bf16 %v7431_v51  ;;  %v7793_v51 = vpack.c.bf16 %v7425_v57, %v10119_v3  ;;  %v6599_v57 = vunpack.i.l.bf16 %v7498_v10 }
 0x149   : > { %v7653_v23 = vpop.f32.mrb[9].mxu1  ;;  %v1174_v61 = vadd.f32 %v7207_v15, %v7651_v45  ;;  %v5747_v45 = vld [vmem:[%s9821_s4 + $0x42] ss:$8 sm:$0xf] }
 0x14a   : > { %10143 = vst [vmem:[#allocation72_spill] sm:$0xff] %v7793_v51 }
 0x14b   : > { %v7657_v34 = vpop.f32.mrb[10].mxu0 }
 0x14c   : > { %10124 = vst [vmem:[#allocation56_spill] sm:$0xff] %v7657_v34  ;;  %2944 = vrot.lane.b32.xlu1 %v7595_v52, %s6736_s26  ;;  %2390 = vrot.lane.b32.xlu0 %v7655_v21, %s6734_s16  ;;  %v7663_v30 = vpop.f32.mrb[10].mxu1  ;;  %v7665_v31 = vpop.f32.mrb[11].mxu0  ;;  %v1170_v34 = vadd.f32 %v7207_v15, %v727_v4 }
 0x14d   : > { %10125 = vst [vmem:[#allocation57_spill] sm:$0xff] %v7663_v30  ;;  %10126 = vst [vmem:[#allocation58_spill] sm:$0xff] %v7665_v31  ;;  %v7667_v39 = vpop.f32.mrb[11].mxu1  ;;  %v7720_v4 = vpop.permute.xlu1 %6607 }
 0x14e   : > { %10127 = vst [vmem:[#allocation59_spill] sm:$0xff] %v7667_v39  ;;  %v7682_v39 = vmax.f32 %v1171_v16, 0.0  ;;  %v7710_v27 = vmax.f32 %v1170_v34, 0.0  ;;  %10134 = vst [vmem:[#allocation66_spill] sm:$0xff] %v7720_v4 }
 0x150   : > { %2948 = vrot.lane.b32.xlu1 %v7607_v35, %s6736_s26  ;;  %2670 = vrot.lane.b32.xlu0 %v7655_v21, %s6735_s17  ;;  %10128 = vst [vmem:[#allocation60_spill] sm:$0xff] %v7682_v39  ;;  %10131 = vst [vmem:[#allocation63_spill] sm:$0xff] %v7710_v27 }
 0x151   : > { %v7730_v34 = vpop.permute.xlu1 %6612 }
 0x152   : > { %10135 = vst [vmem:[#allocation67_spill] sm:$0xff] %v7730_v34 }
 0x154   : > { %3224 = vrot.lane.b32.xlu1 %v7595_v52, %s6737_s7  ;;  %2950 = vrot.lane.b32.xlu0 %v7655_v21, %s6736_s26 }
 0x155   : > { %v7736_v48 = vpop.permute.xlu1 %6617 }
 0x156   : > { %10136 = vst [vmem:[#allocation68_spill] sm:$0xff] %v7736_v48 }
 0x158   : > { %3228 = vrot.lane.b32.xlu1 %v7607_v35, %s6737_s7  ;;  %3230 = vrot.lane.b32.xlu0 %v7655_v21, %s6737_s7 }
 0x159   : > { %v7746_v44 = vpop.permute.xlu1 %6622 }
 0x15a   : > { %10137 = vst [vmem:[#allocation69_spill] sm:$0xff] %v7746_v44 }
 0x15c   : > { %1269 = vrot.lane.b32.xlu1 %v7655_v21, %s6729_s9  ;;  %2394 = vrot.lane.b32.xlu0 %v7682_v39, %s6734_s16 }
 0x160   : > { %1273 = vrot.lane.b32.xlu1 %v7682_v39, %s6729_s9  ;;  %2674 = vrot.lane.b32.xlu0 %v7682_v39, %s6735_s17 }
 0x163   : > { %v7692_v32 = vpop.f32.mrb[12].mxu0 }
 0x164   : > { %v7694_v31 = vpop.f32.mrb[12].mxu1  ;;  %1550 = vrot.lane.b32.xlu1 %v7655_v21, %s6730_s13  ;;  %2954 = vrot.lane.b32.xlu0 %v7682_v39, %s6736_s26  ;;  %v7700_v16 = vpop.f32.mrb[13].mxu0 }
 0x165   : > { %10129 = vst [vmem:[#allocation61_spill] sm:$0xff] %v7694_v31  ;;  %10130 = vst [vmem:[#allocation62_spill] sm:$0xff] %v7700_v16  ;;  %v7702_v30 = vpop.f32.mrb[13].mxu1 }
 0x168   : > { %1554 = vrot.lane.b32.xlu1 %v7682_v39, %s6730_s13  ;;  %3234 = vrot.lane.b32.xlu0 %v7682_v39, %s6737_s7 }
 0x16c   : > { %1830 = vrot.lane.b32.xlu1 %v7655_v21, %s6731_s14  ;;  %1271 = vrot.lane.b32.xlu0 %v7710_v27, %s6729_s9 }
 0x170   : > { %1834 = vrot.lane.b32.xlu1 %v7682_v39, %s6731_s14  ;;  %1275 = vrot.lane.b32.xlu0 %v7718_v60, %s6729_s9 }
 0x174   : > { %2110 = vrot.lane.b32.xlu1 %v7655_v21, %s6732_s15  ;;  %1552 = vrot.lane.b32.xlu0 %v7710_v27, %s6730_s13 }
 0x178   : > { %2114 = vrot.lane.b32.xlu1 %v7682_v39, %s6732_s15  ;;  %1556 = vrot.lane.b32.xlu0 %v7718_v60, %s6730_s13 }
 0x17c   : > { %2392 = vrot.lane.b32.xlu1 %v7710_v27, %s6734_s16  ;;  %1832 = vrot.lane.b32.xlu0 %v7710_v27, %s6731_s14 }
 0x180   : > { %2396 = vrot.lane.b32.xlu1 %v7718_v60, %s6734_s16  ;;  %1836 = vrot.lane.b32.xlu0 %v7718_v60, %s6731_s14 }
 0x184   : > { %2672 = vrot.lane.b32.xlu1 %v7710_v27, %s6735_s17  ;;  %2112 = vrot.lane.b32.xlu0 %v7710_v27, %s6732_s15 }
 0x186   : > { %v7754_v56 = vpop.permute.xlu0 %2662  ;;  %v7756_v12 = vpop.permute.xlu1 %2382 }
 0x187   : > { %v2430_v44 = vsel %vm2414_vm8, %v10138_v14, %v7756_v12  ;;  %v2710_v43 = vsel %vm2694_vm9, %v10139_v46, %v7754_v56 }
 0x188   : > { %v2581_v48 = vmul.f32 %v2485_v5, %v2430_v44  ;;  %2676 = vrot.lane.b32.xlu1 %v7718_v60, %s6735_s17  ;;  %2116 = vrot.lane.b32.xlu0 %v7718_v60, %s6732_s15  ;;  %v7784_v44 = vmax.f32 %v1173_v63, 0.0  ;;  %v2861_v46 = vmul.f32 %v2765_v17, %v2710_v43  ;;  %v1175_v43 = vadd.f32 %v7207_v15, %v7645_v20 }
 0x18a   : > { %v7777_v14 = vpop.permute.xlu0 %1261  ;;  %v7779_v34 = vpop.permute.xlu1 %2942  ;;  %v7782_v5 = vpack.c.bf16 %v2581_v48, %v10119_v3  ;;  %10141 = vst [vmem:[#allocation71_spill] sm:$0xff] %v7784_v44  ;;  %v7842_v10 = vmax.f32 %v1175_v43, 0.0 }
 0x18b   : > { %v2990_v22 = vsel %vm2974_vm10, %v10142_v62, %v7779_v34 }
 0x18c   : > { %10140 = vst [vmem:[#allocation70_spill] sm:$0xff] %v7782_v5  ;;  %v3141_v4 = vmul.f32 %v3045_v33, %v2990_v22  ;;  %6078 = vmatprep.subr.bf16.mxu1 %v7782_v5  ;;  %2952 = vrot.lane.b32.xlu1 %v7710_v27, %s6736_s26 }
 0x18d   : > { %2398 = vrot.lane.b32.xlu0 %v7784_v44, %s6734_s16  ;;  %6080 = vmatpush1.bf16.msra.mxu1 %v7793_v51 }
 0x18e   : > { %v7801_v63 = vpop.permute.xlu0 %1265  ;;  %v7803_v48 = vpop.permute.xlu1 %1822  ;;  %v7805_v62 = vpack.c.bf16 %v3141_v4, %v2861_v46  ;;  %v3325_v46 = vrot.slane %v7524_v25, %v7293_v19 }
 0x190   : > { %10144 = vst [vmem:[#allocation73_spill] sm:$0xff] %v7805_v62  ;;  %6082 = vmatprep.subr.bf16.mxu1 %v7805_v62  ;;  %2956 = vrot.lane.b32.xlu1 %v7718_v60, %s6736_s26  ;;  %v10145_v62 = vunpack.i.h.bf16 %v7254_v1  ;;  %v5742_v1 = vld [vmem:[%s9821_s4 + $0x41] ss:$8 sm:$0xf0] }
 0x191   : > { %2678 = vrot.lane.b32.xlu0 %v7784_v44, %s6735_s17  ;;  %6084 = vmatpush1.bf16.msra.mxu1 %v7520_v13  ;;  %v3321_v13 = vrot.slane %v7524_v25, %v7248_v59  ;;  %v5736_v25 = vld [vmem:[%s9821_s4 + $0x40] ss:$8 sm:$0xf0] }
 0x192   : > { %v1543_v22 = vpop.permute.xlu0 %1542  ;;  %v7813_v33 = vpop.permute.xlu1 %1826  ;;  %v3271_v51 = vsel %vm3254_vm11, %v10145_v62, %v6599_v57 }
 0x193   : > { %v7859_v43 = vmul.f32 %v3321_v13, %v3271_v51  ;;  %v7878_v51 = vsub.s32 0, %v7233_v49 }
 0x194   : > { %3232 = vrot.lane.b32.xlu1 %v7710_v27, %s6737_s7 }
 0x195   : > { %2958 = vrot.lane.b32.xlu0 %v7784_v44, %s6736_s26  ;;  %10147 = vst [vmem:[#allocation75_spill] sm:$0xff] %v7859_v43 }
 0x196   : > { %v7820_v17 = vpop.permute.xlu0 %1546  ;;  %v7822_v4 = vpop.permute.xlu1 %2102 }
 0x198   : > { %3236 = vrot.lane.b32.xlu1 %v7718_v60, %s6737_s7  ;;  %v5754_v60 = vld [vmem:[%s9821_s4 + $0x43] ss:$8 sm:$0xf0] }
 0x199   : > { %3238 = vrot.lane.b32.xlu0 %v7784_v44, %s6737_s7 }
 0x19a   : > { %v7838_v5 = vpop.permute.xlu0 %3222  ;;  %v7840_v20 = vpop.permute.xlu1 %2106 }
 0x19b   : > { %v3270_v50 = vsel %vm3254_vm11, %v6599_v57, %v7838_v5  ;;  %v5735_v57 = vld [vmem:[%s9821_s4 + $0x40] ss:$8 sm:$0xf] }
 0x19c   : > { %1277 = vrot.lane.b32.xlu1 %v7784_v44, %s6729_s9  ;;  %v7855_v62 = vmul.f32 %v3325_v46, %v3270_v50  ;;  %v7870_v50 = vor.u32 %v5742_v1, %v5741_v54  ;;  %v7880_v13 = vor.u32 %v5736_v25, %v5735_v57  ;;  %v7886_v54 = vsub.s32 1, %v7233_v49 }
 0x19d   : > { %2402 = vrot.lane.b32.xlu0 %v7842_v10, %s6734_s16 }
 0x19e   : > { %10146 = vst [vmem:[#allocation74_spill] sm:$0xff] %v7855_v62  ;;  %v7867_v24 = vpop.permute.xlu0 %2386  ;;  %3736 = vmatprep.subr.mxu1 %v7855_v62  ;;  %v1264_v42 = vpop.permute.xlu1 %1263  ;;  %10148 = vst [vmem:[#allocation76_spill] sm:$0xff] %v7870_v50  ;;  %v10151_v62 = vunpack.i.h.bf16 %v7209_v37  ;;  %v1373_v57 = vrot.slane %v7880_v13, %v7886_v54  ;;  %v1653_v8 = vrot.slane %v7870_v50, %v7886_v54  ;;  %v7912_v37 = vsub.s32 2, %v7233_v49 }
 0x19f   : > { %3737 = vmatpush1.msra.mxu1 %v7859_v43  ;;  %10149 = vst [vmem:[#allocation77_spill] sm:$0xff] %v7880_v13  ;;  %v1649_v43 = vrot.slane %v7870_v50, %v7878_v51  ;;  %v1369_v29 = vrot.slane %v7880_v13, %v7878_v51  ;;  %v1310_v28 = vsel %vm1295_vm4, %v7777_v14, %v1264_v42 }
 0x1a0   : > { %1281 = vrot.lane.b32.xlu1 %v7842_v10, %s6729_s9  ;;  %5783 = vmatmul.mubr.msk.f32.vlgmr.msra.gmra.mrb[16].mxu1 %vm3645_vm12, %v7605_v9  ;;  %v1590_v25 = vsel %vm1574_vm5, %v10151_v62, %v1543_v22  ;;  %v10152_v62 = vunpack.i.h.bf16 %v7223_v53  ;;  %v1381_v6 = vrot.slane %v7880_v13, %v7444_v36  ;;  %v1463_v55 = vmul.f32 %v1373_v57, %v1310_v28 }
 0x1a1   : > { %2682 = vrot.lane.b32.xlu0 %v7842_v10, %s6735_s17  ;;  %3926 = vmatprep.mubr.f32.mxu1 %v10119_v3  ;;  %v1742_v18 = vmul.f32 %v1649_v43, %v1590_v25  ;;  %v1657_v53 = vrot.slane %v7870_v50, %v7912_v37  ;;  %v1377_v43 = vrot.slane %v7880_v13, %v7912_v37 }
 0x1a2   : > { %v7888_v46 = vpop.permute.xlu0 %2666  ;;  %v7890_v1 = vpop.permute.xlu1 %1267  ;;  %v1311_v58 = vsel %vm1295_vm4, %v10152_v62, %v7777_v14  ;;  %v1661_v14 = vrot.slane %v7870_v50, %v7444_v36  ;;  %v1309_v21 = vsel %vm1295_vm4, %v1264_v42, %v7801_v63  ;;  %v5760_v42 = vld [vmem:[%s9821_s4 + $0x45] ss:$8 sm:$0xf0] }
 0x1a3   : > { %10150 = vst [vmem:[#allocation78_spill] sm:$0xff] %v7890_v1  ;;  %v1462_v62 = vmul.f32 %v1369_v29, %v1311_v58  ;;  %v1308_v28 = vsel %vm1295_vm4, %v7801_v63, %v7890_v1  ;;  %v5748_v58 = vld [vmem:[%s9821_s4 + $0x42] ss:$8 sm:$0xf0] }
 0x1a4   : > { %1558 = vrot.lane.b32.xlu1 %v7784_v44, %s6730_s13  ;;  %v5753_v29 = vld [vmem:[%s9821_s4 + $0x43] ss:$8 sm:$0xf]  ;;  %v1465_v16 = vmul.f32 %v1381_v6, %v1308_v28  ;;  %v7987_v6 = vor.u32 %v5748_v58, %v5747_v45  ;;  %v5766_v45 = vld [vmem:[%s9821_s4 + $0x46] ss:$8 sm:$0xf0] }
 0x1a5   : > { %2962 = vrot.lane.b32.xlu0 %v7842_v10, %s6736_s26 }
 0x1a6   : > { %v7919_v38 = vpop.permute.xlu0 %2946  ;;  %v1545_v26 = vpop.permute.xlu1 %1544  ;;  %10156 = vst [vmem:[#allocation82_spill] sm:$0xff] %v7987_v6  ;;  %v1933_v58 = vrot.slane %v7987_v6, %v7886_v54 }
 0x1a7   : > { %v1589_v49 = vsel %vm1574_vm5, %v1543_v22, %v1545_v26  ;;  %v1176_v22 = vadd.f32 %v7207_v15, %v7653_v23  ;;  %v7963_v23 = vpack.c.bf16 %v1742_v18, %v1462_v62  ;;  %v7989_v18 = vor.u32 %v5754_v60, %v5753_v29  ;;  %v5771_v60 = vld [vmem:[%s9821_s4 + $0x47] ss:$8 sm:$0xf] }
 0x1a8   : > { %v1743_v39 = vmul.f32 %v1653_v8, %v1589_v49  ;;  %1562 = vrot.lane.b32.xlu1 %v7842_v10, %s6730_s13  ;;  %v1588_v8 = vsel %vm1574_vm5, %v1545_v26, %v7820_v17  ;;  %v7961_v49 = vmax.f32 %v1174_v61, 0.0  ;;  %v5759_v61 = vld [vmem:[%s9821_s4 + $0x45] ss:$8 sm:$0xf] }
 0x1a9   : > { %3242 = vrot.lane.b32.xlu0 %v7842_v10, %s6737_s7  ;;  %10155 = vst [vmem:[#allocation81_spill] sm:$0xff] %v7963_v23  ;;  %v7996_v62 = vmax.f32 %v1176_v22, 0.0  ;;  %v7998_v28 = vor.u32 %v5760_v42, %v5759_v61  ;;  %v2209_v22 = vrot.slane %v7989_v18, %v7878_v51 }
 0x1aa   : > { %v7955_v25 = vpop.permute.xlu0 %3226  ;;  %v7957_v26 = vpop.permute.xlu1 %1548  ;;  %v7959_v57 = vpack.c.bf16 %v1743_v39, %v1463_v55  ;;  %v1744_v55 = vmul.f32 %v1657_v53, %v1588_v8 }
 0x1ab   : > { %10153 = vst [vmem:[#allocation79_spill] sm:$0xff] %v7957_v26  ;;  %v1587_v27 = vsel %vm1574_vm5, %v7820_v17, %v7957_v26  ;;  %v2489_v61 = vrot.slane %v7998_v28, %v7878_v51  ;;  %v2493_v42 = vrot.slane %v7998_v28, %v7886_v54 }
 0x1ac   : > { %10154 = vst [vmem:[#allocation80_spill] sm:$0xff] %v7959_v57  ;;  %v1745_v39 = vmul.f32 %v1661_v14, %v1587_v27  ;;  %6086 = vmatprep.subr.bf16.mxu0 %v7959_v57  ;;  %1838 = vrot.lane.b32.xlu1 %v7784_v44, %s6731_s14  ;;  %v1464_v27 = vmul.f32 %v1377_v43, %v1309_v21  ;;  %v5765_v14 = vld [vmem:[%s9821_s4 + $0x46] ss:$8 sm:$0xf]  ;;  %v10160_v57 = vunpack.i.h.bf16 %v7213_v40 }
 0x1ad   : > { %1279 = vrot.lane.b32.xlu0 %v7961_v49, %s6729_s9  ;;  %6088 = vmatpush1.bf16.msra.mxu0 %v7963_v23  ;;  %v5772_v21 = vld [vmem:[%s9821_s4 + $0x47] ss:$8 sm:$0xf0] }
 0x1ae   : > { %v1825_v63 = vpop.permute.xlu0 %1824  ;;  %v2385_v17 = vpop.permute.xlu1 %2384  ;;  %v7991_v53 = vpack.c.bf16 %v1745_v39, %v1465_v16  ;;  %v8003_v8 = vpack.c.bf16 %v1744_v55, %v1464_v27  ;;  %v1929_v16 = vrot.slane %v7987_v6, %v7878_v51  ;;  %v8027_v55 = vor.u32 %v5766_v45, %v5765_v14 }
 0x1af   : > { %v1937_v39 = vrot.slane %v7987_v6, %v7912_v37  ;;  %v8035_v27 = vor.u32 %v5772_v21, %v5771_v60  ;;  %v1941_v14 = vrot.slane %v7987_v6, %v7444_v36  ;;  %v2497_v45 = vrot.slane %v7998_v28, %v7912_v37 }
 0x1b0   : > { %10157 = vst [vmem:[#allocation83_spill] sm:$0xff] %v7991_v53  ;;  %10158 = vst [vmem:[#allocation84_spill] sm:$0xff] %v8003_v8  ;;  %6102 = vmatprep.subr.bf16.mxu1 %v7991_v53  ;;  %1842 = vrot.lane.b32.xlu1 %v7842_v10, %s6731_s14  ;;  %v2213_v53 = vrot.slane %v7989_v18, %v7886_v54  ;;  %v1870_v60 = vsel %vm1854_vm6, %v10160_v57, %v7803_v48 }
 0x1b1   : > { %1283 = vrot.lane.b32.xlu0 %v7996_v62, %s6729_s9  ;;  %6104 = vmatpush1.bf16.msra.mxu1 %v8003_v8  ;;  %v10159_v8 = vunpack.i.h.bf16 %v7215_v41  ;;  %v1869_v41 = vsel %vm1854_vm6, %v7803_v48, %v1825_v63  ;;  %v2428_v40 = vsel %vm2414_vm8, %v2385_v17, %v7867_v24  ;;  %v2769_v57 = vrot.slane %v8027_v55, %v7878_v51 }
 0x1b2   : > { %v8023_v29 = vpop.permute.xlu0 %1828  ;;  %v8025_v43 = vpop.permute.xlu1 %2388  ;;  %v2773_v48 = vrot.slane %v8027_v55, %v7886_v54  ;;  %v2429_v59 = vsel %vm2414_vm8, %v7756_v12, %v2385_v17  ;;  %v3049_v19 = vrot.slane %v8035_v27, %v7878_v51  ;;  %v2022_v26 = vmul.f32 %v1929_v16, %v1870_v60 }
 0x1b3   : > { %v2150_v23 = vsel %vm2134_vm7, %v10159_v8, %v7822_v4  ;;  %v2217_v8 = vrot.slane %v7989_v18, %v7912_v37  ;;  %v2023_v13 = vmul.f32 %v1933_v58, %v1869_v41  ;;  %v3053_v50 = vrot.slane %v8035_v27, %v7886_v54  ;;  %v5777_v58 = vld [vmem:[%s9821_s4 + $0x100] ss:$8 sm:$0xf] }
 0x1b4   : > { %2118 = vrot.lane.b32.xlu1 %v7784_v44, %s6732_s15  ;;  %v2221_v44 = vrot.slane %v7989_v18, %v7444_v36  ;;  %v2302_v31 = vmul.f32 %v2209_v22, %v2150_v23  ;;  %v2583_v2 = vmul.f32 %v2493_v42, %v2428_v40  ;;  %v1867_v23 = vsel %vm1854_vm6, %v7813_v33, %v8023_v29  ;;  %v5778_v42 = vld [vmem:[%s9821_s4 + $0x100] ss:$8 sm:$0xf0] }
 0x1b5   : > { %1560 = vrot.lane.b32.xlu0 %v7961_v49, %s6730_s13  ;;  %v2501_v22 = vrot.slane %v7998_v28, %v7444_v36 }
 0x1b6   : > { %v2105_v21 = vpop.permute.xlu0 %2104  ;;  %v2665_v6 = vpop.permute.xlu1 %2664  ;;  %v8107_v60 = vpack.c.bf16 %v2302_v31, %v2022_v26 }
 0x1b7   : > { %v2149_v1 = vsel %vm2134_vm7, %v7822_v4, %v2105_v21  ;;  %v2148_v12 = vsel %vm2134_vm7, %v2105_v21, %v7840_v20  ;;  %v1868_v4 = vsel %vm1854_vm6, %v1825_v63, %v7813_v33  ;;  %v2708_v31 = vsel %vm2694_vm9, %v2665_v6, %v7888_v46 }
 0x1b8   : > { %v2303_v7 = vmul.f32 %v2213_v53, %v2149_v1  ;;  %2122 = vrot.lane.b32.xlu1 %v7842_v10, %s6732_s15  ;;  %v2582_v1 = vmul.f32 %v2489_v61, %v2429_v59  ;;  %10162 = vst [vmem:[#allocation86_spill] sm:$0xff] %v8107_v60  ;;  %v2427_v59 = vsel %vm2414_vm8, %v7867_v24, %v8025_v43 }
 0x1b9   : > { %1564 = vrot.lane.b32.xlu0 %v7996_v62, %s6730_s13  ;;  %v2304_v63 = vmul.f32 %v2217_v8, %v2148_v12  ;;  %v2024_v61 = vmul.f32 %v1937_v39, %v1868_v4  ;;  %v8131_v24 = vor.u32 %v5778_v42, %v5777_v58  ;;  %v2863_v8 = vmul.f32 %v2773_v48, %v2708_v31 }
 0x1ba   : > { %v8095_v17 = vpop.permute.xlu0 %2108  ;;  %v2669_v53 = vpop.permute.xlu1 %2668  ;;  %v8097_v16 = vpack.c.bf16 %v2303_v7, %v2023_v13  ;;  %v2709_v7 = vsel %vm2694_vm9, %v7754_v56, %v2665_v6  ;;  %v2025_v13 = vmul.f32 %v1941_v14, %v1867_v23  ;;  %v8129_v56 = vpack.c.bf16 %v2583_v2, %v7595_v52 }
 0x1bb   : > { %v2147_v33 = vsel %vm2134_vm7, %v7840_v20, %v8095_v17  ;;  %v8134_v20 = vpack.c.bf16 %v2582_v1, %v7557_v11  ;;  %v2584_v14 = vmul.f32 %v2497_v45, %v2427_v59  ;;  %v2862_v6 = vmul.f32 %v2769_v57, %v2709_v7 }
 0x1bc   : > { %10161 = vst [vmem:[#allocation85_spill] sm:$0xff] %v8097_v16  ;;  %v2305_v26 = vmul.f32 %v2221_v44, %v2147_v33  ;;  %6090 = vmatprep.subr.bf16.mxu0 %v8097_v16  ;;  %2400 = vrot.lane.b32.xlu1 %v7961_v49, %s6734_s16  ;;  %10163 = vst [vmem:[#allocation87_spill] sm:$0xff] %v8129_v56  ;;  %v8152_v45 = vpack.c.bf16 %v2304_v63, %v2024_v61 }
 0x1bd   : > { %1840 = vrot.lane.b32.xlu0 %v7961_v49, %s6731_s14  ;;  %10164 = vst [vmem:[#allocation88_spill] sm:$0xff] %v8134_v20  ;;  %6092 = vmatpush1.bf16.msra.mxu0 %v8107_v60  ;;  %v3057_v23 = vrot.slane %v8035_v27, %v7912_v37  ;;  %v2781_v12 = vrot.slane %v8027_v55, %v7444_v36 }
 0x1be   : > { %v2945_v44 = vpop.permute.xlu1 %2944  ;;  %v8137_v39 = vpop.permute.xlu0 %2390  ;;  %v8139_v41 = vpack.c.bf16 %v2305_v26, %v2025_v13  ;;  %6094 = vmatprep.subr.bf16.mxu0 %v8129_v56  ;;  %10166 = vst [vmem:[#allocation90_spill] sm:$0xff] %v8152_v45  ;;  %v3329_v4 = vrot.slane %v8131_v24, %v7878_v51  ;;  %v3061_v1 = vrot.slane %v8035_v27, %v7444_v36 }
 0x1bf   : > { %v2988_v2 = vsel %vm2974_vm10, %v2945_v44, %v7919_v38  ;;  %v2989_v11 = vsel %vm2974_vm10, %v7779_v34, %v2945_v44  ;;  %v2426_v52 = vsel %vm2414_vm8, %v8025_v43, %v8137_v39  ;;  %v3333_v58 = vrot.slane %v8131_v24, %v7886_v54 }
 0x1c0   : > { %10165 = vst [vmem:[#allocation89_spill] sm:$0xff] %v8139_v41  ;;  %v3142_v40 = vmul.f32 %v3049_v19, %v2989_v11  ;;  %v3143_v21 = vmul.f32 %v3053_v50, %v2988_v2  ;;  %v2585_v57 = vmul.f32 %v2501_v22, %v2426_v52  ;;  %6106 = vmatprep.subr.bf16.mxu1 %v8139_v41 }
 0x1c1   : > { %2404 = vrot.lane.b32.xlu1 %v7996_v62, %s6734_s16  ;;  %1844 = vrot.lane.b32.xlu0 %v7996_v62, %s6731_s14  ;;  %v8179_v22 = vpack.c.bf16 %v2584_v14, %v7576_v0  ;;  %v2777_v42 = vrot.slane %v8027_v55, %v7912_v37  ;;  %v2707_v0 = vsel %vm2694_vm9, %v7888_v46, %v2669_v53 }
 0x1c2   : > { %v8159_v48 = vpack.c.bf16 %v3142_v40, %v2862_v6  ;;  %6096 = vmatpush1.bf16.msra.mxu0 %v8134_v20  ;;  %6108 = vmatpush1.bf16.msra.mxu1 %v8152_v45  ;;  %v2949_v34 = vpop.permute.xlu1 %2948  ;;  %v8163_v43 = vpop.permute.xlu0 %2670  ;;  %v8165_v19 = vpack.c.bf16 %v3143_v21, %v2863_v8  ;;  %v8168_v50 = vpack.c.bf16 %v2585_v57, %v7607_v35 }
 0x1c3   : > { %10170 = vst [vmem:[#allocation94_spill] sm:$0xff] %v8179_v22  ;;  %v2987_v35 = vsel %vm2974_vm10, %v7919_v38, %v2949_v34  ;;  %v2706_v59 = vsel %vm2694_vm9, %v2669_v53, %v8163_v43  ;;  %v1177_v38 = vadd.f32 %v7207_v15, %v7692_v32  ;;  %v3341_v13 = vrot.slane %v8131_v24, %v7444_v36 }
 0x1c4   : > { %10167 = vst [vmem:[#allocation91_spill] sm:$0xff] %v8159_v48  ;;  %10168 = vst [vmem:[#allocation92_spill] sm:$0xff] %v8165_v19  ;;  %6098 = vmatprep.subr.bf16.mxu0 %v8165_v19  ;;  %6110 = vmatprep.subr.bf16.mxu1 %v8168_v50  ;;  %v3144_v63 = vmul.f32 %v3057_v23, %v2987_v35  ;;  %v2865_v53 = vmul.f32 %v2781_v12, %v2706_v59 }
 0x1c5   : > { %10169 = vst [vmem:[#allocation93_spill] sm:$0xff] %v8168_v50  ;;  %2680 = vrot.lane.b32.xlu1 %v7961_v49, %s6735_s17  ;;  %2120 = vrot.lane.b32.xlu0 %v7961_v49, %s6732_s15  ;;  %v2864_v6 = vmul.f32 %v2777_v42, %v2707_v0  ;;  %v8230_v2 = vmax.f32 %v1177_v38, 0.0  ;;  %v3337_v40 = vrot.slane %v8131_v24, %v7912_v37 }
 0x1c6   : > { %6100 = vmatpush1.bf16.msra.mxu0 %v8159_v48  ;;  %6112 = vmatpush1.bf16.msra.mxu1 %v8179_v22  ;;  %v3225_v7 = vpop.permute.xlu1 %3224  ;;  %v8204_v33 = vpop.permute.xlu0 %2950 }
 0x1c7   : > { %v3268_v31 = vsel %vm3254_vm11, %v3225_v7, %v7955_v25  ;;  %v3269_v32 = vsel %vm3254_vm11, %v7838_v5, %v3225_v7  ;;  %v2986_v46 = vsel %vm2974_vm10, %v2949_v34, %v8204_v33  ;;  %10174 = vst [vmem:[#allocation98_spill] sm:$0xff] %v8230_v2  ;;  %v8236_v52 = vpack.c.bf16 %v3144_v63, %v2864_v6  ;;  %v10180_v63 = vld [vmem:[#allocation76_spill] sm:$0xff]  ;;  %v10183_v6 = vld [vmem:[#allocation79_spill] sm:$0xff] }
 0x1c8   : > { %v8217_v26 = vmul.f32 %v3329_v4, %v3269_v32  ;;  %v3145_v61 = vmul.f32 %v3061_v1, %v2986_v46  ;;  %v8219_v14 = vmul.f32 %v3333_v58, %v3268_v31  ;;  %v1180_v58 = vadd.f32 %v7207_v15, %v7702_v30  ;;  %v10181_v32 = vld [vmem:[#allocation15_spill] sm:$0xff]  ;;  %v10182_v46 = vld [vmem:[#allocation77_spill] sm:$0xff] }
 0x1c9   : > { %2684 = vrot.lane.b32.xlu1 %v7996_v62, %s6735_s17  ;;  %2124 = vrot.lane.b32.xlu0 %v7996_v62, %s6732_s15  ;;  %10175 = vst [vmem:[#allocation99_spill] sm:$0xff] %v8236_v52 }
 0x1ca   : > { %10171 = vst [vmem:[#allocation95_spill] sm:$0xff] %v8217_v26  ;;  %10172 = vst [vmem:[#allocation96_spill] sm:$0xff] %v8219_v14  ;;  %3807 = vmatprep.subr.mxu0 %v8219_v14  ;;  %v3229_v5 = vpop.permute.xlu1 %3228  ;;  %v8226_v44 = vpop.permute.xlu0 %3230  ;;  %v8228_v8 = vpack.c.bf16 %v3145_v61, %v2865_v53  ;;  %v8283_v59 = vmax.f32 %v1180_v58, 0.0  ;;  %v1389_v53 = vrot.slane %v10182_v46, %v10181_v32  ;;  %v10186_v14 = vld [vmem:[#allocation11_spill] sm:$0xff] }
 0x1cb   : > { %v3266_v11 = vsel %vm3254_vm11, %v3229_v5, %v8226_v44  ;;  %3808 = vmatpush1.msra.mxu0 %v8217_v26  ;;  %v3267_v57 = vsel %vm3254_vm11, %v7955_v25, %v3229_v5  ;;  %v1669_v61 = vrot.slane %v10180_v63, %v10181_v32 }
 0x1cc   : > { %10173 = vst [vmem:[#allocation97_spill] sm:$0xff] %v8228_v8  ;;  %6114 = vmatprep.subr.bf16.mxu1 %v8228_v8  ;;  %v8241_v21 = vmul.f32 %v3341_v13, %v3266_v11  ;;  %5784 = vmatmul.mubr.msk.f32.vlgmr.msra.gmra.mrb[18].mxu0 %vm3645_vm12, %v7605_v9  ;;  %v8257_v12 = vmul.f32 %v3337_v40, %v3267_v57  ;;  %10178 = vst [vmem:[#allocation102_spill] sm:$0xff] %v8283_v59  ;;  %v10179_v13 = vld [vmem:[#allocation13_spill] sm:$0xff] }
 0x1cd   : > { %2960 = vrot.lane.b32.xlu1 %v7961_v49, %s6736_s26  ;;  %2406 = vrot.lane.b32.xlu0 %v8230_v2, %s6734_s16  ;;  %v1665_v31 = vrot.slane %v10180_v63, %v10179_v13  ;;  %v1385_v40 = vrot.slane %v10182_v46, %v10179_v13  ;;  %v10184_v57 = vld [vmem:[#allocation17_spill] sm:$0xff] }
 0x1ce   : > { %10176 = vst [vmem:[#allocation100_spill] sm:$0xff] %v8241_v21  ;;  %6116 = vmatpush1.bf16.msra.mxu1 %v8236_v52  ;;  %v1270_v34 = vpop.permute.xlu1 %1269  ;;  %v8253_v23 = vpop.permute.xlu0 %2394  ;;  %3997 = vmatprep.mubr.f32.mxu0 %v10119_v3  ;;  %10177 = vst [vmem:[#allocation101_spill] sm:$0xff] %v8257_v12  ;;  %v1397_v58 = vrot.slane %v10182_v46, %v10184_v57  ;;  %v1673_v52 = vrot.slane %v10180_v63, %v10186_v14 }
 0x1cf   : > { %3878 = vmatprep.subr.mxu1 %v8241_v21  ;;  %v10185_v21 = vld [vmem:[#allocation78_spill] sm:$0xff]  ;;  %v1677_v8 = vrot.slane %v10180_v63, %v10184_v57 }
 0x1d1   : > { %2964 = vrot.lane.b32.xlu1 %v7996_v62, %s6736_s26  ;;  %2686 = vrot.lane.b32.xlu0 %v8230_v2, %s6735_s17 }
 0x1d2   : > { %3879 = vmatpush1.msra.mxu1 %v8257_v12  ;;  %v1274_v25 = vpop.permute.xlu1 %1273  ;;  %v8264_v4 = vpop.permute.xlu0 %2674 }
 0x1d3   : > { %5785 = vmatmul.mubr.msk.f32.vlgmr.msra.gmra.mrb[18].mxu1 %vm3645_vm12, %v7605_v9 }
 0x1d4   : > { %4068 = vmatprep.mubr.f32.mxu1 %v10119_v3 }
 0x1d5   : > { %3240 = vrot.lane.b32.xlu1 %v7961_v49, %s6737_s7  ;;  %2966 = vrot.lane.b32.xlu0 %v8230_v2, %s6736_s26 }
 0x1d6   : > { %v1551_v1 = vpop.permute.xlu1 %1550  ;;  %v8273_v35 = vpop.permute.xlu0 %2954 }
 0x1d7   : > { %v1586_v5 = vsel %vm1574_vm5, %v10183_v6, %v1551_v1  ;;  %v1307_v6 = vsel %vm1295_vm4, %v10185_v21, %v1270_v34 }
 0x1d8   : > { %v1746_v19 = vmul.f32 %v1665_v31, %v1586_v5  ;;  %v1466_v21 = vmul.f32 %v1385_v40, %v1307_v6 }
 0x1d9   : > { %3244 = vrot.lane.b32.xlu1 %v7996_v62, %s6737_s7  ;;  %3246 = vrot.lane.b32.xlu0 %v8230_v2, %s6737_s7 }
 0x1da   : > { %v1555_v9 = vpop.permute.xlu1 %1554  ;;  %v8281_v42 = vpop.permute.xlu0 %3234 }
 0x1dd   : > { %1291 = vrot.lane.b32.xlu1 %v8283_v59, %s6729_s9  ;;  %1572 = vrot.lane.b32.xlu0 %v8283_v59, %s6730_s13 }
 0x1de   : > { %v8289_v38 = vpop.permute.xlu1 %1830  ;;  %v1272_v30 = vpop.permute.xlu0 %1271 }
 0x1df   : > { %v1306_v11 = vsel %vm1295_vm4, %v1270_v34, %v1272_v30  ;;  %v1393_v34 = vrot.slane %v10182_v46, %v10186_v14  ;;  %v1305_v31 = vsel %vm1295_vm4, %v1272_v30, %v1274_v25 }
 0x1e0   : > { %v1467_v22 = vmul.f32 %v1389_v53, %v1306_v11  ;;  %v8351_v53 = vpack.c.bf16 %v1746_v19, %v1466_v21  ;;  %v10190_v19 = vld [vmem:[#allocation61_spill] sm:$0xff]  ;;  %v2225_v21 = vrot.slane %v7989_v18, %v10179_v13 }
 0x1e1   : > { %1852 = vrot.lane.b32.xlu1 %v8283_v59, %s6731_s14  ;;  %2132 = vrot.lane.b32.xlu0 %v8283_v59, %s6732_s15 }
 0x1e2   : > { %v8295_v0 = vpop.permute.xlu1 %1834  ;;  %v8297_v7 = vpop.permute.xlu0 %1275  ;;  %10188 = vst [vmem:[#allocation77_spill] sm:$0xff] %v8351_v53 }
 0x1e3   : > { %v1304_v50 = vsel %vm1295_vm4, %v1274_v25, %v8297_v7 }
 0x1e5   : > { %6632 = vrot.lane.b32.xlu1 %v10119_v3, %s6735_s17  ;;  %6637 = vrot.lane.b32.xlu0 %v10119_v3, %s6735_s17 }
 0x1e6   : > { %v8318_v12 = vpop.permute.xlu1 %2110  ;;  %v1553_v26 = vpop.permute.xlu0 %1552 }
 0x1e7   : > { %v1585_v48 = vsel %vm1574_vm5, %v1551_v1, %v1553_v26  ;;  %v1584_v56 = vsel %vm1574_vm5, %v1553_v26, %v1555_v9 }
 0x1e8   : > { %v1747_v20 = vmul.f32 %v1669_v61, %v1585_v48  ;;  %v1469_v61 = vmul.f32 %v1397_v58, %v1304_v50  ;;  %v1748_v5 = vmul.f32 %v1673_v52, %v1584_v56  ;;  %v1179_v50 = vadd.f32 %v7207_v15, %v10190_v19  ;;  %v10194_v58 = vld [vmem:[#allocation62_spill] sm:$0xff] }
 0x1e9   : > { %6642 = vrot.lane.b32.xlu1 %v10119_v3, %s6736_s26  ;;  %6647 = vrot.lane.b32.xlu0 %v10119_v3, %s6736_s26  ;;  %v8381_v6 = vadd.f32 %v7207_v15, %v10194_v58  ;;  %v2229_v15 = vrot.slane %v7989_v18, %v10181_v32 }
 0x1ea   : > { %v8340_v1 = vpop.permute.xlu1 %2114  ;;  %v8342_v48 = vpop.permute.xlu0 %1556  ;;  %v8344_v63 = vpack.c.bf16 %v1747_v20, %v1467_v22  ;;  %v1468_v20 = vmul.f32 %v1393_v34, %v1305_v31  ;;  %v8377_v40 = vmax.f32 %v1179_v50, 0.0  ;;  %v2505_v34 = vrot.slane %v7998_v28, %v10179_v13 }
 0x1eb   : > { %v1583_v26 = vsel %vm1574_vm5, %v1555_v9, %v8342_v48  ;;  %v2146_v31 = vsel %vm2134_vm7, %v8095_v17, %v8318_v12  ;;  %v1866_v17 = vsel %vm1854_vm6, %v8023_v29, %v8289_v38  ;;  %v2785_v50 = vrot.slane %v8027_v55, %v10179_v13 }
 0x1ec   : > { %10187 = vst [vmem:[#allocation76_spill] sm:$0xff] %v8344_v63  ;;  %v1749_v11 = vmul.f32 %v1677_v8, %v1583_v26  ;;  %6118 = vmatprep.subr.bf16.mxu0 %v8344_v63  ;;  %v8363_v56 = vpack.c.bf16 %v1748_v5, %v1468_v20  ;;  %v10192_v8 = vld [vmem:[#allocation82_spill] sm:$0xff]  ;;  %10193 = vst [vmem:[#allocation61_spill] sm:$0xff] %v8377_v40  ;;  %v2509_v26 = vrot.slane %v7998_v28, %v10181_v32 }
 0x1ed   : > { %6652 = vrot.lane.b32.xlu1 %v10119_v3, %s6737_s7  ;;  %6657 = vrot.lane.b32.xlu0 %v10119_v3, %s6737_s7  ;;  %v1945_v52 = vrot.slane %v10192_v8, %v10179_v13  ;;  %v1953_v5 = vrot.slane %v10192_v8, %v10186_v14  ;;  %v1957_v20 = vrot.slane %v10192_v8, %v10184_v57 }
 0x1ee   : > { %6120 = vmatpush1.bf16.msra.mxu0 %v8351_v53  ;;  %v2393_v22 = vpop.permute.xlu1 %2392  ;;  %v1833_v25 = vpop.permute.xlu0 %1832  ;;  %v8359_v30 = vpack.c.bf16 %v1749_v11, %v1469_v61  ;;  %10191 = vst [vmem:[#allocation78_spill] sm:$0xff] %v8363_v56  ;;  %v1949_v61 = vrot.slane %v10192_v8, %v10181_v32  ;;  %v2789_v8 = vrot.slane %v8027_v55, %v10181_v32 }
 0x1ef   : > { %v1865_v11 = vsel %vm1854_vm6, %v8289_v38, %v1833_v25  ;;  %v2424_v19 = vsel %vm2414_vm8, %v2393_v22, %v8253_v23  ;;  %v2306_v53 = vmul.f32 %v2225_v21, %v2146_v31  ;;  %v2233_v29 = vrot.slane %v7989_v18, %v10186_v14 }
 0x1f0   : > { %10189 = vst [vmem:[#allocation79_spill] sm:$0xff] %v8359_v30  ;;  %6134 = vmatprep.subr.bf16.mxu1 %v8359_v30  ;;  %v2425_v30 = vsel %vm2414_vm8, %v8137_v39, %v2393_v22  ;;  %v2027_v63 = vmul.f32 %v1949_v61, %v1865_v11  ;;  %v2237_v21 = vrot.slane %v7989_v18, %v10184_v57 }
 0x1f1   : > { %1285 = vrot.lane.b32.xlu1 %v8230_v2, %s6729_s9  ;;  %1566 = vrot.lane.b32.xlu0 %v8230_v2, %s6730_s13  ;;  %v2026_v31 = vmul.f32 %v1945_v52, %v1866_v17  ;;  %v2587_v41 = vmul.f32 %v2509_v26, %v2424_v19  ;;  %v3065_v18 = vrot.slane %v8035_v27, %v10179_v13 }
 0x1f2   : > { %6136 = vmatpush1.bf16.msra.mxu1 %v8363_v56  ;;  %v8373_v9 = vpop.permute.xlu1 %2396  ;;  %v8375_v46 = vpop.permute.xlu0 %1836  ;;  %v3069_v52 = vrot.slane %v8035_v27, %v10181_v32  ;;  %v1864_v26 = vsel %vm1854_vm6, %v1833_v25, %v8295_v0  ;;  %v2517_v25 = vrot.slane %v7998_v28, %v10184_v57 }
 0x1f3   : > { %v1863_v45 = vsel %vm1854_vm6, %v8295_v0, %v8375_v46  ;;  %v10197_v0 = vld [vmem:[#allocation63_spill] sm:$0xff]  ;;  %v2028_v17 = vmul.f32 %v1953_v5, %v1864_v26  ;;  %v2423_v19 = vsel %vm2414_vm8, %v8253_v23, %v8373_v9 }
 0x1f4   : > { %v2029_v11 = vmul.f32 %v1957_v20, %v1863_v45  ;;  %v2513_v45 = vrot.slane %v7998_v28, %v10186_v14 }
 0x1f5   : > { %1289 = vrot.lane.b32.xlu1 %v8377_v40, %s6729_s9  ;;  %1570 = vrot.lane.b32.xlu0 %v8377_v40, %s6730_s13 }
 0x1f6   : > { %v2673_v58 = vpop.permute.xlu1 %2672  ;;  %v2113_v56 = vpop.permute.xlu0 %2112 }
 0x1f7   : > { %v2145_v38 = vsel %vm2134_vm7, %v8318_v12, %v2113_v56  ;;  %v2144_v39 = vsel %vm2134_vm7, %v2113_v56, %v8340_v1  ;;  %v2586_v12 = vmul.f32 %v2505_v34, %v2425_v30  ;;  %v8450_v56 = vpack.c.bf16 %v2306_v53, %v2026_v31 }
 0x1f8   : > { %v2307_v60 = vmul.f32 %v2229_v15, %v2145_v38  ;;  %v2308_v53 = vmul.f32 %v2233_v29, %v2144_v39 }
 0x1f9   : > { %1846 = vrot.lane.b32.xlu1 %v8230_v2, %s6731_s14  ;;  %2126 = vrot.lane.b32.xlu0 %v8230_v2, %s6732_s15  ;;  %10196 = vst [vmem:[#allocation62_spill] sm:$0xff] %v8450_v56 }
 0x1fa   : > { %v8440_v22 = vpop.permute.xlu1 %2676  ;;  %v8442_v61 = vpop.permute.xlu0 %2116  ;;  %v8444_v15 = vpack.c.bf16 %v2307_v60, %v2027_v63  ;;  %v2704_v60 = vsel %vm2694_vm9, %v2673_v58, %v8264_v4  ;;  %v2705_v63 = vsel %vm2694_vm9, %v8163_v43, %v2673_v58  ;;  %v10199_v43 = vld [vmem:[#allocation55_spill] sm:$0xff]  ;;  %v8496_v23 = vpack.c.bf16 %v2308_v53, %v2028_v17 }
 0x1fb   : > { %v2143_v30 = vsel %vm2134_vm7, %v8340_v1, %v8442_v61  ;;  %v8473_v1 = vpack.c.bf16 %v2587_v41, %v10197_v0  ;;  %v8478_v20 = vpack.c.bf16 %v2586_v12, %v10199_v43  ;;  %v2866_v38 = vmul.f32 %v2785_v50, %v2705_v63 }
 0x1fc   : > { %10195 = vst [vmem:[#allocation82_spill] sm:$0xff] %v8444_v15  ;;  %v2309_v34 = vmul.f32 %v2237_v21, %v2143_v30  ;;  %6122 = vmatprep.subr.bf16.mxu0 %v8444_v15  ;;  %v2867_v41 = vmul.f32 %v2789_v8, %v2704_v60  ;;  %10202 = vst [vmem:[#allocation104_spill] sm:$0xff] %v8496_v23  ;;  %v2588_v8 = vmul.f32 %v2513_v45, %v2423_v19 }
 0x1fd   : > { %1850 = vrot.lane.b32.xlu1 %v8377_v40, %s6731_s14  ;;  %2130 = vrot.lane.b32.xlu0 %v8377_v40, %s6732_s15  ;;  %10198 = vst [vmem:[#allocation63_spill] sm:$0xff] %v8473_v1  ;;  %10200 = vst [vmem:[#allocation55_spill] sm:$0xff] %v8478_v20  ;;  %v3073_v60 = vrot.slane %v8035_v27, %v10186_v14  ;;  %v2797_v63 = vrot.slane %v8027_v55, %v10184_v57 }
 0x1fe   : > { %6124 = vmatpush1.bf16.msra.mxu0 %v8450_v56  ;;  %v2953_v58 = vpop.permute.xlu1 %2952  ;;  %v8485_v29 = vpack.c.bf16 %v2309_v34, %v2029_v11  ;;  %v10206_v11 = vld [vmem:[#allocation65_spill] sm:$0xff]  ;;  %v3345_v53 = vrot.slane %v8131_v24, %v10179_v13  ;;  %v10208_v34 = vld [vmem:[#allocation60_spill] sm:$0xff]  ;;  %v2793_v43 = vrot.slane %v8027_v55, %v10186_v14  ;;  %v2703_v19 = vsel %vm2694_vm9, %v8264_v4, %v8440_v22 }
 0x1ff   : > { %v2984_v28 = vsel %vm2974_vm10, %v2953_v58, %v8273_v35  ;;  %v2985_v5 = vsel %vm2974_vm10, %v8204_v33, %v2953_v58  ;;  %6126 = vmatprep.subr.bf16.mxu0 %v8473_v1  ;;  %v8494_v21 = vpop.permute.xlu0 %2398  ;;  %v8531_v45 = vpack.c.bf16 %v2588_v8, %v10208_v34  ;;  %v10238_v1 = vld [vmem:[#allocation64_spill] sm:$0xff] }
 0x200   : > { %10201 = vst [vmem:[#allocation103_spill] sm:$0xff] %v8485_v29  ;;  %v3146_v31 = vmul.f32 %v3065_v18, %v2985_v5  ;;  %v3147_v39 = vmul.f32 %v3069_v52, %v2984_v28  ;;  %v2422_v50 = vsel %vm2414_vm8, %v8373_v9, %v8494_v21  ;;  %6138 = vmatprep.subr.bf16.mxu1 %v8485_v29  ;;  %v8514_v9 = vmax.f32 %v8381_v6, 0.0  ;;  %v5756_v13 = vld [vmem:[%s9821_s4 + $0x83] ss:$8 sm:$0xf0] }
 0x201   : > { %v2589_v12 = vmul.f32 %v2517_v25, %v2422_v50  ;;  %2690 = vrot.lane.b32.xlu1 %v8377_v40, %s6735_s17  ;;  %2410 = vrot.lane.b32.xlu0 %v8377_v40, %s6734_s16  ;;  %v3349_v6 = vrot.slane %v8131_v24, %v10181_v32  ;;  %10209 = vst [vmem:[#allocation60_spill] sm:$0xff] %v8531_v45  ;;  %v8674_v32 = vpop.f32.mrb[14].mxu0 }
 0x202   : > { %v8507_v33 = vpack.c.bf16 %v3146_v31, %v2866_v38  ;;  %6128 = vmatpush1.bf16.msra.mxu0 %v8478_v20  ;;  %6140 = vmatpush1.bf16.msra.mxu1 %v8496_v23  ;;  %v2957_v18 = vpop.permute.xlu1 %2956  ;;  %v8511_v52 = vpack.c.bf16 %v3147_v39, %v2867_v41  ;;  %10205 = vst [vmem:[#allocation107_spill] sm:$0xff] %v8514_v9  ;;  %v10237_v20 = vld [vmem:[#allocation28_spill] sm:$0xff] }
 0x203   : > { %v8516_v26 = vpop.permute.xlu0 %2678  ;;  %v8519_v30 = vpack.c.bf16 %v2589_v12, %v10206_v11  ;;  %v2983_v0 = vsel %vm2974_vm10, %v8273_v35, %v2957_v18  ;;  %v3077_v25 = vrot.slane %v8035_v27, %v10184_v57  ;;  %v3357_v31 = vrot.slane %v8131_v24, %v10184_v57 }
 0x204   : > { %10203 = vst [vmem:[#allocation105_spill] sm:$0xff] %v8507_v33  ;;  %10204 = vst [vmem:[#allocation106_spill] sm:$0xff] %v8511_v52  ;;  %6130 = vmatprep.subr.bf16.mxu0 %v8511_v52  ;;  %v2702_v17 = vsel %vm2694_vm9, %v8440_v22, %v8516_v26  ;;  %v3148_v38 = vmul.f32 %v3073_v60, %v2983_v0  ;;  %v8592_v60 = vld [vmem:[%s9819_s2 + $0x8] sm:$0xff] }
 0x205   : > { %10207 = vst [vmem:[#allocation65_spill] sm:$0xff] %v8519_v30  ;;  %6142 = vmatprep.subr.bf16.mxu1 %v8519_v30  ;;  %2970 = vrot.lane.b32.xlu0 %v8377_v40, %s6736_s26  ;;  %v2869_v22 = vmul.f32 %v2797_v63, %v2702_v17 }
 0x206   : > { %1568 = vrot.lane.b32.xlu1 %v8514_v9, %s6730_s13  ;;  %6132 = vmatpush1.bf16.msra.mxu0 %v8507_v33  ;;  %v3233_v35 = vpop.permute.xlu1 %3232  ;;  %v8703_v33 = vpop.f32.mrb[15].mxu0  ;;  %s9770_s13 = scalar_lea.hbm %s9822_s5, %s5812_s6 }
 0x207   : > { %6144 = vmatpush1.bf16.msra.mxu1 %v8531_v45  ;;  %v3264_v55 = vsel %vm3254_vm11, %v3233_v35, %v8281_v42  ;;  %v3265_v27 = vsel %vm3254_vm11, %v8226_v44, %v3233_v35  ;;  %v8561_v58 = vpop.permute.xlu0 %2958  ;;  %v2868_v44 = vmul.f32 %v2793_v43, %v2703_v19  ;;  %v5743_v19 = vld [vmem:[%s9821_s4 + $0x81] ss:$8 sm:$0xf] }
 0x208   : > { %v8563_v41 = vmul.f32 %v3345_v53, %v3265_v27  ;;  %v8565_v28 = vmul.f32 %v3349_v6, %v3264_v55  ;;  %v2982_v4 = vsel %vm2974_vm10, %v2957_v18, %v8561_v58  ;;  %v3353_v18 = vrot.slane %v8131_v24, %v10186_v14  ;;  %v5744_v55 = vld [vmem:[%s9821_s4 + $0x81] ss:$8 sm:$0xf0] }
 0x209   : > { %v3149_v5 = vmul.f32 %v3077_v25, %v2982_v4  ;;  %1287 = vrot.lane.b32.xlu0 %v8514_v9, %s6729_s9  ;;  %v8582_v12 = vpack.c.bf16 %v3148_v38, %v2868_v44  ;;  %v1121_v38 = vld [vmem:[%s9820_s3 + $0x10] sm:$0xff]  ;;  %v10217_v44 = vld [vmem:[#allocation10_spill] sm:$0xff]  ;;  %v10236_v45 = vld [vmem:[#allocation8_spill] sm:$0xff] }
 0x20a   : > { %10210 = vst [vmem:[#allocation108_spill] sm:$0xff] %v8563_v41  ;;  %10211 = vst [vmem:[#allocation109_spill] sm:$0xff] %v8565_v28  ;;  %2128 = vrot.lane.b32.xlu1 %v8514_v9, %s6732_s15  ;;  %v3237_v39 = vpop.permute.xlu1 %3236  ;;  %3949 = vmatprep.subr.mxu0 %v8565_v28  ;;  %v5737_v4 = vld [vmem:[%s9821_s4 + $0x80] ss:$8 sm:$0xf]  ;;  %v2155_v30 = vsel %vm2134_vm7, %v10237_v20, %v10236_v45  ;;  %s6738_s15 = smov [#allocation4]  }
 0x20b   : > { %v8577_v50 = vpop.permute.xlu0 %3238  ;;  %3950 = vmatpush1.msra.mxu0 %v8563_v41  ;;  %v8580_v8 = vpack.c.bf16 %v3149_v5, %v2869_v22  ;;  %10213 = vst [vmem:[#allocation111_spill] sm:$0xff] %v8582_v12  ;;  %v3263_v63 = vsel %vm3254_vm11, %v8281_v42, %v3237_v39  ;;  %v5738_v22 = vld [vmem:[%s9821_s4 + $0x80] ss:$8 sm:$0xf0] }
 0x20c   : > { %v3262_v11 = vsel %vm3254_vm11, %v3237_v39, %v8577_v50  ;;  %5786 = vmatmul.mubr.msk.f32.vlgmr.msra.gmra.mrb[20].mxu0 %vm3645_vm12, %v8592_v60  ;;  %v8611_v42 = vmul.f32 %v3353_v18, %v3263_v63  ;;  %v1349_v39 = vrot.slane %v10217_v44, %v7444_v36  ;;  %v10218_v18 = vld [vmem:[#allocation14_spill] sm:$0xff]  ;;  %v8672_v14 = vor.u32 %v5738_v22, %v5737_v4  ;;  %v10227_v41 = vld [vmem:[#allocation25_spill] sm:$0xff] }
 0x20d   : > { %10212 = vst [vmem:[#allocation110_spill] sm:$0xff] %v8580_v8  ;;  %v8599_v53 = vmul.f32 %v3357_v31, %v3262_v11  ;;  %6146 = vmatprep.subr.bf16.mxu1 %v8580_v8  ;;  %1848 = vrot.lane.b32.xlu0 %v8514_v9, %s6731_s14  ;;  %v8660_v31 = vor.u32 %v5744_v55, %v5743_v19  ;;  %v10219_v11 = vld [vmem:[#allocation16_spill] sm:$0xff]  ;;  %10223 = vst [vmem:[#allocation14_spill] sm:$0xff] %v8674_v32  ;;  %v8676_v19 = vpop.f32.mrb[14].mxu1  ;;  %v10225_v55 = vld [vmem:[#allocation7_spill] sm:$0xff] }
 0x20e   : > { %2408 = vrot.lane.b32.xlu1 %v8514_v9, %s6734_s16  ;;  %6148 = vmatpush1.bf16.msra.mxu1 %v8582_v12  ;;  %v1278_v24 = vpop.permute.xlu1 %1277  ;;  %10215 = vst [vmem:[#allocation113_spill] sm:$0xff] %v8611_v42  ;;  %v1316_v63 = vsel %vm1295_vm4, %v10219_v11, %v10218_v18  ;;  %10222 = vst [vmem:[#allocation10_spill] sm:$0xff] %v8672_v14  ;;  %v8692_v22 = vpop.f32.mrb[15].mxu1  ;;  %v1405_v32 = vrot.slane %v8672_v14, %v7886_v54 }
 0x20f   : > { %10214 = vst [vmem:[#allocation112_spill] sm:$0xff] %v8599_v53  ;;  %4020 = vmatprep.subr.mxu1 %v8599_v53  ;;  %v8608_v6 = vpop.permute.xlu0 %2402  ;;  %4139 = vmatprep.mubr.f32.mxu0 %v10119_v3  ;;  %10216 = vst [vmem:[#allocation114_spill] sm:$0xff] %v8660_v31  ;;  %v10228_v53 = vld [vmem:[#allocation26_spill] sm:$0xff]  ;;  %v1681_v4 = vrot.slane %v8660_v31, %v7878_v51  ;;  %v1413_v23 = vrot.slane %v8672_v14, %v7444_v36 }
 0x210   : > { %10224 = vst [vmem:[#allocation16_spill] sm:$0xff] %v8676_v19  ;;  %v1875_v18 = vsel %vm1854_vm6, %v10228_v53, %v10227_v41  ;;  %v8694_v19 = vmul.f32 %v1349_v39, %v1316_v63  ;;  %v1685_v41 = vrot.slane %v8660_v31, %v7886_v54  ;;  %v1401_v39 = vrot.slane %v8672_v14, %v7878_v51 }
 0x211   : > { %2688 = vrot.lane.b32.xlu0 %v8514_v9, %s6735_s17  ;;  %v1689_v56 = vrot.slane %v8660_v31, %v7912_v37  ;;  %v1409_v57 = vrot.slane %v8672_v14, %v7912_v37  ;;  %v5755_v14 = vld [vmem:[%s9821_s4 + $0x83] ss:$8 sm:$0xf] }
 0x212   : > { %2412 = vrot.lane.b32.xlu1 %v8283_v59, %s6734_s16  ;;  %4021 = vmatpush1.msra.mxu1 %v8611_v42  ;;  %v8618_v34 = vpop.permute.xlu1 %1281  ;;  %v10226_v42 = vld [vmem:[#allocation20_spill] sm:$0xff]  ;;  %10231 = vst [vmem:[#allocation7_spill] sm:$0xff] %v8694_v19  ;;  %s6667_s16 = sshll.u32 %s6738_s15, 4  ;;  %s6668_s16 = int_to_ptr.vmem [resolvable:$false] %s6667_s16 }
 0x213   : > { %v8620_v0 = vpop.permute.xlu0 %2682  ;;  %5787 = vmatmul.mubr.msk.f32.vlgmr.msra.gmra.mrb[20].mxu1 %vm3645_vm12, %v8592_v60  ;;  %10232 = vst [vmem:[#allocation20_spill] sm:$0xff] %v8703_v33  ;;  %v6605_v33 = vunpack.i.h.bf16 %v10238_v1 }
 0x214   : > { %4210 = vmatprep.mubr.f32.mxu1 %v10119_v3 }
 0x215   : > { %2692 = vrot.lane.b32.xlu0 %v8283_v59, %s6735_s17  ;;  %s6669_s17 = scalar_lea.vmem %s6668_s16, 4096 }
 0x216   : > { %2968 = vrot.lane.b32.xlu1 %v8514_v9, %s6736_s26  ;;  %v1559_v25 = vpop.permute.xlu1 %1558 }
 0x217   : > { %v8629_v43 = vpop.permute.xlu0 %2962 }
 0x219   : > { %3248 = vrot.lane.b32.xlu0 %v8514_v9, %s6737_s7 }
 0x21a   : > { %2972 = vrot.lane.b32.xlu1 %v8283_v59, %s6736_s26  ;;  %v8635_v17 = vpop.permute.xlu1 %1562 }
 0x21b   : > { %v8637_v35 = vpop.permute.xlu0 %3242 }
 0x21d   : > { %3252 = vrot.lane.b32.xlu0 %v8283_v59, %s6737_s7  ;;  %v10221_v59 = vld [vmem:[#allocation18_spill] sm:$0xff] }
 0x21e   : > { %3250 = vrot.lane.b32.xlu1 %v8377_v40, %s6737_s7  ;;  %v8649_v27 = vpop.permute.xlu1 %1838  ;;  %v10220_v40 = vld [vmem:[#allocation12_spill] sm:$0xff]  ;;  %v1909_v9 = vrot.slane %v10221_v59, %v7444_v36  ;;  %10230 = vst [vmem:[#allocation18_spill] sm:$0xff] %v8692_v22  ;;  %s9714_s7 = scalar_lea.vmem [#allocation4], %s5701_s30 }
 0x21f   : > { %v1280_v5 = vpop.permute.xlu0 %1279  ;;  %v1629_v2 = vrot.slane %v10220_v40, %v7444_v36  ;;  %s5638_s8 = sshll.u32 %s9714_s7, 4  ;;  %s9772_s8 = int_to_ptr.vmem [resolvable:$true] %s5638_s8 }
 0x220   : > { %v8707_v52 = vmul.f32 %v1909_v9, %v1875_v18  ;;  %v1302_v63 = vsel %vm1295_vm4, %v1278_v24, %v1280_v5  ;;  %s6663_s14 = scalar_lea.vmem %s9772_s8, 2048  ;;  %p6670_p0 = scmp.lt.s32.totalorder %s9772_s8, %s6668_s16 }
 0x221   : > { %1124 = vperm.xlu0 %6520, %v1121_v38   ;;  %v1595_v38 = vsel %vm1574_vm5, %v10226_v42, %v10225_v55  ;;  %v1582_v55 = vsel %vm1574_vm5, %v8342_v48, %v1559_v25  ;;  %v10235_v48 = vld [vmem:[#allocation23_spill] sm:$0xff]  ;;  %v1471_v45 = vmul.f32 %v1405_v32, %v1302_v63  ;;  %v1345_v32 = vrot.slane %v10217_v44, %v7912_v37  ;;  %p6664_p11 = scmp.ne.s32.totalorder %s9772_s8, %s6663_s14  ;;  %p6671_p1 = scmp.lt.s32.totalorder %s6669_s17, %s6663_s14 }
 0x222   : > { %v8686_v28 = vpop.permute.xlu1 %1842  ;;  %v8705_v8 = vmul.f32 %v1629_v2, %v1595_v38  ;;  %10234 = vst [vmem:[#allocation26_spill] sm:$0xff] %v8707_v52  ;;  %v2189_v22 = vrot.slane %v10235_v48, %v7444_v36  ;;  %v1303_v2 = vsel %vm1295_vm4, %v8297_v7, %v1278_v24  ;;  %v1750_v18 = vmul.f32 %v1681_v4, %v1582_v55  ;;  %v10239_v24 = vld [vmem:[#allocation66_spill] sm:$0xff] }
 0x223   : > { %v8688_v12 = vpop.permute.xlu0 %1283  ;;  %v1693_v7 = vrot.slane %v8660_v31, %v7444_v36  ;;  %v6610_v4 = vunpack.i.h.bf16 %v10239_v24  ;;  %v1470_v55 = vmul.f32 %v1401_v39, %v1303_v2  ;;  %v1301_v39 = vsel %vm1295_vm4, %v1280_v5, %v8618_v34  ;;  %p6665_p12 = pnand %p6664_p11, %p6807_p5  ;;  %p6672_p2 = por %p6671_p1, %p6670_p0 }
 0x224   : > { %10229 = vst [vmem:[#allocation12_spill] sm:$0xff] %v8688_v12  ;;  %10233 = vst [vmem:[#allocation25_spill] sm:$0xff] %v8705_v8  ;;  %v1625_v5 = vrot.slane %v10220_v40, %v7912_v37  ;;  %v1472_v63 = vmul.f32 %v1409_v57, %v1301_v39 }
 0x225   : > { %v8762_v31 = vpack.c.bf16 %v1750_v18, %v1470_v55  ;;  %p6666_p13 = pneg %p6665_p12 }
 0x226   : > { %v8723_v9 = vpop.permute.xlu1 %2118 }
 0x227   : > { %v1561_v38 = vpop.permute.xlu0 %1560  ;;  %10242 = vst [vmem:[#allocation28_spill] sm:$0xff] %v8762_v31  ;;  %p6673_p3 = pnand %p6672_p2, %p6666_p13 }
 0x228   : > { %v1581_v29 = vsel %vm1574_vm5, %v1559_v25, %v1561_v38  ;;  %v1580_v15 = vsel %vm1574_vm5, %v1561_v38, %v8635_v17  ;;  %v1300_v25 = vsel %vm1295_vm4, %v8618_v34, %v8688_v12 }
 0x229   : > { %v1751_v16 = vmul.f32 %v1685_v41, %v1581_v29  ;;  %v5749_v29 = vld [vmem:[%s9821_s4 + $0x82] ss:$8 sm:$0xf]  ;;  %v1752_v52 = vmul.f32 %v1689_v56, %v1580_v15  ;;  %v1473_v18 = vmul.f32 %v1413_v23, %v1300_v25  ;;  %v5761_v15 = vld [vmem:[%s9821_s4 + $0x85] ss:$8 sm:$0xf]  ;;  %v1341_v23 = vrot.slane %v10217_v44, %v7886_v54 }
 0x22a   : > { %v5750_v41 = vld [vmem:[%s9821_s4 + $0x82] ss:$8 sm:$0xf0]  ;;  %v8755_v2 = vpop.permute.xlu1 %2122  ;;  %v5762_v56 = vld [vmem:[%s9821_s4 + $0x85] ss:$8 sm:$0xf0] }
 0x22b   : > { %v8757_v38 = vpop.permute.xlu0 %1564  ;;  %v8759_v12 = vpack.c.bf16 %v1751_v16, %v1471_v45  ;;  %v1317_v16 = vsel %vm1295_vm4, %v6605_v33, %v10219_v11  ;;  %v10243_v11 = vld [vmem:[#allocation67_spill] sm:$0xff]  ;;  %v8803_v57 = vor.u32 %v5750_v41, %v5749_v29  ;;  %v8805_v39 = vpack.c.bf16 %v1752_v52, %v1472_v63 }
 0x22c   : > { %10240 = vst [vmem:[#allocation23_spill] sm:$0xff] %v8757_v38  ;;  %v1579_v34 = vsel %vm1574_vm5, %v8635_v17, %v8757_v38  ;;  %v1596_v17 = vsel %vm1574_vm5, %v6610_v4, %v10226_v42  ;;  %v10246_v38 = vunpack.i.l.bf16 %v10238_v1  ;;  %v1621_v42 = vrot.slane %v10220_v40, %v7886_v54 }
 0x22d   : > { %10241 = vst [vmem:[#allocation8_spill] sm:$0xff] %v8759_v12  ;;  %v1753_v45 = vmul.f32 %v1693_v7, %v1579_v34  ;;  %6150 = vmatprep.subr.bf16.mxu0 %v8759_v12  ;;  %v8793_v7 = vor.u32 %v5756_v13, %v5755_v14  ;;  %10247 = vst [vmem:[#allocation67_spill] sm:$0xff] %v8803_v57  ;;  %v8807_v55 = vor.u32 %v5762_v56, %v5761_v15  ;;  %v5767_v14 = vld [vmem:[%s9821_s4 + $0x86] ss:$8 sm:$0xf] }
 0x22e   : > { %6152 = vmatpush1.bf16.msra.mxu0 %v8762_v31  ;;  %v2401_v25 = vpop.permute.xlu1 %2400  ;;  %v1318_v3 = vsel %vm1295_vm4, %v10246_v38, %v6605_v33  ;;  %10248 = vst [vmem:[#allocation115_spill] sm:$0xff] %v8805_v39  ;;  %v5768_v13 = vld [vmem:[%s9821_s4 + $0x86] ss:$8 sm:$0xf0]  ;;  %v8819_v38 = vmul.f32 %v2189_v22, %v2155_v30  ;;  %v8821_v29 = vmul.f32 %v1345_v32, %v1317_v16  ;;  %v10253_v15 = vunpack.i.h.bf16 %v10243_v11 }
 0x22f   : > { %10244 = vst [vmem:[#allocation64_spill] sm:$0xff] %v8793_v7  ;;  %v1841_v34 = vpop.permute.xlu0 %1840  ;;  %v8795_v12 = vpack.c.bf16 %v1753_v45, %v1473_v18  ;;  %10249 = vst [vmem:[#allocation116_spill] sm:$0xff] %v8807_v55  ;;  %v10250_v18 = vunpack.i.l.bf16 %v10239_v24  ;;  %v8828_v41 = vmul.f32 %v1625_v5, %v1596_v17  ;;  %v8847_v5 = vor.u32 %v5768_v13, %v5767_v14  ;;  %v5773_v56 = vld [vmem:[%s9821_s4 + $0x87] ss:$8 sm:$0xf] }
 0x230   : > { %10251 = vst [vmem:[#allocation117_spill] sm:$0xff] %v8819_v38  ;;  %v8836_v30 = vsel %vm1854_vm6, %v10253_v15, %v10228_v53  ;;  %v5774_v53 = vld [vmem:[%s9821_s4 + $0x87] ss:$8 sm:$0xf0]  ;;  %v8855_v17 = vmul.f32 %v1341_v23, %v1318_v3  ;;  %v1961_v15 = vrot.slane %v8803_v57, %v7878_v51  ;;  %v2142_v14 = vsel %vm2134_vm7, %v8442_v61, %v8723_v9 }
 0x231   : > { %10245 = vst [vmem:[#allocation66_spill] sm:$0xff] %v8795_v12  ;;  %v1597_v33 = vsel %vm1574_vm5, %v10250_v18, %v6610_v4  ;;  %6166 = vmatprep.subr.bf16.mxu1 %v8795_v12  ;;  %10252 = vst [vmem:[#allocation118_spill] sm:$0xff] %v8828_v41  ;;  %v2241_v4 = vrot.slane %v8793_v7, %v7878_v51  ;;  %v2521_v13 = vrot.slane %v8807_v55, %v7878_v51 }
 0x232   : > { %6168 = vmatpush1.bf16.msra.mxu1 %v8805_v39  ;;  %10255 = vst [vmem:[#allocation120_spill] sm:$0xff] %v8847_v5  ;;  %v8857_v18 = vmul.f32 %v1621_v42, %v1597_v33  ;;  %v2525_v63 = vrot.slane %v8807_v55, %v7886_v54  ;;  %v1862_v3 = vsel %vm1854_vm6, %v8375_v46, %v8649_v27 }
 0x233   : > { %v8843_v32 = vpop.permute.xlu1 %2404  ;;  %v8845_v16 = vpop.permute.xlu0 %1844  ;;  %v1965_v23 = vrot.slane %v8803_v57, %v7886_v54  ;;  %v1969_v42 = vrot.slane %v8803_v57, %v7912_v37  ;;  %v2245_v61 = vrot.slane %v8793_v7, %v7886_v54  ;;  %v2420_v33 = vsel %vm2414_vm8, %v2401_v25, %v8608_v6 }
 0x234   : > { %10254 = vst [vmem:[#allocation119_spill] sm:$0xff] %v8845_v16  ;;  %v1861_v22 = vsel %vm1854_vm6, %v8649_v27, %v1841_v34  ;;  %v2529_v46 = vrot.slane %v8807_v55, %v7912_v37  ;;  %v8887_v52 = vor.u32 %v5774_v53, %v5773_v56  ;;  %v2310_v45 = vmul.f32 %v2241_v4, %v2142_v14 }
 0x235   : > { %v1973_v39 = vrot.slane %v8803_v57, %v7444_v36  ;;  %v2801_v31 = vrot.slane %v8847_v5, %v7878_v51  ;;  %v2249_v19 = vrot.slane %v8793_v7, %v7912_v37  ;;  %v2030_v38 = vmul.f32 %v1961_v15, %v1862_v3 }
 0x236   : > { %10256 = vst [vmem:[#allocation121_spill] sm:$0xff] %v8887_v52  ;;  %v2421_v27 = vsel %vm2414_vm8, %v8494_v21, %v2401_v25  ;;  %v2253_v56 = vrot.slane %v8793_v7, %v7444_v36  ;;  %v2591_v53 = vmul.f32 %v2525_v63, %v2420_v33  ;;  %v2031_v14 = vmul.f32 %v1965_v23, %v1861_v22  ;;  %v5779_v33 = vld [vmem:[%s9821_s4 + $0x140] ss:$8 sm:$0xf] }
 0x237   : > { %v2681_v12 = vpop.permute.xlu1 %2680  ;;  %v2121_v8 = vpop.permute.xlu0 %2120  ;;  %v1859_v15 = vsel %vm1854_vm6, %v8686_v28, %v8845_v16  ;;  %v2805_v21 = vrot.slane %v8847_v5, %v7886_v54  ;;  %v3085_v25 = vrot.slane %v8887_v52, %v7886_v54  ;;  %v8916_v63 = vpack.c.bf16 %v2310_v45, %v2030_v38  ;;  %v5780_v38 = vld [vmem:[%s9821_s4 + $0x140] ss:$8 sm:$0xf0] }
 0x238   : > { %v2141_v4 = vsel %vm2134_vm7, %v8723_v9, %v2121_v8  ;;  %v2140_v57 = vsel %vm2134_vm7, %v2121_v8, %v8755_v2  ;;  %v3081_v9 = vrot.slane %v8887_v52, %v7878_v51  ;;  %v2590_v22 = vmul.f32 %v2521_v13, %v2421_v27 }
 0x239   : > { %v2311_v41 = vmul.f32 %v2245_v61, %v2141_v4  ;;  %v1860_v8 = vsel %vm1854_vm6, %v1841_v34, %v8686_v28  ;;  %v2419_v45 = vsel %vm2414_vm8, %v8608_v6, %v8843_v32  ;;  %v2701_v28 = vsel %vm2694_vm9, %v8516_v26, %v2681_v12 }
 0x23a   : > { %v2312_v34 = vmul.f32 %v2249_v19, %v2140_v57  ;;  %v2033_v13 = vmul.f32 %v1973_v39, %v1859_v15  ;;  %v8946_v4 = vpack.c.bf16 %v2591_v53, %v7961_v49  ;;  %v2533_v6 = vrot.slane %v8807_v55, %v7444_v36  ;;  %v10393_v55 = vld [vmem:[#allocation112_spill] sm:$0xff] }
 0x23b   : > { %v8921_v3 = vpop.permute.xlu1 %2684  ;;  %v8923_v23 = vpop.permute.xlu0 %2124  ;;  %v8925_v61 = vpack.c.bf16 %v2311_v41, %v2031_v14  ;;  %v10257_v14 = vld [vmem:[#allocation68_spill] sm:$0xff]  ;;  %v2032_v7 = vmul.f32 %v1969_v42, %v1860_v8  ;;  %v2700_v26 = vsel %vm2694_vm9, %v2681_v12, %v8620_v0  ;;  %v8955_v19 = vor.u32 %v5780_v38, %v5779_v33 }
 0x23c   : > { %v2139_v41 = vsel %vm2134_vm7, %v8755_v2, %v8923_v23  ;;  %v6620_v16 = vunpack.i.h.bf16 %v10257_v14  ;;  %v10259_v2 = vld [vmem:[#allocation71_spill] sm:$0xff]  ;;  %v2592_v39 = vmul.f32 %v2529_v46, %v2419_v45  ;;  %v2870_v49 = vmul.f32 %v2801_v31, %v2701_v28 }
 0x23d   : > { %v2313_v27 = vmul.f32 %v2253_v56, %v2139_v41  ;;  %6154 = vmatprep.subr.bf16.mxu0 %v8925_v61  ;;  %10258 = vst [vmem:[#allocation68_spill] sm:$0xff] %v8955_v19  ;;  %v8958_v57 = vpack.c.bf16 %v2590_v22, %v10259_v2  ;;  %v8965_v42 = vpack.c.bf16 %v2312_v34, %v2032_v7  ;;  %v10019_v7 = vunpack.i.l.bf16 %v10257_v14  ;;  %v10264_v2 = vld [vmem:[#allocation69_spill] sm:$0xff] }
 0x23e   : > { %6156 = vmatpush1.bf16.msra.mxu0 %v8916_v63  ;;  %v2871_v46 = vmul.f32 %v2805_v21, %v2700_v26  ;;  %v8982_v45 = vsel %vm2134_vm7, %v6620_v16, %v10237_v20  ;;  %v2181_v34 = vrot.slane %v10235_v48, %v7886_v54  ;;  %v9002_v41 = vpack.c.bf16 %v2592_v39, %v7842_v10 }
 0x23f   : > { %v2961_v56 = vpop.permute.xlu1 %2960  ;;  %6158 = vmatprep.subr.bf16.mxu0 %v8946_v4  ;;  %v8961_v53 = vpop.permute.xlu0 %2406  ;;  %v8963_v15 = vpack.c.bf16 %v2313_v27, %v2033_v13  ;;  %v3361_v13 = vrot.slane %v8955_v19, %v7878_v51  ;;  %v10263_v27 = vld [vmem:[#allocation35_spill] sm:$0xff]  ;;  %v3365_v10 = vrot.slane %v8955_v19, %v7886_v54  ;;  %v3093_v26 = vrot.slane %v8887_v52, %v7444_v36 }
 0x240   : > { %10260 = vst [vmem:[#allocation71_spill] sm:$0xff] %v8961_v53  ;;  %v2980_v12 = vsel %vm2974_vm10, %v2961_v56, %v8629_v43  ;;  %v2981_v22 = vsel %vm2974_vm10, %v8561_v58, %v2961_v56  ;;  %v2418_v31 = vsel %vm2414_vm8, %v8843_v32, %v8961_v53  ;;  %v6181_v58 = vpack.c.bf16 %v8857_v18, %v8855_v17 }
 0x241   : > { %v3150_v8 = vmul.f32 %v3081_v9, %v2981_v22  ;;  %v3151_v33 = vmul.f32 %v3085_v25, %v2980_v12  ;;  %v2593_v38 = vmul.f32 %v2533_v6, %v2418_v31  ;;  %6170 = vmatprep.subr.bf16.mxu1 %v8963_v15  ;;  %v1901_v32 = vrot.slane %v10221_v59, %v7886_v54 }
 0x242   : > { %6160 = vmatpush1.bf16.msra.mxu0 %v8958_v57  ;;  %6172 = vmatpush1.bf16.msra.mxu1 %v8965_v42  ;;  %v3089_v17 = vrot.slane %v8887_v52, %v7912_v37  ;;  %v2813_v18 = vrot.slane %v8847_v5, %v7444_v36  ;;  %v6625_v39 = vunpack.i.h.bf16 %v10264_v2  ;;  %v10265_v56 = vunpack.i.h.bf16 %v10243_v11 }
 0x243   : > { %v8990_v21 = vpack.c.bf16 %v3150_v8, %v2870_v49  ;;  %v2965_v9 = vpop.permute.xlu1 %2964  ;;  %v8992_v25 = vpop.permute.xlu0 %2686  ;;  %v8994_v28 = vpack.c.bf16 %v3151_v33, %v2871_v46  ;;  %v8997_v20 = vpack.c.bf16 %v2593_v38, %v7996_v62  ;;  %v2809_v49 = vrot.slane %v8847_v5, %v7912_v37 }
 0x244   : > { %10262 = vst [vmem:[#allocation123_spill] sm:$0xff] %v8992_v25  ;;  %v2979_v62 = vsel %vm2974_vm10, %v8629_v43, %v2965_v9  ;;  %v2698_v43 = vsel %vm2694_vm9, %v8921_v3, %v8992_v25  ;;  %v10266_v12 = vunpack.i.l.bf16 %v10243_v11  ;;  %v6624_v31 = vunpack.i.l.bf16 %v10264_v2 }
 0x245   : > { %10261 = vst [vmem:[#allocation122_spill] sm:$0xff] %v8990_v21  ;;  %6162 = vmatprep.subr.bf16.mxu0 %v8994_v28  ;;  %6174 = vmatprep.subr.bf16.mxu1 %v8997_v20  ;;  %v2699_v46 = vsel %vm2694_vm9, %v8620_v0, %v8921_v3  ;;  %v3373_v38 = vrot.slane %v8955_v19, %v7444_v36 }
 0x246   : > { %6164 = vmatpush1.bf16.msra.mxu0 %v8990_v21  ;;  %6176 = vmatpush1.bf16.msra.mxu1 %v9002_v41  ;;  %v1877_v22 = vsel %vm1854_vm6, %v10266_v12, %v10265_v56  ;;  %v2157_v6 = vsel %vm2134_vm7, %v10019_v7, %v6620_v16  ;;  %v3152_v25 = vmul.f32 %v3089_v17, %v2979_v62  ;;  %v10270_v16 = vld [vmem:[#allocation27_spill] sm:$0xff]  ;;  %v10271_v7 = vunpack.i.l.bf16 %v10263_v27 }
 0x247   : > { %v3241_v8 = vpop.permute.xlu1 %3240  ;;  %v9040_v33 = vpop.permute.xlu0 %2966  ;;  %v2873_v56 = vmul.f32 %v2813_v18, %v2698_v43  ;;  %v2457_v17 = vrot.slane %v10270_v16, %v7878_v51  ;;  %v2465_v62 = vrot.slane %v10270_v16, %v7912_v37  ;;  %v2436_v43 = vsel %vm2414_vm8, %v6624_v31, %v6625_v39 }
 0x248   : > { %10267 = vst [vmem:[#allocation69_spill] sm:$0xff] %v9040_v33  ;;  %v3260_v2 = vsel %vm3254_vm11, %v3241_v8, %v8637_v35  ;;  %v3261_v0 = vsel %vm3254_vm11, %v8577_v50, %v3241_v8  ;;  %v2978_v3 = vsel %vm2974_vm10, %v2965_v9, %v9040_v33  ;;  %v2435_v50 = vsel %vm2414_vm8, %v6625_v39, %v10271_v7 }
 0x249   : > { %v9057_v12 = vmul.f32 %v3361_v13, %v3261_v0  ;;  %v9059_v53 = vmul.f32 %v3365_v10, %v3260_v2  ;;  %v3153_v21 = vmul.f32 %v3093_v26, %v2978_v3  ;;  %v2872_v8 = vmul.f32 %v2809_v49, %v2699_v46 }
 0x24a   : > { %v10272_v9 = vunpack.i.h.bf16 %v10263_v27  ;;  %v2461_v2 = vrot.slane %v10270_v16, %v7886_v54  ;;  %v3369_v49 = vrot.slane %v8955_v19, %v7912_v37  ;;  %v10276_v0 = vrot.slane %v10221_v59, %v7912_v37  ;;  %v10368_v27 = vld [vmem:[#allocation96_spill] sm:$0xff] }
 0x24b   : > { %10268 = vst [vmem:[#allocation124_spill] sm:$0xff] %v9057_v12  ;;  %10269 = vst [vmem:[#allocation125_spill] sm:$0xff] %v9059_v53  ;;  %v3245_v13 = vpop.permute.xlu1 %3244  ;;  %4091 = vmatprep.subr.mxu0 %v9059_v53  ;;  %v9074_v10 = vpop.permute.xlu0 %3246  ;;  %v9076_v26 = vpack.c.bf16 %v3153_v21, %v2873_v56  ;;  %v9082_v7 = vpack.c.bf16 %v3152_v25, %v2872_v8  ;;  %v1337_v21 = vrot.slane %v10217_v44, %v7878_v51  ;;  %v10278_v8 = vmov 0.0   ;;  %v10389_v53 = vld [vmem:[#allocation110_spill] sm:$0xff] }
 0x24c   : > { %v2437_v18 = vsel %vm2414_vm8, %v10272_v9, %v6624_v31  ;;  %10273 = vst [vmem:[#allocation27_spill] sm:$0xff] %v9074_v10  ;;  %v3258_v46 = vsel %vm3254_vm11, %v3245_v13, %v9074_v10  ;;  %4092 = vmatpush1.msra.mxu0 %v9057_v12  ;;  %v3259_v39 = vsel %vm3254_vm11, %v8637_v35, %v3245_v13 }
 0x24d   : > { %10274 = vst [vmem:[#allocation126_spill] sm:$0xff] %v9082_v7  ;;  %v9095_v31 = vmul.f32 %v3373_v38, %v3258_v46  ;;  %6178 = vmatprep.subr.bf16.mxu1 %v9076_v26  ;;  %6182 = vmatprep.subr.bf16.mxu0 %v6181_v58  ;;  %v1617_v25 = vrot.slane %v10220_v40, %v7878_v51  ;;  %v10285_v46 = vld [vmem:[#allocation44_spill] sm:$0xff] }
 0x24e   : > { %v2016_v3 = vmul.f32 %v10276_v0, %v8836_v30  ;;  %v10277_v44 = vrot.slane %v10235_v48, %v7912_v37  ;;  %6180 = vmatpush1.bf16.msra.mxu1 %v9082_v7  ;;  %5788 = vmatmul.mubr.msk.f32.vlgmr.msra.gmra.mrb[22].mxu0 %vm3645_vm12, %v8592_v60  ;;  %v2015_v35 = vmul.f32 %v1901_v32, %v1877_v22  ;;  %v10281_v22 = vunpack.i.l.bf16 %v10239_v24  ;;  %v10286_v0 = vld [vmem:[#allocation25_spill] sm:$0xff] }
 0x24f   : > { %10275 = vst [vmem:[#allocation127_spill] sm:$0xff] %v9095_v31  ;;  %v2574_v58 = vmul.f32 %v2457_v17, %v2437_v18  ;;  %v9111_v38 = vpop.permute.xlu1 %1291  ;;  %4162 = vmatprep.subr.mxu1 %v9095_v31  ;;  %v9114_v40 = vpop.permute.xlu0 %1572  ;;  %v2295_v16 = vmul.f32 %v2181_v34, %v2157_v6  ;;  %v2575_v30 = vmul.f32 %v2461_v2, %v2436_v43  ;;  %v10283_v43 = vld [vmem:[#allocation26_spill] sm:$0xff]  ;;  %v10284_v2 = vld [vmem:[#allocation117_spill] sm:$0xff]  ;;  %v10377_v31 = vld [vmem:[#allocation79_spill] sm:$0xff] }
 0x250   : > { %v2296_v56 = vmul.f32 %v10277_v44, %v8982_v45  ;;  %4284 = vmatprep.mubr.f32.mxu0 %v10278_v8  ;;  %v2576_v9 = vmul.f32 %v2465_v62, %v2435_v50  ;;  %v9117_v13 = vmul.f32 %v3369_v49, %v3259_v39  ;;  %v10280_v45 = vunpack.i.l.bf16 %v10238_v1  ;;  %v10282_v1 = vld [vmem:[#allocation118_spill] sm:$0xff]  ;;  %v10390_v7 = vld [vmem:[#allocation105_spill] sm:$0xff] }
 0x251   : > { %v1598_v17 = vsel %vm1574_vm5, %v9114_v40, %v10281_v22  ;;  %v1897_v6 = vrot.slane %v10221_v59, %v7878_v51  ;;  %v2177_v62 = vrot.slane %v10235_v48, %v7878_v51  ;;  %v6199_v50 = vpack.c.bf16 %v10282_v1, %v8821_v29  ;;  %v10287_v59 = vld [vmem:[#allocation7_spill] sm:$0xff]  ;;  %v10292_v1 = vld [vmem:[#allocation36_spill] sm:$0xff] }
 0x252   : > { %10279 = vst [vmem:[#allocation128_spill] sm:$0xff] %v9117_v13  ;;  %v1319_v32 = vsel %vm1295_vm4, %v9111_v38, %v10280_v45  ;;  %v1734_v34 = vmul.f32 %v1617_v25, %v1598_v17  ;;  %4163 = vmatpush1.msra.mxu1 %v9117_v13  ;;  %v6201_v24 = vpack.c.bf16 %v10284_v2, %v10283_v43 }
 0x253   : > { %v1454_v18 = vmul.f32 %v1337_v21, %v1319_v32  ;;  %v6203_v49 = vpack.c.bf16 %v2296_v56, %v2016_v3  ;;  %v6205_v39 = vpack.c.bf16 %v10285_v46, %v10278_v8  ;;  %v9140_v25 = vpop.permute.xlu1 %1852  ;;  %v10288_v44 = vpack.c.bf16 %v10286_v0, %v10287_v59  ;;  %v9145_v48 = vpop.permute.xlu0 %2132  ;;  %5789 = vmatmul.mubr.msk.f32.vlgmr.msra.gmra.mrb[22].mxu1 %vm3645_vm12, %v8592_v60  ;;  %v10293_v0 = vld [vmem:[#allocation42_spill] sm:$0xff] }
 0x254   : > { %v6185_v29 = vpack.c.bf16 %v2295_v16, %v2015_v35  ;;  %v6189_v45 = vpack.c.bf16 %v2575_v30, %v10278_v8  ;;  %v10289_v3 = vunpack.i.l.bf16 %v10243_v11  ;;  %v10290_v32 = vunpack.i.l.bf16 %v10257_v14  ;;  %4355 = vmatprep.mubr.f32.mxu1 %v10278_v8  ;;  %v10291_v16 = vld [vmem:[#allocation34_spill] sm:$0xff] }
 0x255   : > { %v6183_v21 = vpack.c.bf16 %v1734_v34, %v1454_v18  ;;  %6198 = vmatprep.subr.bf16.mxu1 %v10288_v44  ;;  %v6207_v17 = vpack.c.bf16 %v2576_v9, %v10278_v8  ;;  %v6191_v11 = vpack.c.bf16 %v2574_v58, %v10278_v8  ;;  %v2737_v30 = vrot.slane %v10291_v16, %v7878_v51 }
 0x256   : > { %v1878_v56 = vsel %vm1854_vm6, %v9140_v25, %v10289_v3  ;;  %v2158_v22 = vsel %vm2134_vm7, %v9145_v48, %v10290_v32  ;;  %6200 = vmatpush1.bf16.msra.mxu1 %v6199_v50  ;;  %v2745_v14 = vrot.slane %v10291_v16, %v7912_v37  ;;  %v2741_v18 = vrot.slane %v10291_v16, %v7886_v54 }
 0x257   : > { %v2014_v60 = vmul.f32 %v1897_v6, %v1878_v56  ;;  %v2294_v35 = vmul.f32 %v2177_v62, %v2158_v22  ;;  %6184 = vmatpush1.bf16.msra.mxu0 %v6183_v21  ;;  %6202 = vmatprep.subr.bf16.mxu1 %v6201_v24  ;;  %v2749_v9 = vrot.slane %v10291_v16, %v7444_v36  ;;  %v6633_v6 = vpop.permute.xlu1 %6632  ;;  %v9171_v62 = vpop.permute.xlu0 %6637 }
 0x258   : > { %6186 = vmatprep.subr.bf16.mxu0 %v6185_v29  ;;  %v3017_v58 = vrot.slane %v10292_v1, %v7878_v51  ;;  %v3025_v50 = vrot.slane %v10292_v1, %v7912_v37  ;;  %v3021_v43 = vrot.slane %v10292_v1, %v7886_v54  ;;  %v6635_v2 = vunpack.i.h.bf16 %v6633_v6 }
 0x259   : > { %v6187_v34 = vpack.c.bf16 %v2294_v35, %v2014_v60  ;;  %v6634_v24 = vunpack.i.l.bf16 %v6633_v6  ;;  %v10020_v46 = vunpack.i.h.bf16 %v9171_v62  ;;  %v6639_v21 = vunpack.i.l.bf16 %v9171_v62  ;;  %v10296_v60 = vld [vmem:[#allocation13_spill] sm:$0xff]  ;;  %v10297_v35 = vld [vmem:[#allocation10_spill] sm:$0xff] }
 0x25a   : > { %6204 = vmatpush1.bf16.msra.mxu1 %v6203_v49  ;;  %v3297_v59 = vrot.slane %v10293_v0, %v7878_v51  ;;  %v3305_v44 = vrot.slane %v10293_v0, %v7912_v37  ;;  %v3029_v29 = vrot.slane %v10292_v1, %v7444_v36  ;;  %v10294_v49 = vld [vmem:[#allocation32_spill] sm:$0xff]  ;;  %v1417_v16 = vrot.slane %v10297_v35, %v10296_v60 }
 0x25b   : > { %6188 = vmatpush1.bf16.msra.mxu0 %v6187_v34  ;;  %6206 = vmatprep.subr.bf16.mxu1 %v6205_v39  ;;  %v2716_v3 = vsel %vm2694_vm9, %v6634_v24, %v6635_v2  ;;  %v2717_v56 = vsel %vm2694_vm9, %v10020_v46, %v6634_v24  ;;  %v10295_v32 = vunpack.i.h.bf16 %v10294_v49  ;;  %v2715_v51 = vsel %vm2694_vm9, %v6635_v2, %v6639_v21  ;;  %v6643_v37 = vpop.permute.xlu1 %6642  ;;  %v9199_v22 = vpop.permute.xlu0 %6647  ;;  %v10298_v34 = vld [vmem:[#allocation114_spill] sm:$0xff] }
 0x25c   : > { %6190 = vmatprep.subr.bf16.mxu0 %v6189_v45  ;;  %v1697_v6 = vrot.slane %v10298_v34, %v10296_v60  ;;  %v3309_v1 = vrot.slane %v10293_v0, %v7444_v36  ;;  %v3301_v24 = vrot.slane %v10293_v0, %v7886_v54  ;;  %v6645_v49 = vunpack.i.h.bf16 %v6643_v37  ;;  %v10299_v54 = vld [vmem:[#allocation9_spill] sm:$0xff] }
 0x25d   : > { %v2714_v39 = vsel %vm2694_vm9, %v6639_v21, %v10295_v32  ;;  %v6644_v32 = vunpack.i.l.bf16 %v6643_v37  ;;  %v10025_v2 = vunpack.i.h.bf16 %v9199_v22  ;;  %v6649_v45 = vunpack.i.l.bf16 %v9199_v22 }
 0x25e   : > { %6208 = vmatpush1.bf16.msra.mxu1 %v6207_v17  ;;  %v2854_v21 = vmul.f32 %v2737_v30, %v2717_v56  ;;  %v2856_v46 = vmul.f32 %v2745_v14, %v2715_v51  ;;  %v2855_v10 = vmul.f32 %v2741_v18, %v2716_v3  ;;  %v2857_v19 = vmul.f32 %v2749_v9, %v2714_v39 }
 0x25f   : > { %6192 = vmatpush1.bf16.msra.mxu0 %v6191_v11  ;;  %v2996_v33 = vsel %vm2974_vm10, %v6644_v32, %v6645_v49  ;;  %v2997_v36 = vsel %vm2974_vm10, %v10025_v2, %v6644_v32  ;;  %v10300_v0 = vunpack.i.h.bf16 %v10299_v54  ;;  %v2995_v17 = vsel %vm2974_vm10, %v6645_v49, %v6649_v45  ;;  %v6653_v14 = vpop.permute.xlu1 %6652  ;;  %v9223_v18 = vpop.permute.xlu0 %6657 }
 0x260   : > { %v3134_v30 = vmul.f32 %v3017_v58, %v2997_v36  ;;  %v3136_v11 = vmul.f32 %v3025_v50, %v2995_v17  ;;  %10301 = vst [vmem:[#allocation118_spill] sm:$0xff] %v9223_v18  ;;  %v3135_v9 = vmul.f32 %v3021_v43, %v2996_v33  ;;  %v6655_v56 = vunpack.i.h.bf16 %v6653_v14  ;;  %v10302_v33 = vld [vmem:[#allocation39_spill] sm:$0xff]  ;;  %v10304_v36 = vld [vmem:[#allocation12_spill] sm:$0xff] }
 0x261   : > { %v2994_v37 = vsel %vm2974_vm10, %v6649_v45, %v10300_v0  ;;  %v6654_v39 = vunpack.i.l.bf16 %v6653_v14  ;;  %v10027_v51 = vunpack.i.h.bf16 %v9223_v18  ;;  %v6659_v32 = vunpack.i.l.bf16 %v9223_v18  ;;  %v10305_v17 = vld [vmem:[#allocation23_spill] sm:$0xff]  ;;  %v10357_v18 = vld [vmem:[#allocation93_spill] sm:$0xff] }
 0x262   : > { %v3137_v3 = vmul.f32 %v3029_v29, %v2994_v37  ;;  %v6193_v54 = vpack.c.bf16 %v3135_v9, %v2855_v10  ;;  %v6195_v13 = vpack.c.bf16 %v3134_v30, %v2854_v21  ;;  %v6211_v0 = vpack.c.bf16 %v3136_v11, %v2856_v46  ;;  %v10355_v9 = vld [vmem:[#allocation87_spill] sm:$0xff] }
 0x263   : > { %v3277_v58 = vsel %vm3254_vm11, %v10027_v51, %v6654_v39  ;;  %v3275_v50 = vsel %vm3254_vm11, %v6655_v56, %v6659_v32  ;;  %v10303_v43 = vunpack.i.h.bf16 %v10302_v33  ;;  %v3276_v49 = vsel %vm3254_vm11, %v6654_v39, %v6655_v56  ;;  %v9239_v45 = vpop.permute.xlu1 %1285  ;;  %v9241_v46 = vpop.permute.xlu0 %1566  ;;  %v10310_v56 = vld [vmem:[#allocation67_spill] sm:$0xff]  ;;  %v10317_v33 = vld [vmem:[#allocation22_spill] sm:$0xff] }
 0x264   : > { %v6209_v2 = vpack.c.bf16 %v3137_v3, %v2857_v19  ;;  %v3414_v10 = vmul.f32 %v3297_v59, %v3277_v58  ;;  %v3416_v19 = vmul.f32 %v3305_v44, %v3275_v50  ;;  %6194 = vmatprep.subr.bf16.mxu0 %v6193_v54  ;;  %v1299_v37 = vsel %vm1295_vm4, %v10304_v36, %v9239_v45  ;;  %v10314_v58 = vld [vmem:[#allocation24_spill] sm:$0xff]  ;;  %v10320_v36 = vld [vmem:[#allocation30_spill] sm:$0xff] }
 0x265   : > { %v3274_v29 = vsel %vm3254_vm11, %v6659_v32, %v10303_v43  ;;  %v1578_v30 = vsel %vm1574_vm5, %v10305_v17, %v9241_v46  ;;  %6196 = vmatpush1.bf16.msra.mxu0 %v6195_v13  ;;  %v3415_v59 = vmul.f32 %v3301_v24, %v3276_v49  ;;  %v9251_v44 = vmul.f32 %v1417_v16, %v1299_v37  ;;  %v9268_v16 = vld [vmem:[%s9819_s2] sm:$0xff]  ;;  %v10321_v37 = vld [vmem:[#allocation33_spill] sm:$0xff] }
 0x266   : > { %6210 = vmatprep.subr.bf16.mxu1 %v6209_v2  ;;  %v3417_v21 = vmul.f32 %v3309_v1, %v3274_v29  ;;  %v9253_v11 = vmul.f32 %v1697_v6, %v1578_v30  ;;  %v10308_v2 = vld [vmem:[#allocation17_spill] sm:$0xff]  ;;  %v1977_v39 = vrot.slane %v10310_v56, %v10296_v60 }
 0x267   : > { %6212 = vmatpush1.bf16.msra.mxu1 %v6211_v0  ;;  %10306 = vst [vmem:[#allocation26_spill] sm:$0xff] %v9251_v44  ;;  %v1429_v1 = vrot.slane %v10297_v35, %v10308_v2  ;;  %v1709_v14 = vrot.slane %v10298_v34, %v10308_v2  ;;  %4236 = vmatprep.subr.mxu0 %v3415_v59  ;;  %v9261_v3 = vpop.permute.xlu1 %1289  ;;  %v9263_v13 = vpop.permute.xlu0 %1570  ;;  %v10313_v0 = vld [vmem:[#allocation21_spill] sm:$0xff] }
 0x268   : > { %10307 = vst [vmem:[#allocation117_spill] sm:$0xff] %v9253_v11  ;;  %4307 = vmatprep.subr.mxu1 %v3417_v21  ;;  %10309 = vst [vmem:[#allocation44_spill] sm:$0xff] %v9263_v13  ;;  %v1296_v6 = vsel %vm1295_vm4, %v9261_v3, %v9111_v38  ;;  %v1575_v24 = vsel %vm1574_vm5, %v9263_v13, %v9114_v40  ;;  %v10315_v38 = vld [vmem:[#allocation64_spill] sm:$0xff]  ;;  %v10316_v40 = vld [vmem:[#allocation19_spill] sm:$0xff]  ;;  %v1989_v17 = vrot.slane %v10310_v56, %v10308_v2 }
 0x269   : > { %4237 = vmatpush1.msra.mxu0 %v3414_v10  ;;  %v9280_v32 = vmul.f32 %v1429_v1, %v1296_v6  ;;  %v9282_v54 = vmul.f32 %v1709_v14, %v1575_v24  ;;  %v2257_v50 = vrot.slane %v10315_v38, %v10296_v60  ;;  %v10319_v10 = vld [vmem:[#allocation119_spill] sm:$0xff]  ;;  %v2269_v1 = vrot.slane %v10315_v38, %v10308_v2  ;;  %v10324_v14 = vld [vmem:[#allocation29_spill] sm:$0xff]  ;;  %v10394_v60 = vld [vmem:[#allocation108_spill] sm:$0xff] }
 0x26a   : > { %6214 = vmatprep.subr.bf16.mxu0 %v10313_v0  ;;  %5790 = vmatmul.mubr.msk.f32.vlgmr.msra.gmra.mrb[16].mxu0 %vm3645_vm12, %v9268_v16  ;;  %v10325_v6 = vld [vmem:[#allocation31_spill] sm:$0xff]  ;;  %v5521_v0 = vld [vmem:[%s9820_s3 + $0x8] sm:$0xff]  ;;  %v10395_v13 = vld [vmem:[#allocation113_spill] sm:$0xff] }
 0x26b   : > { %4308 = vmatpush1.msra.mxu1 %v3416_v19  ;;  %10311 = vst [vmem:[#allocation25_spill] sm:$0xff] %v9280_v32  ;;  %10312 = vst [vmem:[#allocation7_spill] sm:$0xff] %v9282_v54  ;;  %6216 = vmatpush1.bf16.msra.mxu0 %v10316_v40  ;;  %v9294_v43 = vpop.permute.xlu1 %1846  ;;  %v9296_v29 = vpop.permute.xlu0 %2126  ;;  %v10328_v40 = vld [vmem:[#allocation38_spill] sm:$0xff]  ;;  %v2829_v32 = vrot.slane %v8847_v5, %v10308_v2  ;;  %v3109_v54 = vrot.slane %v8887_v52, %v10308_v2  ;;  %v10371_v5 = vunpack.i.h.bf16 %v9199_v22  ;;  %v10384_v22 = vld [vmem:[#allocation63_spill] sm:$0xff] }
 0x26c   : > { %6230 = vmatprep.subr.bf16.mxu1 %v10314_v58  ;;  %5791 = vmatmul.mubr.msk.f32.vlgmr.msra.gmra.mrb[16].mxu1 %vm3645_vm12, %v9268_v16  ;;  %10318 = vst [vmem:[#allocation34_spill] sm:$0xff] %v9296_v29  ;;  %v1858_v19 = vsel %vm1854_vm6, %v10319_v10, %v9294_v43  ;;  %v2138_v21 = vsel %vm2134_vm7, %v8923_v23, %v9296_v29  ;;  %v10353_v23 = vld [vmem:[#allocation86_spill] sm:$0xff]  ;;  %v10391_v29 = vld [vmem:[#allocation111_spill] sm:$0xff] }
 0x26d   : > { %6232 = vmatpush1.bf16.msra.mxu1 %v10317_v33  ;;  %6218 = vmatprep.subr.bf16.mxu0 %v10320_v36  ;;  %v9312_v30 = vmul.f32 %v1977_v39, %v1858_v19  ;;  %v9314_v59 = vmul.f32 %v2257_v50, %v2138_v21  ;;  %v10329_v33 = vld [vmem:[#allocation70_spill] sm:$0xff]  ;;  %v10332_v21 = vld [vmem:[#allocation37_spill] sm:$0xff]  ;;  %v10333_v36 = vld [vmem:[#allocation72_spill] sm:$0xff] }
 0x26e   : > { %6234 = vmatprep.subr.bf16.mxu1 %v10321_v37  ;;  %4426 = vmatprep.mubr.f32.mxu0 %v10278_v8 }
 0x26f   : > { %10322 = vst [vmem:[#allocation36_spill] sm:$0xff] %v9312_v30  ;;  %10323 = vst [vmem:[#allocation42_spill] sm:$0xff] %v9314_v59  ;;  %4497 = vmatprep.mubr.f32.mxu1 %v10278_v8  ;;  %6220 = vmatpush1.bf16.msra.mxu0 %v10324_v14  ;;  %v9324_v24 = vpop.permute.xlu1 %1850  ;;  %v9326_v39 = vpop.permute.xlu0 %2130  ;;  %v10336_v14 = vld [vmem:[#allocation43_spill] sm:$0xff]  ;;  %v10359_v59 = vld [vmem:[#allocation88_spill] sm:$0xff] }
 0x270   : > { %10326 = vst [vmem:[#allocation32_spill] sm:$0xff] %v9324_v24  ;;  %10327 = vst [vmem:[#allocation10_spill] sm:$0xff] %v9326_v39  ;;  %v1855_v58 = vsel %vm1854_vm6, %v9324_v24, %v9140_v25  ;;  %v2135_v50 = vsel %vm2134_vm7, %v9326_v39, %v9145_v48  ;;  %6222 = vmatprep.subr.bf16.mxu0 %v10328_v40  ;;  %5524 = vperm.xlu1 %6661, %v5521_v0   ;;  %v10354_v48 = vld [vmem:[#allocation90_spill] sm:$0xff]  ;;  %v10387_v24 = vld [vmem:[#allocation60_spill] sm:$0xff] }
 0x271   : > { %6236 = vmatpush1.bf16.msra.mxu1 %v10325_v6  ;;  %v9341_v10 = vmul.f32 %v1989_v17, %v1855_v58  ;;  %v9343_v19 = vmul.f32 %v2269_v1, %v2135_v50  ;;  %v10337_v6 = vld [vmem:[#allocation73_spill] sm:$0xff]  ;;  %v10339_v1 = vld [vmem:[#allocation40_spill] sm:$0xff]  ;;  %v10342_v50 = vld [vmem:[#allocation74_spill] sm:$0xff] }
 0x272   : > { %6238 = vmatprep.subr.bf16.mxu1 %v10329_v33  ;;  %v10338_v17 = vld [vmem:[#allocation41_spill] sm:$0xff]  ;;  %v10343_v33 = vld [vmem:[#allocation46_spill] sm:$0xff] }
 0x273   : > { %10330 = vst [vmem:[#allocation114_spill] sm:$0xff] %v9341_v10  ;;  %10331 = vst [vmem:[#allocation9_spill] sm:$0xff] %v9343_v19  ;;  %6224 = vmatpush1.bf16.msra.mxu0 %v10332_v21  ;;  %v9347_v37 = vpop.permute.xlu1 %2690  ;;  %v9349_v25 = vpop.permute.xlu0 %2410  ;;  %v10341_v58 = vld [vmem:[#allocation45_spill] sm:$0xff]  ;;  %v10344_v21 = vld [vmem:[#allocation75_spill] sm:$0xff] }
 0x274   : > { %10334 = vst [vmem:[#allocation39_spill] sm:$0xff] %v9347_v37  ;;  %10335 = vst [vmem:[#allocation12_spill] sm:$0xff] %v9349_v25  ;;  %6226 = vmatprep.subr.bf16.mxu0 %v10336_v14  ;;  %v10345_v14 = vld [vmem:[#allocation80_spill] sm:$0xff]  ;;  %v10360_v10 = vld [vmem:[#allocation94_spill] sm:$0xff] }
 0x275   : > { %6240 = vmatpush1.bf16.msra.mxu1 %v10333_v36  ;;  %v10361_v19 = vld [vmem:[#allocation92_spill] sm:$0xff]  ;;  %v10362_v37 = vld [vmem:[#allocation97_spill] sm:$0xff]  ;;  %v10374_v25 = vld [vmem:[#allocation95_spill] sm:$0xff] }
 0x276   : > { %6242 = vmatprep.subr.bf16.mxu1 %v10337_v6  ;;  %v10346_v6 = vld [vmem:[#allocation83_spill] sm:$0xff]  ;;  %v10388_v39 = vld [vmem:[#allocation106_spill] sm:$0xff] }
 0x277   : > { %6228 = vmatpush1.bf16.msra.mxu0 %v10338_v17  ;;  %v9357_v0 = vpop.permute.xlu0 %2970 }
 0x278   : > { %10340 = vst [vmem:[#allocation23_spill] sm:$0xff] %v9357_v0  ;;  %4378 = vmatprep.subr.mxu0 %v10341_v58  ;;  %v9361_v40 = vpop.permute.xlu1 %1568  ;;  %v10349_v58 = vld [vmem:[#allocation84_spill] sm:$0xff]  ;;  %v10366_v0 = vunpack.i.h.bf16 %v9171_v62 }
 0x279   : > { %6244 = vmatpush1.bf16.msra.mxu1 %v10339_v1  ;;  %v10348_v1 = vld [vmem:[#allocation81_spill] sm:$0xff] }
 0x27a   : > { %4449 = vmatprep.subr.mxu1 %v10342_v50  ;;  %v10350_v50 = vld [vmem:[#allocation85_spill] sm:$0xff] }
 0x27b   : > { %4379 = vmatpush1.msra.mxu0 %v10343_v33  ;;  %v9365_v36 = vpop.permute.xlu0 %1287 }
 0x27c   : > { %6246 = vmatprep.subr.bf16.mxu0 %v10345_v14  ;;  %v9369_v17 = vpop.permute.xlu1 %2128  ;;  %5792 = vmatmul.mubr.msk.f32.vlgmr.msra.gmra.mrb[18].mxu0 %vm3645_vm12, %v9268_v16 }
 0x27d   : > { %4450 = vmatpush1.msra.mxu1 %v10344_v21  ;;  %10347 = vst [vmem:[#allocation67_spill] sm:$0xff] %v9369_v17  ;;  %6248 = vmatpush1.bf16.msra.mxu0 %v10348_v1  ;;  %v10351_v21 = vld [vmem:[#allocation89_spill] sm:$0xff] }
 0x27e   : > { %6262 = vmatprep.subr.bf16.mxu1 %v10346_v6  ;;  %5793 = vmatmul.mubr.msk.f32.vlgmr.msra.gmra.mrb[18].mxu1 %vm3645_vm12, %v9268_v16  ;;  %v10392_v17 = vld [vmem:[#allocation109_spill] sm:$0xff] }
 0x27f   : > { %6264 = vmatpush1.bf16.msra.mxu1 %v10349_v58  ;;  %6250 = vmatprep.subr.bf16.mxu0 %v10350_v50  ;;  %v9378_v33 = vpop.permute.xlu0 %1848 }
 0x280   : > { %6266 = vmatprep.subr.bf16.mxu1 %v10351_v21  ;;  %v9381_v51 = vpop.permute.xlu1 %2408  ;;  %4568 = vmatprep.mubr.f32.mxu0 %v10278_v8 }
 0x281   : > { %10352 = vst [vmem:[#allocation21_spill] sm:$0xff] %v9381_v51  ;;  %4639 = vmatprep.mubr.f32.mxu1 %v10278_v8  ;;  %6252 = vmatpush1.bf16.msra.mxu0 %v10353_v23 }
 0x282   : > { %6254 = vmatprep.subr.bf16.mxu0 %v10355_v9 }
 0x283   : > { %6268 = vmatpush1.bf16.msra.mxu1 %v10354_v48  ;;  %v9388_v49 = vpop.permute.xlu0 %2688 }
 0x284   : > { %10356 = vst [vmem:[#allocation24_spill] sm:$0xff] %v9388_v49  ;;  %6270 = vmatprep.subr.bf16.mxu1 %v10357_v18  ;;  %v9391_v30 = vpop.permute.xlu1 %2412  ;;  %v10365_v49 = vld [vmem:[#allocation91_spill] sm:$0xff] }
 0x285   : > { %10358 = vst [vmem:[#allocation64_spill] sm:$0xff] %v9391_v30  ;;  %6256 = vmatpush1.bf16.msra.mxu0 %v10359_v59  ;;  %v10367_v30 = vld [vmem:[#allocation99_spill] sm:$0xff] }
 0x286   : > { %6258 = vmatprep.subr.bf16.mxu0 %v10361_v19 }
 0x287   : > { %6272 = vmatpush1.bf16.msra.mxu1 %v10360_v10  ;;  %v9399_v11 = vpop.permute.xlu0 %2692 }
 0x288   : > { %6274 = vmatprep.subr.bf16.mxu1 %v10362_v37  ;;  %v9397_v44 = vpop.permute.xlu1 %2968  ;;  %10364 = vst [vmem:[#allocation22_spill] sm:$0xff] %v9399_v11  ;;  %v2718_v12 = vsel %vm2694_vm9, %v9399_v11, %v10366_v0  ;;  %v10375_v0 = vld [vmem:[#allocation101_spill] sm:$0xff]  ;;  %v10376_v11 = vld [vmem:[#allocation76_spill] sm:$0xff] }
 0x289   : > { %10363 = vst [vmem:[#allocation19_spill] sm:$0xff] %v9397_v44  ;;  %6260 = vmatpush1.bf16.msra.mxu0 %v10365_v49  ;;  %v10369_v44 = vld [vmem:[#allocation100_spill] sm:$0xff]  ;;  %v9421_v2 = vmul.f32 %v2829_v32, %v2718_v12  ;;  %v10380_v12 = vld [vmem:[#allocation82_spill] sm:$0xff]  ;;  %v10381_v32 = vld [vmem:[#allocation103_spill] sm:$0xff] }
 0x28a   : > { %4520 = vmatprep.subr.mxu0 %v10368_v27 }
 0x28b   : > { %6276 = vmatpush1.bf16.msra.mxu1 %v10367_v30  ;;  %10372 = vst [vmem:[#allocation30_spill] sm:$0xff] %v9421_v2  ;;  %v10385_v2 = vld [vmem:[#allocation65_spill] sm:$0xff] }
 0x28c   : > { %4591 = vmatprep.subr.mxu1 %v10369_v44  ;;  %v9414_v51 = vpop.permute.xlu1 %2972 }
 0x28d   : > { %10370 = vst [vmem:[#allocation119_spill] sm:$0xff] %v9414_v51  ;;  %v2998_v52 = vsel %vm2974_vm10, %v9414_v51, %v10371_v5  ;;  %4521 = vmatpush1.msra.mxu0 %v10374_v25  ;;  %v10378_v5 = vld [vmem:[#allocation77_spill] sm:$0xff]  ;;  %v10383_v51 = vld [vmem:[#allocation104_spill] sm:$0xff] }
 0x28e   : > { %v9423_v62 = vmul.f32 %v3109_v54, %v2998_v52  ;;  %6278 = vmatprep.subr.bf16.mxu0 %v10376_v11  ;;  %5794 = vmatmul.mubr.msk.f32.vlgmr.msra.gmra.mrb[20].mxu0 %vm3645_vm12, %v9268_v16  ;;  %v10379_v52 = vld [vmem:[#allocation78_spill] sm:$0xff] }
 0x28f   : > { %4592 = vmatpush1.msra.mxu1 %v10375_v0  ;;  %6280 = vmatpush1.bf16.msra.mxu0 %v10378_v5  ;;  %v10382_v54 = vld [vmem:[#allocation62_spill] sm:$0xff] }
 0x290   : > { %10373 = vst [vmem:[#allocation33_spill] sm:$0xff] %v9423_v62  ;;  %6294 = vmatprep.subr.bf16.mxu1 %v10377_v31  ;;  %5795 = vmatmul.mubr.msk.f32.vlgmr.msra.gmra.mrb[20].mxu1 %vm3645_vm12, %v9268_v16  ;;  %v10386_v62 = vld [vmem:[#allocation55_spill] sm:$0xff] }
 0x291   : > { %6296 = vmatpush1.bf16.msra.mxu1 %v10379_v52  ;;  %6282 = vmatprep.subr.bf16.mxu0 %v10380_v12 }
 0x292   : > { %6298 = vmatprep.subr.bf16.mxu1 %v10381_v32  ;;  %4710 = vmatprep.mubr.f32.mxu0 %v10278_v8 }
 0x293   : > { %4781 = vmatprep.mubr.f32.mxu1 %v10278_v8  ;;  %6284 = vmatpush1.bf16.msra.mxu0 %v10382_v54 }
 0x294   : > { %6286 = vmatprep.subr.bf16.mxu0 %v10384_v22 }
 0x295   : > { %6300 = vmatpush1.bf16.msra.mxu1 %v10383_v51 }
 0x296   : > { %6302 = vmatprep.subr.bf16.mxu1 %v10385_v2 }
 0x297   : > { %6288 = vmatpush1.bf16.msra.mxu0 %v10386_v62 }
 0x298   : > { %6290 = vmatprep.subr.bf16.mxu0 %v10388_v39 }
 0x299   : > { %6304 = vmatpush1.bf16.msra.mxu1 %v10387_v24 }
 0x29a   : > { %6306 = vmatprep.subr.bf16.mxu1 %v10389_v53 }
 0x29b   : > { %6292 = vmatpush1.bf16.msra.mxu0 %v10390_v7 }
 0x29c   : > { %4662 = vmatprep.subr.mxu0 %v10392_v17 }
 0x29d   : > { %6308 = vmatpush1.bf16.msra.mxu1 %v10391_v29 }
 0x29e   : > { %4733 = vmatprep.subr.mxu1 %v10393_v55 }
 0x29f   : > { %4663 = vmatpush1.msra.mxu0 %v10394_v60 }
 0x2a0   : > { %6310 = vmatprep.subr.bf16.mxu0 %v10345_v14  ;;  %5796 = vmatmul.mubr.msk.f32.vlgmr.msra.gmra.mrb[22].mxu0 %vm3645_vm12, %v9268_v16 }
 0x2a1   : > { %4734 = vmatpush1.msra.mxu1 %v10395_v13  ;;  %6312 = vmatpush1.bf16.msra.mxu0 %v10348_v1 }
 0x2a2   : > { %6326 = vmatprep.subr.bf16.mxu1 %v10346_v6  ;;  %5797 = vmatmul.mubr.msk.f32.vlgmr.msra.gmra.mrb[22].mxu1 %vm3645_vm12, %v9268_v16 }
 0x2a3   : > { %6328 = vmatpush1.bf16.msra.mxu1 %v10349_v58  ;;  %6314 = vmatprep.subr.bf16.mxu0 %v10350_v50  ;;  %v10418_v58 = vld [vmem:[#allocation64_spill] sm:$0xff] }
 0x2a4   : > { %6330 = vmatprep.subr.bf16.mxu1 %v10351_v21  ;;  %5001 = vmatprep.mubr.f32.mxu0 %v10278_v8 }
 0x2a5   : > { %5072 = vmatprep.mubr.f32.mxu1 %v10278_v8  ;;  %6316 = vmatpush1.bf16.msra.mxu0 %v10353_v23 }
 0x2a6   : > { %6318 = vmatprep.subr.bf16.mxu0 %v10355_v9  ;;  %v10405_v9 = vld [vmem:[#allocation122_spill] sm:$0xff] }
 0x2a7   : > { %6332 = vmatpush1.bf16.msra.mxu1 %v10354_v48 }
 0x2a8   : > { %6334 = vmatprep.subr.bf16.mxu1 %v10357_v18  ;;  %v9482_v18 = vld [vmem:[%s9819_s2 + $0x10] sm:$0xff] }
 0x2a9   : > { %6320 = vmatpush1.bf16.msra.mxu0 %v10359_v59  ;;  %v10410_v59 = vld [vmem:[#allocation10_spill] sm:$0xff] }
 0x2aa   : > { %6322 = vmatprep.subr.bf16.mxu0 %v10361_v19  ;;  %v10412_v19 = vld [vmem:[#allocation127_spill] sm:$0xff] }
 0x2ab   : > { %6336 = vmatpush1.bf16.msra.mxu1 %v10360_v10 }
 0x2ac   : > { %6338 = vmatprep.subr.bf16.mxu1 %v10362_v37 }
 0x2ad   : > { %6324 = vmatpush1.bf16.msra.mxu0 %v10365_v49  ;;  %v10409_v49 = vld [vmem:[#allocation125_spill] sm:$0xff] }
 0x2ae   : > { %4953 = vmatprep.subr.mxu0 %v10368_v27  ;;  %v10396_v27 = vld [vmem:[#allocation8_spill] sm:$0xff] }
 0x2af   : > { %6340 = vmatpush1.bf16.msra.mxu1 %v10367_v30 }
 0x2b0   : > { %5024 = vmatprep.subr.mxu1 %v10369_v44  ;;  %v10403_v44 = vld [vmem:[#allocation13_spill] sm:$0xff] }
 0x2b1   : > { %4954 = vmatpush1.msra.mxu0 %v10374_v25  ;;  %v10414_v25 = vld [vmem:[#allocation21_spill] sm:$0xff] }
 0x2b2   : > { %5799 = vmatmul.mubr.msk.f32.vlgmr.msra.gmra.mrb[16].mxu0 %vm3645_vm12, %v9482_v18  ;;  %6342 = vmatprep.subr.bf16.mxu0 %v10376_v11  ;;  %v10404_v11 = vld [vmem:[#allocation116_spill] sm:$0xff] }
 0x2b3   : > { %5025 = vmatpush1.msra.mxu1 %v10375_v0  ;;  %6344 = vmatpush1.bf16.msra.mxu0 %v10378_v5 }
 0x2b4   : > { %5800 = vmatmul.mubr.msk.f32.vlgmr.msra.gmra.mrb[16].mxu1 %vm3645_vm12, %v9482_v18  ;;  %6358 = vmatprep.subr.bf16.mxu1 %v10377_v31  ;;  %v10399_v31 = vld [vmem:[#allocation115_spill] sm:$0xff] }
 0x2b5   : > { %6360 = vmatpush1.bf16.msra.mxu1 %v10379_v52  ;;  %6346 = vmatprep.subr.bf16.mxu0 %v10380_v12  ;;  %v10421_v12 = vld [vmem:[#allocation128_spill] sm:$0xff] }
 0x2b6   : > { %6362 = vmatprep.subr.bf16.mxu1 %v10381_v32  ;;  %5143 = vmatprep.mubr.f32.mxu0 %v10278_v8  ;;  %v10422_v32 = vld [vmem:[#allocation71_spill] sm:$0xff] }
 0x2b7   : > { %5214 = vmatprep.mubr.f32.mxu1 %v10278_v8  ;;  %6348 = vmatpush1.bf16.msra.mxu0 %v10382_v54  ;;  %v2417_v54 = vsel %vm2414_vm8, %v10422_v32, %v10414_v25 }
 0x2b8   : > { %6350 = vmatprep.subr.bf16.mxu0 %v10384_v22 }
 0x2b9   : > { %6364 = vmatpush1.bf16.msra.mxu1 %v10383_v51  ;;  %v1298_v51 = vsel %vm1295_vm4, %v9239_v45, %v9365_v36 }
 0x2ba   : > { %6366 = vmatprep.subr.bf16.mxu1 %v10385_v2 }
 0x2bb   : > { %6352 = vmatpush1.bf16.msra.mxu0 %v10386_v62  ;;  %v10420_v62 = vld [vmem:[#allocation124_spill] sm:$0xff] }
 0x2bc   : > { %6354 = vmatprep.subr.bf16.mxu0 %v10388_v39 }
 0x2bd   : > { %6368 = vmatpush1.bf16.msra.mxu1 %v10387_v24  ;;  %v10411_v24 = vld [vmem:[#allocation32_spill] sm:$0xff] }
 0x2be   : > { %6370 = vmatprep.subr.bf16.mxu1 %v10389_v53  ;;  %v10397_v53 = vld [vmem:[#allocation66_spill] sm:$0xff]  ;;  %v1856_v39 = vsel %vm1854_vm6, %v9378_v33, %v10411_v24 }
 0x2bf   : > { %6356 = vmatpush1.bf16.msra.mxu0 %v10390_v7  ;;  %v10398_v7 = vld [vmem:[#allocation28_spill] sm:$0xff] }
 0x2c0   : > { %5095 = vmatprep.subr.mxu0 %v10392_v17  ;;  %v10416_v17 = vld [vmem:[#allocation35_spill] sm:$0xff] }
 0x2c1   : > { %6372 = vmatpush1.bf16.msra.mxu1 %v10391_v29  ;;  %v10408_v29 = vld [vmem:[#allocation126_spill] sm:$0xff]  ;;  %v10417_v1 = vunpack.i.h.bf16 %v10416_v17  ;;  %v3251_v17 = vpop.permute.xlu1 %3250 }
 0x2c2   : > { %5166 = vmatprep.subr.mxu1 %v10393_v55  ;;  %v10400_v55 = vld [vmem:[#allocation15_spill] sm:$0xff] }
 0x2c3   : > { %5096 = vmatpush1.msra.mxu0 %v10394_v60  ;;  %v1421_v60 = vrot.slane %v10297_v35, %v10400_v55  ;;  %v2541_v2 = vrot.slane %v10404_v11, %v10400_v55  ;;  %v2438_v50 = vsel %vm2414_vm8, %v10418_v58, %v10417_v1  ;;  %v10445_v1 = vld [vmem:[#allocation98_spill] sm:$0xff] }
 0x2c4   : > { %5801 = vmatmul.mubr.msk.f32.vlgmr.msra.gmra.mrb[18].mxu0 %vm3645_vm12, %v9482_v18  ;;  %6374 = vmatprep.subr.bf16.mxu0 %v10396_v27 }
 0x2c5   : > { %5167 = vmatpush1.msra.mxu1 %v10395_v13  ;;  %6376 = vmatpush1.bf16.msra.mxu0 %v10398_v7  ;;  %v1475_v45 = vmul.f32 %v1421_v60, %v1298_v51  ;;  %v10407_v13 = vld [vmem:[#allocation34_spill] sm:$0xff]  ;;  %v10423_v60 = vld [vmem:[#allocation23_spill] sm:$0xff] }
 0x2c6   : > { %5802 = vmatmul.mubr.msk.f32.vlgmr.msra.gmra.mrb[18].mxu1 %vm3645_vm12, %v9482_v18  ;;  %6390 = vmatprep.subr.bf16.mxu1 %v10397_v53 }
 0x2c7   : > { %6392 = vmatpush1.bf16.msra.mxu1 %v10399_v31  ;;  %6378 = vmatprep.subr.bf16.mxu0 %v8925_v61  ;;  %v10401_v61 = vld [vmem:[#allocation11_spill] sm:$0xff] }
 0x2c8   : > { %6394 = vmatprep.subr.bf16.mxu1 %v8963_v15  ;;  %5285 = vmatprep.mubr.f32.mxu0 %v10278_v8  ;;  %v1425_v15 = vrot.slane %v10297_v35, %v10401_v61  ;;  %v1857_v35 = vsel %vm1854_vm6, %v9294_v43, %v9378_v33  ;;  %v1985_v43 = vrot.slane %v10310_v56, %v10401_v61  ;;  %v10419_v33 = vld [vmem:[#allocation121_spill] sm:$0xff] }
 0x2c9   : > { %5356 = vmatprep.mubr.f32.mxu1 %v10278_v8  ;;  %6380 = vmatpush1.bf16.msra.mxu0 %v8916_v63  ;;  %v1701_v63 = vrot.slane %v10298_v34, %v10400_v55  ;;  %v3101_v21 = vrot.slane %v10419_v33, %v10400_v55 }
 0x2ca   : > { %6382 = vmatprep.subr.bf16.mxu0 %v8946_v4  ;;  %v1705_v4 = vrot.slane %v10298_v34, %v10401_v61  ;;  %v10402_v34 = vld [vmem:[#allocation44_spill] sm:$0xff]  ;;  %v2036_v52 = vmul.f32 %v1985_v43, %v1856_v39  ;;  %v10439_v39 = vld [vmem:[#allocation119_spill] sm:$0xff] }
 0x2cb   : > { %6396 = vmatpush1.bf16.msra.mxu1 %v8965_v42  ;;  %v1981_v42 = vrot.slane %v10310_v56, %v10400_v55  ;;  %v10413_v56 = vld [vmem:[#allocation12_spill] sm:$0xff] }
 0x2cc   : > { %6398 = vmatprep.subr.bf16.mxu1 %v8997_v20  ;;  %v2261_v20 = vrot.slane %v10315_v38, %v10400_v55  ;;  %v2416_v48 = vsel %vm2414_vm8, %v10414_v25, %v10413_v56  ;;  %v2415_v7 = vsel %vm2414_vm8, %v10413_v56, %v10418_v58  ;;  %v10443_v25 = vld [vmem:[#allocation102_spill] sm:$0xff] }
 0x2cd   : > { %6384 = vmatpush1.bf16.msra.mxu0 %v8958_v57  ;;  %v1297_v57 = vsel %vm1295_vm4, %v9365_v36, %v9261_v3  ;;  %v10406_v3 = vld [vmem:[#allocation67_spill] sm:$0xff]  ;;  %v2035_v10 = vmul.f32 %v1981_v42, %v1857_v35  ;;  %v10415_v36 = vld [vmem:[#allocation17_spill] sm:$0xff]  ;;  %v2595_v27 = vmul.f32 %v2541_v2, %v2416_v48  ;;  %v10431_v35 = vld [vmem:[#allocation120_spill] sm:$0xff] }
 0x2ce   : > { %6386 = vmatprep.subr.bf16.mxu0 %v8994_v28  ;;  %v1577_v28 = vsel %vm1574_vm5, %v9241_v46, %v9361_v40  ;;  %v2537_v46 = vrot.slane %v10404_v11, %v10403_v44  ;;  %v2137_v16 = vsel %vm2134_vm7, %v10407_v13, %v10406_v3  ;;  %v2136_v23 = vsel %vm2134_vm7, %v10406_v3, %v10410_v59  ;;  %v10433_v3 = vld [vmem:[#allocation24_spill] sm:$0xff] }
 0x2cf   : > { %6400 = vmatpush1.bf16.msra.mxu1 %v9002_v41  ;;  %v2265_v41 = vrot.slane %v10315_v38, %v10401_v61  ;;  %v1476_v38 = vmul.f32 %v1425_v15, %v1297_v57  ;;  %v1755_v30 = vmul.f32 %v1701_v63, %v1577_v28  ;;  %v2549_v14 = vrot.slane %v10404_v11, %v10415_v36  ;;  %v10424_v15 = vld [vmem:[#allocation19_spill] sm:$0xff]  ;;  %v3249_v63 = vpop.permute.xlu0 %3248  ;;  %v10426_v57 = vld [vmem:[#allocation25_spill] sm:$0xff] }
 0x2d0   : > { %6402 = vmatprep.subr.bf16.mxu1 %v9076_v26  ;;  %v1576_v26 = vsel %vm1574_vm5, %v9361_v40, %v10402_v34  ;;  %v2545_v40 = vrot.slane %v10404_v11, %v10401_v61  ;;  %v2315_v6 = vmul.f32 %v2261_v20, %v2137_v16  ;;  %v2976_v51 = vsel %vm2974_vm10, %v10424_v15, %v10423_v60  ;;  %v10428_v28 = vld [vmem:[#allocation117_spill] sm:$0xff]  ;;  %v10429_v20 = vld [vmem:[#allocation26_spill] sm:$0xff] }
 0x2d1   : > { %6388 = vmatpush1.bf16.msra.mxu0 %v10405_v9  ;;  %v1756_v37 = vmul.f32 %v1705_v4, %v1576_v26  ;;  %v6405_v0 = vpack.c.bf16 %v1755_v30, %v1475_v45  ;;  %v2316_v22 = vmul.f32 %v2265_v41, %v2136_v23  ;;  %v2597_v31 = vmul.f32 %v2549_v14, %v2438_v50  ;;  %v10425_v4 = vld [vmem:[#allocation7_spill] sm:$0xff]  ;;  %v10434_v16 = vld [vmem:[#allocation9_spill] sm:$0xff] }
 0x2d2   : > { %5237 = vmatprep.subr.mxu0 %v10409_v49  ;;  %v6409_v53 = vpack.c.bf16 %v2315_v6, %v2035_v10  ;;  %v10427_v42 = vpack.c.bf16 %v10425_v4, %v10426_v57  ;;  %v10430_v41 = vpack.c.bf16 %v10428_v28, %v10429_v20  ;;  %v2821_v34 = vrot.slane %v10431_v35, %v10400_v55  ;;  %v10432_v9 = vld [vmem:[#allocation39_spill] sm:$0xff]  ;;  %v10437_v49 = vld [vmem:[#allocation69_spill] sm:$0xff]  ;;  %v10452_v57 = vld [vmem:[#allocation30_spill] sm:$0xff] }
 0x2d3   : > { %6404 = vmatpush1.bf16.msra.mxu1 %v10408_v29  ;;  %v6423_v5 = vpack.c.bf16 %v1756_v37, %v1476_v38  ;;  %v3097_v26 = vrot.slane %v10419_v33, %v10403_v44  ;;  %v3105_v45 = vrot.slane %v10419_v33, %v10401_v61  ;;  %v2594_v11 = vmul.f32 %v2537_v46, %v2417_v54  ;;  %v10435_v38 = vld [vmem:[#allocation114_spill] sm:$0xff]  ;;  %v10438_v46 = vld [vmem:[#allocation107_spill] sm:$0xff]  ;;  %v10441_v37 = vld [vmem:[#allocation36_spill] sm:$0xff] }
 0x2d4   : > { %5308 = vmatprep.subr.mxu1 %v10412_v19  ;;  %v6427_v2 = vpack.c.bf16 %v2316_v22, %v2036_v52  ;;  %v2696_v13 = vsel %vm2694_vm9, %v10433_v3, %v10432_v9  ;;  %v10436_v43 = vpack.c.bf16 %v10434_v16, %v10435_v38  ;;  %v2596_v29 = vmul.f32 %v2545_v40, %v2415_v7  ;;  %v10440_v19 = vld [vmem:[#allocation42_spill] sm:$0xff]  ;;  %v10444_v40 = vld [vmem:[#allocation123_spill] sm:$0xff]  ;;  %v10448_v52 = vld [vmem:[#allocation68_spill] sm:$0xff] }
 0x2d5   : > { %5238 = vmatpush1.msra.mxu0 %v10420_v62  ;;  %v2977_v30 = vsel %vm2974_vm10, %v10437_v49, %v10424_v15  ;;  %v3155_v59 = vmul.f32 %v3101_v21, %v2976_v51  ;;  %v6413_v23 = vpack.c.bf16 %v2595_v27, %v10438_v46  ;;  %v2817_v24 = vrot.slane %v10431_v35, %v10403_v44  ;;  %v10446_v33 = vld [vmem:[#allocation22_spill] sm:$0xff]  ;;  %v3253_v62 = vpop.permute.xlu0 %3252  ;;  %v10451_v4 = vld [vmem:[#allocation33_spill] sm:$0xff]  ;;  %v10454_v20 = vld [vmem:[#allocation27_spill] sm:$0xff] }
 0x2d6   : > { %5803 = vmatmul.mubr.msk.f32.vlgmr.msra.gmra.mrb[20].mxu0 %vm3645_vm12, %v9482_v18  ;;  %6406 = vmatprep.subr.bf16.mxu0 %v6405_v0  ;;  %v2975_v10 = vsel %vm2974_vm10, %v10423_v60, %v10439_v39  ;;  %v10442_v56 = vpack.c.bf16 %v10440_v19, %v10441_v37  ;;  %v6429_v48 = vpack.c.bf16 %v2597_v31, %v10443_v25  ;;  %v10447_v0 = vld [vmem:[#allocation61_spill] sm:$0xff]  ;;  %v10449_v31 = vld [vmem:[#allocation118_spill] sm:$0xff]  ;;  %v10455_v38 = vld [vmem:[#allocation47_spill] sm:$0xff] }
 0x2d7   : > { %5309 = vmatpush1.msra.mxu1 %v10421_v12  ;;  %6408 = vmatpush1.bf16.msra.mxu0 %v10430_v41  ;;  %v2697_v14 = vsel %vm2694_vm9, %v10444_v40, %v10433_v3  ;;  %v2825_v6 = vrot.slane %v10431_v35, %v10401_v61  ;;  %v6415_v58 = vpack.c.bf16 %v2594_v11, %v10445_v1  ;;  %v10450_v60 = vunpack.i.h.bf16 %v10449_v31  ;;  %v10456_v49 = vld [vmem:[#allocation48_spill] sm:$0xff]  ;;  %v10457_v46 = vld [vmem:[#allocation49_spill] sm:$0xff] }
 0x2d8   : > { %5804 = vmatmul.mubr.msk.f32.vlgmr.msra.gmra.mrb[20].mxu1 %vm3645_vm12, %v9482_v18  ;;  %6422 = vmatprep.subr.bf16.mxu1 %v10427_v42  ;;  %v3154_v50 = vmul.f32 %v3097_v26, %v2977_v30  ;;  %v2695_v21 = vsel %vm2694_vm9, %v10432_v9, %v10446_v33  ;;  %v6431_v22 = vpack.c.bf16 %v2596_v29, %v10447_v0  ;;  %v10459_v0 = vld [vmem:[#allocation51_spill] sm:$0xff] }
 0x2d9   : > { %6424 = vmatpush1.bf16.msra.mxu1 %v6423_v5  ;;  %6410 = vmatprep.subr.bf16.mxu0 %v6409_v53  ;;  %v3156_v5 = vmul.f32 %v3105_v45, %v2975_v10  ;;  %v3381_v12 = vrot.slane %v10448_v52, %v10400_v55  ;;  %v2874_v54 = vmul.f32 %v2817_v24, %v2697_v14  ;;  %v9697_v47 = vpop.permute.xlu0 %1124  ;;  %v10458_v10 = vld [vmem:[#allocation50_spill] sm:$0xff] }
 0x2da   : > { %6426 = vmatprep.subr.bf16.mxu1 %v10436_v43  ;;  %5427 = vmatprep.mubr.f32.mxu0 %v10278_v8  ;;  %v3256_v27 = vsel %vm3254_vm11, %v3249_v63, %v3251_v17  ;;  %v3389_v53 = vrot.slane %v10448_v52, %v10415_v36  ;;  %v2876_v7 = vmul.f32 %v2825_v6, %v2695_v21 }
 0x2db   : > { %5498 = vmatprep.mubr.f32.mxu1 %v10278_v8  ;;  %6412 = vmatpush1.bf16.msra.mxu0 %v10442_v56  ;;  %v2875_v8 = vmul.f32 %v2821_v34, %v2696_v13  ;;  %v3278_v15 = vsel %vm3254_vm11, %v3253_v62, %v10450_v60  ;;  %v6419_v51 = vpack.c.bf16 %v3154_v50, %v2874_v54  ;;  %v10462_v60 = vld [vmem:[#allocation54_spill] sm:$0xff] }
 0x2dc   : > { %6414 = vmatprep.subr.bf16.mxu0 %v6413_v23  ;;  %v3377_v55 = vrot.slane %v10448_v52, %v10403_v44  ;;  %v10453_v42 = vpack.c.bf16 %v10451_v4, %v10452_v57  ;;  %v6435_v28 = vpack.c.bf16 %v3156_v5, %v2876_v7  ;;  %v3257_v36 = vsel %vm3254_vm11, %v10454_v20, %v3249_v63 }
 0x2dd   : > { %6428 = vmatpush1.bf16.msra.mxu1 %v6427_v2  ;;  %v6417_v32 = vpack.c.bf16 %v3155_v59, %v2875_v8  ;;  %v3435_v41 = vmul.f32 %v3381_v12, %v3256_v27  ;;  %v3385_v35 = vrot.slane %v10448_v52, %v10401_v61  ;;  %v3255_v34 = vsel %vm3254_vm11, %v3251_v17, %v3253_v62  ;;  %v10460_v12 = vld [vmem:[#allocation52_spill] sm:$0xff]  ;;  %v10461_v27 = vld [vmem:[#allocation53_spill] sm:$0xff] }
 0x2de   : > { %6430 = vmatprep.subr.bf16.mxu1 %v6429_v48  ;;  %v3437_v26 = vmul.f32 %v3389_v53, %v3278_v15  ;;  %v3434_v44 = vmul.f32 %v3377_v55, %v3257_v36  ;;  %v1129_v30 = vadd.f32 %v9697_v47, %v10456_v49  ;;  %v1128_v23 = vadd.f32 %v9697_v47, %v10457_v46 }
 0x2df   : > { %6416 = vmatpush1.bf16.msra.mxu0 %v6415_v58  ;;  %v3436_v45 = vmul.f32 %v3385_v35, %v3255_v34  ;;  %v1130_v19 = vadd.f32 %v9697_v47, %v10458_v10  ;;  %v1132_v53 = vadd.f32 %v9697_v47, %v10461_v27  ;;  %v1134_v15 = vadd.f32 %v9697_v47, %v10462_v60 }
 0x2e0   : > { %6418 = vmatprep.subr.bf16.mxu0 %v6417_v32  ;;  %v1133_v32 = vadd.f32 %v9697_v47, %v10460_v12 }
 0x2e1   : > { %6432 = vmatpush1.bf16.msra.mxu1 %v6431_v22  ;;  %v1131_v22 = vadd.f32 %v9697_v47, %v10459_v0  ;;  %v10469_v0 = vld [vmem:[#allocation16_spill] sm:$0xff] }
 0x2e2   : > { %6434 = vmatprep.subr.bf16.mxu1 %v10453_v42 }
 0x2e3   : > { %6420 = vmatpush1.bf16.msra.mxu0 %v6419_v51 }
 0x2e4   : > { %5379 = vmatprep.subr.mxu0 %v3435_v41 }
 0x2e5   : > { %6436 = vmatpush1.bf16.msra.mxu1 %v6435_v28 }
 0x2e6   : > { %5450 = vmatprep.subr.mxu1 %v3437_v26 }
 0x2e7   : > { %5380 = vmatpush1.msra.mxu0 %v3434_v44 }
 0x2e8   : > { %5805 = vmatmul.mubr.msk.f32.vlgmr.msra.gmra.mrb[22].mxu0 %vm3645_vm12, %v9482_v18 }
 0x2e9   : > { %5451 = vmatpush1.msra.mxu1 %v3436_v45 }
 0x2ea   : > { %5806 = vmatmul.mubr.msk.f32.vlgmr.msra.gmra.mrb[22].mxu1 %vm3645_vm12, %v9482_v18  ;;  %v1127_v18 = vadd.f32 %v9697_v47, %v10455_v38 }
 0x2ef   : > { %v9695_v61 = vpop.permute.xlu1 %5524 }
 0x385   : > { %v5003_v63 = vpop.f32.mrb[16].mxu0 }
 0x386   : > { %v5527_v2 = vadd.f32 %v9695_v61, %v5003_v63  ;;  %v5005_v9 = vpop.f32.mrb[17].mxu0 }
 0x387   : > { %v5074_v11 = vpop.f32.mrb[16].mxu1  ;;  %v5528_v13 = vadd.f32 %v9695_v61, %v5005_v9 }
 0x388   : > { %v5529_v3 = vadd.f32 %v9695_v61, %v5074_v11  ;;  %v5076_v16 = vpop.f32.mrb[17].mxu1  ;;  %v5543_v43 = vmax.f32 %v5527_v2, 0.0  ;;  %v10463_v11 = vld [vmem:[#allocation56_spill] sm:$0xff] }
 0x389   : > { %v5530_v29 = vadd.f32 %v9695_v61, %v5076_v16  ;;  %v5544_v24 = vmax.f32 %v5528_v13, 0.0  ;;  %v1135_v2 = vadd.f32 %v9697_v47, %v10463_v11  ;;  %v10464_v13 = vld [vmem:[#allocation57_spill] sm:$0xff] }
 0x38a   : > { %v5545_v59 = vmax.f32 %v5529_v3, 0.0  ;;  %v5575_v39 = vadd.f32 %v5543_v43, %v1127_v18  ;;  %v1137_v16 = vadd.f32 %v9697_v47, %v10464_v13  ;;  %v10465_v18 = vld [vmem:[#allocation58_spill] sm:$0xff] }
 0x38b   : > { %v5546_v37 = vmax.f32 %v5530_v29, 0.0  ;;  %v5576_v25 = vadd.f32 %v5544_v24, %v1128_v23  ;;  %v1136_v43 = vadd.f32 %v9697_v47, %v10465_v18 }
 0x38c   : > { %v5577_v56 = vadd.f32 %v5545_v59, %v1129_v30  ;;  %v5591_v48 = vmax.f32 %v5575_v39, 0.0  ;;  %v10466_v30 = vld [vmem:[#allocation59_spill] sm:$0xff] }
 0x38d   : > { %v5578_v40 = vadd.f32 %v5546_v37, %v1130_v19  ;;  %v5592_v8 = vmax.f32 %v5576_v25, 0.0  ;;  %v1138_v59 = vadd.f32 %v9697_v47, %v10466_v30 }
 0x38e   : > { %v5593_v14 = vmax.f32 %v5577_v56, 0.0  ;;  %5607 = vst [vmem:[%s9714_s7] sm:$0xff] %v5591_v48 }
 0x38f   : > { %v5594_v6 = vmax.f32 %v5578_v40, 0.0  ;;  %5608 = vst [vmem:[%s9714_s7 + $0x8] sm:$0xff] %v5592_v8 }
 0x390   : > { %5609 = vst [vmem:[%s9714_s7 + $0x10] sm:$0xff] %v5593_v14 }
 0x391   : > { %5610 = vst [vmem:[%s9714_s7 + $0x18] sm:$0xff] %v5594_v6 }
 0x397   : > { %v5145_v17 = vpop.f32.mrb[18].mxu0 }
 0x398   : > { %v5531_v1 = vadd.f32 %v9695_v61, %v5145_v17  ;;  %v5147_v50 = vpop.f32.mrb[19].mxu0 }
 0x399   : > { %v5216_v58 = vpop.f32.mrb[18].mxu1  ;;  %v5532_v21 = vadd.f32 %v9695_v61, %v5147_v50 }
 0x39a   : > { %v5533_v33 = vadd.f32 %v9695_v61, %v5216_v58  ;;  %v5218_v62 = vpop.f32.mrb[19].mxu1  ;;  %v5547_v5 = vmax.f32 %v5531_v1, 0.0  ;;  %v10467_v1 = vld [vmem:[#allocation14_spill] sm:$0xff] }
 0x39b   : > { %v5534_v52 = vadd.f32 %v9695_v61, %v5218_v62  ;;  %v5548_v7 = vmax.f32 %v5532_v21, 0.0  ;;  %v1139_v58 = vadd.f32 %v9697_v47, %v10467_v1  ;;  %v10468_v21 = vld [vmem:[#allocation20_spill] sm:$0xff] }
 0x39c   : > { %v5549_v54 = vmax.f32 %v5533_v33, 0.0  ;;  %v5579_v31 = vadd.f32 %v5547_v5, %v1131_v22  ;;  %v1140_v62 = vadd.f32 %v9697_v47, %v10468_v21  ;;  %v1141_v22 = vadd.f32 %v9697_v47, %v10469_v0 }
 0x39d   : > { %v5550_v51 = vmax.f32 %v5534_v52, 0.0  ;;  %v5580_v4 = vadd.f32 %v5548_v7, %v1132_v53 }
 0x39e   : > { %v5581_v55 = vadd.f32 %v5549_v54, %v1133_v32  ;;  %v5595_v57 = vmax.f32 %v5579_v31, 0.0  ;;  %v10470_v32 = vld [vmem:[#allocation18_spill] sm:$0xff] }
 0x39f   : > { %v5582_v42 = vadd.f32 %v5550_v51, %v1134_v15  ;;  %v5596_v20 = vmax.f32 %v5580_v4, 0.0  ;;  %v1142_v54 = vadd.f32 %v9697_v47, %v10470_v32 }
 0x3a0   : > { %v5597_v28 = vmax.f32 %v5581_v55, 0.0  ;;  %5611 = vst [vmem:[%s9714_s7 + $0x20] sm:$0xff] %v5595_v57 }
 0x3a1   : > { %v5598_v36 = vmax.f32 %v5582_v42, 0.0  ;;  %5612 = vst [vmem:[%s9714_s7 + $0x28] sm:$0xff] %v5596_v20 }
 0x3a2   : > { %5613 = vst [vmem:[%s9714_s7 + $0x30] sm:$0xff] %v5597_v28 }
 0x3a3   : > { %5614 = vst [vmem:[%s9714_s7 + $0x38] sm:$0xff] %v5598_v36 }
 0x3a9   : > { %v5287_v41 = vpop.f32.mrb[20].mxu0 }
 0x3aa   : > { %v5535_v35 = vadd.f32 %v9695_v61, %v5287_v41  ;;  %v5289_v26 = vpop.f32.mrb[21].mxu0 }
 0x3ab   : > { %v5358_v34 = vpop.f32.mrb[20].mxu1  ;;  %v5536_v45 = vadd.f32 %v9695_v61, %v5289_v26 }
 0x3ac   : > { %v5537_v44 = vadd.f32 %v9695_v61, %v5358_v34  ;;  %v5360_v63 = vpop.f32.mrb[21].mxu1  ;;  %v5551_v9 = vmax.f32 %v5535_v35, 0.0 }
 0x3ad   : > { %v5538_v3 = vadd.f32 %v9695_v61, %v5360_v63  ;;  %v5552_v29 = vmax.f32 %v5536_v45, 0.0 }
 0x3ae   : > { %v5553_v38 = vmax.f32 %v5537_v44, 0.0  ;;  %v5583_v49 = vadd.f32 %v5551_v9, %v1135_v2 }
 0x3af   : > { %v5554_v46 = vmax.f32 %v5538_v3, 0.0  ;;  %v5584_v24 = vadd.f32 %v5552_v29, %v1136_v43 }
 0x3b0   : > { %v5585_v23 = vadd.f32 %v5553_v38, %v1137_v16  ;;  %v5599_v39 = vmax.f32 %v5583_v49, 0.0 }
 0x3b1   : > { %v5586_v10 = vadd.f32 %v5554_v46, %v1138_v59  ;;  %v5600_v37 = vmax.f32 %v5584_v24, 0.0 }
 0x3b2   : > { %v5601_v19 = vmax.f32 %v5585_v23, 0.0  ;;  %5615 = vst [vmem:[%s9714_s7 + $0x40] sm:$0xff] %v5599_v39 }
 0x3b3   : > { %v5602_v56 = vmax.f32 %v5586_v10, 0.0  ;;  %5616 = vst [vmem:[%s9714_s7 + $0x48] sm:$0xff] %v5600_v37 }
 0x3b4   : > { %5617 = vst [vmem:[%s9714_s7 + $0x50] sm:$0xff] %v5601_v19 }
 0x3b5   : > { %5618 = vst [vmem:[%s9714_s7 + $0x58] sm:$0xff] %v5602_v56 }
 0x3bb   : > { %v5429_v25 = vpop.f32.mrb[22].mxu0 }
 0x3bc   : > { %v5539_v48 = vadd.f32 %v9695_v61, %v5429_v25  ;;  %v5431_v14 = vpop.f32.mrb[23].mxu0 }
 0x3bd   : > { %v5500_v40 = vpop.f32.mrb[22].mxu1  ;;  %v5540_v6 = vadd.f32 %v9695_v61, %v5431_v14 }
 0x3be   : > { %v5541_v8 = vadd.f32 %v9695_v61, %v5500_v40  ;;  %v5502_v17 = vpop.f32.mrb[23].mxu1  ;;  %v5555_v50 = vmax.f32 %v5539_v48, 0.0 }
 0x3bf   : > { %v5542_v33 = vadd.f32 %v9695_v61, %v5502_v17  ;;  %v5556_v52 = vmax.f32 %v5540_v6, 0.0 }
 0x3c0   : > { %v5557_v5 = vmax.f32 %v5541_v8, 0.0  ;;  %v5587_v12 = vadd.f32 %v5555_v50, %v1139_v58 }
 0x3c1   : > { %v5558_v27 = vmax.f32 %v5542_v33, 0.0  ;;  %v5588_v61 = vadd.f32 %v5556_v52, %v1140_v62 }
 0x3c2   : > { %v5589_v53 = vadd.f32 %v5557_v5, %v1141_v22  ;;  %v5603_v7 = vmax.f32 %v5587_v12, 0.0 }
 0x3c3   : > { %v5590_v31 = vadd.f32 %v5558_v27, %v1142_v54  ;;  %v5604_v15 = vmax.f32 %v5588_v61, 0.0 }
 0x3c4   : > { %v5605_v60 = vmax.f32 %v5589_v53, 0.0  ;;  %5619 = vst [vmem:[%s9714_s7 + $0x60] sm:$0xff] %v5603_v7 }
 0x3c5   : > { %v5606_v51 = vmax.f32 %v5590_v31, 0.0  ;;  %5620 = vst [vmem:[%s9714_s7 + $0x68] sm:$0xff] %v5604_v15 }
 0x3c6   : > { %5621 = vst [vmem:[%s9714_s7 + $0x70] sm:$0xff] %v5605_v60 }
 0x3c7   : > { %5622 = vst [vmem:[%s9714_s7 + $0x78] sm:$0xff] %v5606_v51 }
 0x3c8   : > { %6676 = shalt.err (!%p6673_p3)
}
 0x3c9   : > { %s6677_s26 = scalar_lea.hbm %s9770_s13, 2048  ;;  %s6681_s23 = scalar_lea.hbm %s9822_s5, 4096 }
 0x3ca   : > { %p6678_p4 = scmp.ne.s32.totalorder %s9770_s13, %s6677_s26  ;;  %p6682_p9 = scmp.lt.u32.totalorder %s9770_s13, %s9822_s5 }
 0x3cb   : > { %p6683_p10 = scmp.lt.u32.totalorder %s6681_s23, %s6677_s26  ;;  %p6685_p12 = scmp.lt.u32.totalorder %s6677_s26, %s9770_s13 }
 0x3cc   : > { %p6679_p7 = pnand %p6678_p4, %p6807_p5 }
 0x3cd   : > { %p6684_p11 = por %p6683_p10, %p6682_p9 }
 0x3ce   : > { %p6680_p8 = pneg %p6679_p7 }
 0x3cf   : > { %p6686_p13 = por %p6685_p12, %p6684_p11 }
 0x3d1   : > { %p6687_p0 = pnand %p6686_p13, %p6680_p8 }
 0x3d3   : > { %6690 = shalt.err (!%p6687_p0)
}
 0x3d4   : > { %6470 = dma.vmem_to_hbm [thread:$0]  (%p6807_p5), %s9772_s8, 2048, %s9770_s13, %s5624_s22  }
 0x3d5 PF: > { %p6476_p1 = scmp.ge.s32.totalorder %s6725_s21, 2  ;;  %s5650_s7 = sand.u32 1, %s6713_s18  }
 0x3d6   : > { %s5651_s6 = scalar_lea.sflag [#allocation5], %s5650_s7 }
 0x3d7   : > { %p6473_p2 = pnand %p6476_p1, %p6811_p6 }
 0x3d9   : > { %6708 = dma.done.wait (!%p6473_p2), %s5651_s6, 2048  }
 0x3da   : > { %6710 = vsyncadd (!%p6473_p2), %s5651_s6, 4294965248  ;;  %p15_p3 = scmp.ge.s32.totalorder %s6794_s24, 4   ;;  %s10471_s18 = smov %s6717_s19 }
 0x3db   : > { %s10472_s19 = smov %s6721_s20  ;;  %s10473_s20 = smov %s6805_s27 }
 0x3dc   : > { %s10474_s21 = smov %s6794_s24  ;;  %17 = sbr.rel (!%p15_p3) target bundleno = 3 (0x3), region = 100 }
 0x3e3   :  { %5656 = vsyncpa [#allocation5], 1 }
 0x3e4   :  { %5658 = vsyncpa [#allocation5 + $0x1], 1 }

</bundles_post_ra>
